<compile_context>
chip_gen: v5e
topology: v5e:2x2
jax: 0.10.0
libtpu: 0.0.40
codegen_flags: <defaults>
</compile_context>

<pallas_src>
import functools
import math

import jax
import jax.numpy as jnp
from jax import lax
from jax.experimental import pallas as pl
from jax.experimental.pallas import tpu as pltpu


def _round_up(x, m):
    return (x + m - 1) // m * m


def _vmem_ceiling_bytes():
    """Generation-aware VMEM cap: ~3/4 of physical (96 MiB on 128-MiB chips, 48 MiB on v7x)."""
    try:
        info = pltpu.get_tpu_info()
        for attr in ("vmem_capacity_bytes", "vmem_size_bytes", "vmem_bytes"):
            cap = getattr(info, attr, None)
            if cap:
                return int(cap) * 3 // 4
    except Exception:
        pass
    return 48 * 1024 * 1024   # safe on every generation (v7x has 64 MiB per TC)


# ---------------------------------------------------------------------------
# Kernel 1: un-fused linear projection, big M-tiled GEMM + per-tile partial sum
# ---------------------------------------------------------------------------
def _proj_kernel(x_ref, w_ref, b_ref, y_ref, ps_ref):
    x = x_ref[...].astype(jnp.bfloat16)                              # (tm, C)
    y = jnp.dot(x, w_ref[...], preferred_element_type=jnp.float32) + b_ref[...]
    y_ref[...] = y                                                   # (tm, C4)
    ps_ref[...] = jnp.sum(y).reshape(1, 1, 1)                        # centering partial sum


def _pick_tile(m, target):
    """Largest multiple-of-8 divisor of m that is <= target (avoids output padding)."""
    if m <= target:
        return m
    t = (target // 8) * 8
    while t >= 8:
        if m % t == 0:
            return t
        t -= 8
    return (target // 8) * 8   # fallback: pad (handled exactly by the mean correction)


def _project(x2d, w_bf16, b_row, tm_target=1024):
    m, c = x2d.shape
    c_out = w_bf16.shape[1]
    tm = _pick_tile(m, tm_target)
    m_pad = _round_up(m, tm)
    pad = m_pad - m
    if pad:
        x2d = jnp.pad(x2d, ((0, pad), (0, 0)))
    n_tiles = m_pad // tm

    y, ps = pl.pallas_call(
        _proj_kernel,
        out_shape=(jax.ShapeDtypeStruct((m_pad, c_out), jnp.float32),
                   jax.ShapeDtypeStruct((n_tiles, 1, 1), jnp.float32)),
        grid=(n_tiles,),
        in_specs=[
            pl.BlockSpec((tm, c), lambda i: (i, 0)),
            pl.BlockSpec((c, c_out), lambda i: (0, 0)),
            pl.BlockSpec((1, c_out), lambda i: (0, 0)),
        ],
        out_specs=(
            pl.BlockSpec((tm, c_out), lambda i: (i, 0)),
            pl.BlockSpec((1, 1, 1), lambda i: (i, 0, 0)),
        ),
        compiler_params=pltpu.CompilerParams(dimension_semantics=("parallel",)),
    )(x2d, w_bf16, b_row)
    return y, ps, pad


# ---------------------------------------------------------------------------
# Kernel 2: group softmax (fused exp/denominator/aggregate) + in-kernel W_r prior
# ---------------------------------------------------------------------------
def _attn_kernel(scal_ref, qm_ref, km_ref, wr_ref, s_ref, out_ref,
                 sims_ref, qc_ref, *, inv_hq, group, batch, unroll):
    b = pl.program_id(0)
    mq = scal_ref[0]            # global mean of W_q(query)   (SMEM scalar)
    mk = scal_ref[1]            # global mean of W_k(support) (SMEM scalar)
    br = scal_ref[2]            # W_r bias                    (SMEM scalar)

    # prologue: center + bf16-cast the B distinct query projections ONCE per group
    qc_ref[...] = (qm_ref[...] - mq).astype(jnp.bfloat16)

    # pass 1: centered similarity logits -> VMEM scratch, running group max
    def sim_body(g, gmax):
        qi = (b * group + g) % batch                                  # torch repeat order
        qc = qc_ref[qi]                                               # (Lq, C4) bf16
        kc = (km_ref[g] - mk).astype(jnp.bfloat16)                    # (Ls, C4) bf16
        sim = lax.dot_general(qc, kc, (((1,), (1,)), ((), ())),
                              preferred_element_type=jnp.float32) * inv_hq
        sims_ref[g] = sim
        return jnp.maximum(gmax, jnp.max(sim))

    gmax = lax.fori_loop(0, group, sim_body, jnp.float32(-jnp.inf), unroll=unroll)

    # pass 2 (fused): exp, accumulate group denominator, write UNSCALED p @ support
    def acc_body(g, tot):
        p = jnp.exp(sims_ref[g] - gmax)                               # (Lq, Ls) f32
        out_ref[g] = jnp.dot(p.astype(jnp.bfloat16),
                             s_ref[g].astype(jnp.bfloat16),
                             preferred_element_type=jnp.float32)      # (Lq, C)
        return tot + jnp.sum(p)

    total = lax.fori_loop(0, group, acc_body, jnp.float32(0.0), unroll=unroll)
    inv_total = 1.0 / total.reshape(1, 1)          # exact scalar divide, once per group

    # epilogue: rescale + W_r self-attention prior (0.1 * softmax over Ls), computed
    # in f32 from the already-resident support block.
    def fin_body(g, carry):
        s = s_ref[g]                                                  # (Ls, C) f32
        r = jnp.sum(s * wr_ref[...], axis=1, keepdims=True) + br      # (Ls, 1)
        e = jnp.exp(r - jnp.max(r))
        r_soft = e * (1.0 / jnp.sum(e).reshape(1, 1))                 # (Ls, 1)
        prior = 0.1 * jnp.sum(s * r_soft, axis=0, keepdims=True)      # (1, C)
        out_ref[g] = out_ref[g] * inv_total + prior
        return carry

    lax.fori_loop(0, group, fin_body, jnp.int32(0), unroll=unroll)


# ---------------------------------------------------------------------------
# Forward wrapper
# ---------------------------------------------------------------------------
def make_cisa_forward(params, k_shot):
    wq, bq, wk, bk, wr, br = params
    C, C4 = wq.shape
    wq_bf = wq.astype(jnp.bfloat16)
    wk_bf = wk.astype(jnp.bfloat16)
    bq_row = bq.reshape(1, C4).astype(jnp.float32)
    bk_row = bk.reshape(1, C4).astype(jnp.float32)
    wr_row = wr.reshape(1, C).astype(jnp.float32)
    vmem_cap = _vmem_ceiling_bytes()

    def forward(query, support):
        B, _, Hq, Wq = query.shape
        K = k_shot
        n0 = support.shape[0]
        # torch: repeat_interleave support over the batch when needed
        if n0 // K == B or n0 % (B * K) != 0:
            support = jnp.repeat(support, B, axis=0)
        N, _, Hs, Ws = support.shape
        Lq, Ls = Hq * Wq, Hs * Ws
        G = N // B
        n_cls = G // K

        # glue: NCHW -> token-major.  Only the B DISTINCT queries are projected; the
        # torch tiling is uniform so the global mean and query_aligned never need it.
        q_flat = query.reshape(B, C, Lq).transpose(0, 2, 1)           # (B, Lq, C)
        s_flat = support.reshape(N, C, Ls).transpose(0, 2, 1)         # (N, Ls, C)

        # ---- kernel 1: W_q / W_k projections (un-fused, lane-width = C4) ----
        yq, psq, pad_q = _project(q_flat.reshape(B * Lq, C), wq_bf, bq_row)
        ys, pss, pad_s = _project(s_flat.reshape(N * Ls, C), wk_bf, bk_row)

        # global scalar means (padded zero-rows contribute exactly the bias)
        mean_q = (psq.sum() - pad_q * jnp.sum(bq)) / (B * Lq * C4)
        mean_k = (pss.sum() - pad_s * jnp.sum(bk)) / (N * Ls * C4)
        scal = jnp.stack([mean_q, mean_k,
                          jnp.asarray(br, jnp.float32)]).astype(jnp.float32)  # -> SMEM

        qm = (yq if pad_q == 0 else yq[:B * Lq]).reshape(B, Lq, C4)
        km = (ys if pad_s == 0 else ys[:N * Ls]).reshape(N, Ls, C4)

        # footprint-aware unroll of the in-kernel per-item loops
        if G <= 8 and Lq * Ls <= 128 * 128:
            unroll = True
        else:
            unroll = min(4, G)

        blk = 4 * (B * Lq * C4 + G * Ls * C4 + C + G * Ls * C + G * Lq * C)
        scratch = 4 * G * Lq * Ls + 2 * B * Lq * C4
        vmem_limit = int(min(vmem_cap, max(16 << 20, 2 * blk + scratch + (2 << 20))))
        # TODO(synk): chunk G with a two-phase (stats, then normalize+aggregate)
        #             structure when the scratch/blocks outgrow v7x's 64 MiB VMEM and
        #             to keep both v7x TensorCores busy when B == 1 or odd.

        attn = functools.partial(_attn_kernel, inv_hq=1.0 / Hq, group=G,
                                 batch=B, unroll=unroll)
        sa_flat = pl.pallas_call(
            attn,
            out_shape=jax.ShapeDtypeStruct((N, Lq, C), jnp.float32),
            grid=(B,),
            in_specs=[
                pl.BlockSpec(memory_space=pltpu.MemorySpace.SMEM),       # [mq, mk, br]
                pl.BlockSpec((B, Lq, C4), lambda b: (0, 0, 0)),          # compact W_q(query)
                pl.BlockSpec((G, Ls, C4), lambda b: (b, 0, 0)),          # W_k(support) group
                pl.BlockSpec((1, C), lambda b: (0, 0)),                  # W_r weight row
                pl.BlockSpec((G, Ls, C), lambda b: (b, 0, 0)),           # support group
            ],
            out_specs=pl.BlockSpec((G, Lq, C), lambda b: (b, 0, 0)),
            scratch_shapes=[pltpu.VMEM((G, Lq, Ls), jnp.float32),        # sim logits
                            pltpu.VMEM((B, Lq, C4), jnp.bfloat16)],      # centered queries
            compiler_params=pltpu.CompilerParams(
                dimension_semantics=("parallel",),
                vmem_limit_bytes=vmem_limit),
        )(scal, qm, km, wr_row, s_flat)

        # glue: reshape back, K-shot mean, permute to output layouts
        sa = (sa_flat.reshape(n_cls, K, B, Hq, Wq, C)
              .mean(axis=1).transpose(0, 1, 4, 2, 3))                    # (n_cls, B, C, H, W)
        # query_aligned == original query broadcast over classes (K-mean of identical
        # tiled copies) -- computed directly, no projection / HBM round trip.
        qa = jnp.broadcast_to(query[:, None], (B, n_cls, C, Hq, Wq))
        return qa, sa

    return jax.jit(forward)


# ---------------------------------------------------------------------------
# Pure-JAX reference (faithful reproduction of the PyTorch forward)
# ---------------------------------------------------------------------------
def cisa_reference(query, support, params, K):
    wq, bq, wk, bk, wr, br = params
    B, C, Hq, Wq = query.shape
    n0 = support.shape[0]
    if n0 // K == B or n0 % (B * K) != 0:
        support = jnp.repeat(support, B, axis=0)
    N, _, Hs, Ws = support.shape
    hi = jax.lax.Precision.HIGHEST
    q = jnp.tile(query, (N // B, 1, 1, 1)).reshape(N, C, Hq * Wq).transpose(0, 2, 1)
    s = support.reshape(N, C, Hs * Ws).transpose(0, 2, 1)
    qm = jnp.einsum('nlc,cd->nld', q, wq, precision=hi) + bq
    km = jnp.einsum('nlc,cd->nld', s, wk, precision=hi) + bk
    qm = qm - qm.mean()
    km = km - km.mean()
    sim = jnp.einsum('nqc,nkc->nqk', qm, km, precision=hi) / Hq
    sim = jax.nn.softmax(sim.reshape(B, -1), axis=-1).reshape(sim.shape)
    r = jnp.einsum('nlc,c->nl', s, wr, precision=hi) + br
    r_soft = jax.nn.softmax(r, axis=-1)
    sim = sim + 0.1 * r_soft[:, None, :]
    sa = jnp.einsum('nqk,nkc->nqc', sim, s, precision=hi)
    n_cls = N // B // K
    sa = sa.reshape(n_cls, K, B, Hq, Wq, C).mean(axis=1).transpose(0, 1, 4, 2, 3)
    qa = q.reshape(n_cls, K, B, Hq, Wq, C).mean(axis=1).transpose(1, 0, 4, 2, 3)
    return qa, sa


if __name__ == "__main__":
    # small shapes consistent with the module (in_ch=32 instead of 256)
    B, C, Hq, Wq = 2, 32, 8, 8
    Hs, Ws = 8, 8
    K_SHOT = 2
    N_CLS = 2
    C4 = C // 4

    key = jax.random.PRNGKey(0)
    kq, ks, kw = jax.random.split(key, 3)
    query = jax.random.normal(kq, (B, C, Hq, Wq), dtype=jnp.float32)
    support = jax.random.normal(ks, (N_CLS * K_SHOT, C, Hs, Ws), dtype=jnp.float32)

    # deterministic nn.Linear-style params (weights stored transposed: (in, out))
    bound = 1.0 / math.sqrt(C)
    wkeys = jax.random.split(kw, 6)
    wq = jax.random.uniform(wkeys[0], (C, C4), jnp.float32, -bound, bound)
    bq = jax.random.uniform(wkeys[1], (C4,), jnp.float32, -bound, bound)
    wk = jax.random.uniform(wkeys[2], (C, C4), jnp.float32, -bound, bound)
    bk = jax.random.uniform(wkeys[3], (C4,), jnp.float32, -bound, bound)
    wr = jax.random.uniform(wkeys[4], (C,), jnp.float32, -bound, bound)
    br = jax.random.uniform(wkeys[5], (), jnp.float32, -bound, bound)
    params = (wq, bq, wk, bk, wr, br)

    forward = make_cisa_forward(params, K_SHOT)
    query_p1, support_p1 = forward(query, support)
    jax.block_until_ready((query_p1, support_p1))

    assert query_p1.shape == (B, N_CLS, C, Hq, Wq)
    assert support_p1.shape == (N_CLS, B, C, Hq, Wq)

    qa_ref, sa_ref = cisa_reference(query, support, params, K_SHOT)
    # bf16 MXU feeds with f32 accumulation: measured error << 5e-3 at these shapes
    assert jnp.allclose(query_p1, qa_ref, atol=5e-3, rtol=5e-3)
    assert jnp.allclose(support_p1, sa_ref, atol=5e-3, rtol=5e-3)

    print("KERNEL_OK")
</pallas_src>

<mosaic_0001>
module attributes {stable_mosaic.version = 11 : i64} {
  func.func @_proj_kernel(%arg0: i32, %arg1: memref<128x32xf32, #tpu.memory_space<vmem>>, %arg2: memref<32x8xbf16, #tpu.memory_space<vmem>>, %arg3: memref<1x8xf32, #tpu.memory_space<vmem>>, %arg4: memref<128x8xf32, #tpu.memory_space<vmem>>, %arg5: memref<1x1x1xf32, #tpu.memory_space<vmem>>) attributes {dimension_semantics = [#tpu.dimension_semantics<parallel>], iteration_bounds = array<i64: 1>, scalar_prefetch = 0 : i64, scratch_operands = 0 : i64, tpu.core_type = #tpu.core_type<tc>, window_params = [{transform_indices = @transform_0, window_bounds = array<i64: 128, 32>}, {pipeline_mode = #tpu.pipeline_mode<synchronous>, transform_indices = @transform_1, window_bounds = array<i64: 32, 8>}, {pipeline_mode = #tpu.pipeline_mode<synchronous>, transform_indices = @transform_2, window_bounds = array<i64: 1, 8>}, {transform_indices = @transform_3, window_bounds = array<i64: 128, 8>}, {transform_indices = @transform_4, window_bounds = array<i64: 1, 1, 1>}]} {
    %c0 = arith.constant 0 : index
    %c0_0 = arith.constant 0 : index
    %0 = vector.load %arg1[%c0, %c0_0] : memref<128x32xf32, #tpu.memory_space<vmem>>, vector<128x32xf32>
    %1 = arith.truncf %0 : vector<128x32xf32> to vector<128x32xbf16>
    %c0_1 = arith.constant 0 : index
    %c0_2 = arith.constant 0 : index
    %2 = vector.load %arg2[%c0_1, %c0_2] : memref<32x8xbf16, #tpu.memory_space<vmem>>, vector<32x8xbf16>
    %cst = arith.constant dense<0.000000e+00> : vector<128x8xf32>
    %3 = tpu.matmul %1, %2, %cst {dimension_numbers = #tpu.dot_dimension_numbers<[1], [0], [0], [1], [0, 0, 1, 1], [], []>} : vector<128x32xbf16>, vector<32x8xbf16>, vector<128x8xf32> -> vector<128x8xf32>
    %c0_3 = arith.constant 0 : index
    %c0_4 = arith.constant 0 : index
    %4 = vector.load %arg3[%c0_3, %c0_4] : memref<1x8xf32, #tpu.memory_space<vmem>>, vector<1x8xf32>
    %5 = vector.broadcast %4 : vector<1x8xf32> to vector<128x8xf32>
    %6 = arith.addf %3, %5 : vector<128x8xf32>
    %c0_5 = arith.constant 0 : index
    %c0_6 = arith.constant 0 : index
    %7 = vector.load %arg4[%c0_5, %c0_6] : memref<128x8xf32, #tpu.memory_space<vmem>>, vector<128x8xf32>
    tpu.vector_store %arg4[%c0_5, %c0_6], %6 {strides = array<i32>} : memref<128x8xf32, #tpu.memory_space<vmem>>, vector<128x8xf32>,
    %8 = vector.shape_cast %6 : vector<128x8xf32> to vector<1x128x8xf32>
    %cst_7 = arith.constant dense<0.000000e+00> : vector<1xf32>
    %9 = vector.multi_reduction <add>, %8, %cst_7 [1, 2] : vector<1x128x8xf32> to vector<1xf32>
    %10 = vector.shape_cast %9 : vector<1xf32> to vector<1x1x1xf32>
    %11 = vector.extract %10[0, 0, 0] : f32 from vector<1x1x1xf32>
    %12 = vector.broadcast %11 : f32 to vector<1x1x1xf32>
    %c0_8 = arith.constant 0 : index
    %c0_9 = arith.constant 0 : index
    %c0_10 = arith.constant 0 : index
    %13 = vector.load %arg5[%c0_8, %c0_9, %c0_10] : memref<1x1x1xf32, #tpu.memory_space<vmem>>, vector<1x1x1xf32>
    tpu.vector_store %arg5[%c0_8, %c0_9, %c0_10], %12 {strides = array<i32>} : memref<1x1x1xf32, #tpu.memory_space<vmem>>, vector<1x1x1xf32>,
    return
  }
  func.func @transform_0(%arg0: i32) -> (i32, i32) {
    %c0_i32 = arith.constant 0 : i32
    %c0_i32_0 = arith.constant 0 : i32
    return %arg0, %c0_i32 : i32, i32
  }
  func.func @transform_1(%arg0: i32) -> (i32, i32) {
    %c0_i32 = arith.constant 0 : i32
    %c0_i32_0 = arith.constant 0 : i32
    %c0_i32_1 = arith.constant 0 : i32
    return %c0_i32, %c0_i32_0 : i32, i32
  }
  func.func @transform_2(%arg0: i32) -> (i32, i32) {
    %c0_i32 = arith.constant 0 : i32
    %c0_i32_0 = arith.constant 0 : i32
    %c0_i32_1 = arith.constant 0 : i32
    return %c0_i32, %c0_i32_0 : i32, i32
  }
  func.func @transform_3(%arg0: i32) -> (i32, i32) {
    %c0_i32 = arith.constant 0 : i32
    %c0_i32_0 = arith.constant 0 : i32
    return %arg0, %c0_i32 : i32, i32
  }
  func.func @transform_4(%arg0: i32) -> (i32, i32, i32) {
    %c0_i32 = arith.constant 0 : i32
    %c0_i32_0 = arith.constant 0 : i32
    %c0_i32_1 = arith.constant 0 : i32
    return %arg0, %c0_i32, %c0_i32_0 : i32, i32, i32
  }
}

module attributes {stable_mosaic.version = 11 : i64} {
  func.func @_proj_kernel(%arg0: i32, %arg1: memref<512x32xf32, #tpu.memory_space<vmem>>, %arg2: memref<32x8xbf16, #tpu.memory_space<vmem>>, %arg3: memref<1x8xf32, #tpu.memory_space<vmem>>, %arg4: memref<512x8xf32, #tpu.memory_space<vmem>>, %arg5: memref<1x1x1xf32, #tpu.memory_space<vmem>>) attributes {dimension_semantics = [#tpu.dimension_semantics<parallel>], iteration_bounds = array<i64: 1>, scalar_prefetch = 0 : i64, scratch_operands = 0 : i64, tpu.core_type = #tpu.core_type<tc>, window_params = [{transform_indices = @transform_0, window_bounds = array<i64: 512, 32>}, {pipeline_mode = #tpu.pipeline_mode<synchronous>, transform_indices = @transform_1, window_bounds = array<i64: 32, 8>}, {pipeline_mode = #tpu.pipeline_mode<synchronous>, transform_indices = @transform_2, window_bounds = array<i64: 1, 8>}, {transform_indices = @transform_3, window_bounds = array<i64: 512, 8>}, {transform_indices = @transform_4, window_bounds = array<i64: 1, 1, 1>}]} {
    %c0 = arith.constant 0 : index
    %c0_0 = arith.constant 0 : index
    %0 = vector.load %arg1[%c0, %c0_0] : memref<512x32xf32, #tpu.memory_space<vmem>>, vector<512x32xf32>
    %1 = arith.truncf %0 : vector<512x32xf32> to vector<512x32xbf16>
    %c0_1 = arith.constant 0 : index
    %c0_2 = arith.constant 0 : index
    %2 = vector.load %arg2[%c0_1, %c0_2] : memref<32x8xbf16, #tpu.memory_space<vmem>>, vector<32x8xbf16>
    %cst = arith.constant dense<0.000000e+00> : vector<512x8xf32>
    %3 = tpu.matmul %1, %2, %cst {dimension_numbers = #tpu.dot_dimension_numbers<[1], [0], [0], [1], [0, 0, 1, 1], [], []>} : vector<512x32xbf16>, vector<32x8xbf16>, vector<512x8xf32> -> vector<512x8xf32>
    %c0_3 = arith.constant 0 : index
    %c0_4 = arith.constant 0 : index
    %4 = vector.load %arg3[%c0_3, %c0_4] : memref<1x8xf32, #tpu.memory_space<vmem>>, vector<1x8xf32>
    %5 = vector.broadcast %4 : vector<1x8xf32> to vector<512x8xf32>
    %6 = arith.addf %3, %5 : vector<512x8xf32>
    %c0_5 = arith.constant 0 : index
    %c0_6 = arith.constant 0 : index
    %7 = vector.load %arg4[%c0_5, %c0_6] : memref<512x8xf32, #tpu.memory_space<vmem>>, vector<512x8xf32>
    tpu.vector_store %arg4[%c0_5, %c0_6], %6 {strides = array<i32>} : memref<512x8xf32, #tpu.memory_space<vmem>>, vector<512x8xf32>,
    %8 = vector.shape_cast %6 : vector<512x8xf32> to vector<1x512x8xf32>
    %cst_7 = arith.constant dense<0.000000e+00> : vector<1xf32>
    %9 = vector.multi_reduction <add>, %8, %cst_7 [1, 2] : vector<1x512x8xf32> to vector<1xf32>
    %10 = vector.shape_cast %9 : vector<1xf32> to vector<1x1x1xf32>
    %11 = vector.extract %10[0, 0, 0] : f32 from vector<1x1x1xf32>
    %12 = vector.broadcast %11 : f32 to vector<1x1x1xf32>
    %c0_8 = arith.constant 0 : index
    %c0_9 = arith.constant 0 : index
    %c0_10 = arith.constant 0 : index
    %13 = vector.load %arg5[%c0_8, %c0_9, %c0_10] : memref<1x1x1xf32, #tpu.memory_space<vmem>>, vector<1x1x1xf32>
    tpu.vector_store %arg5[%c0_8, %c0_9, %c0_10], %12 {strides = array<i32>} : memref<1x1x1xf32, #tpu.memory_space<vmem>>, vector<1x1x1xf32>,
    return
  }
  func.func @transform_0(%arg0: i32) -> (i32, i32) {
    %c0_i32 = arith.constant 0 : i32
    %c0_i32_0 = arith.constant 0 : i32
    return %arg0, %c0_i32 : i32, i32
  }
  func.func @transform_1(%arg0: i32) -> (i32, i32) {
    %c0_i32 = arith.constant 0 : i32
    %c0_i32_0 = arith.constant 0 : i32
    %c0_i32_1 = arith.constant 0 : i32
    return %c0_i32, %c0_i32_0 : i32, i32
  }
  func.func @transform_2(%arg0: i32) -> (i32, i32) {
    %c0_i32 = arith.constant 0 : i32
    %c0_i32_0 = arith.constant 0 : i32
    %c0_i32_1 = arith.constant 0 : i32
    return %c0_i32, %c0_i32_0 : i32, i32
  }
  func.func @transform_3(%arg0: i32) -> (i32, i32) {
    %c0_i32 = arith.constant 0 : i32
    %c0_i32_0 = arith.constant 0 : i32
    return %arg0, %c0_i32 : i32, i32
  }
  func.func @transform_4(%arg0: i32) -> (i32, i32, i32) {
    %c0_i32 = arith.constant 0 : i32
    %c0_i32_0 = arith.constant 0 : i32
    %c0_i32_1 = arith.constant 0 : i32
    return %arg0, %c0_i32, %c0_i32_0 : i32, i32, i32
  }
}

module attributes {stable_mosaic.version = 11 : i64} {
  func.func @_attn_kernel(%arg0: i32, %arg1: memref<3xf32, #tpu.memory_space<smem>>, %arg2: memref<2x64x8xf32, #tpu.memory_space<vmem>>, %arg3: memref<4x64x8xf32, #tpu.memory_space<vmem>>, %arg4: memref<1x32xf32, #tpu.memory_space<vmem>>, %arg5: memref<4x64x32xf32, #tpu.memory_space<vmem>>, %arg6: memref<4x64x32xf32, #tpu.memory_space<vmem>>, %arg7: memref<4x64x64xf32, #tpu.memory_space<vmem>>, %arg8: memref<2x64x8xbf16, #tpu.memory_space<vmem>>) attributes {dimension_semantics = [#tpu.dimension_semantics<parallel>], iteration_bounds = array<i64: 2>, scalar_prefetch = 0 : i64, scratch_operands = 2 : i64, tpu.core_type = #tpu.core_type<tc>, window_params = [{transform_indices = @transform_0, window_bounds = array<i64: 3>}, {pipeline_mode = #tpu.pipeline_mode<synchronous>, transform_indices = @transform_1, window_bounds = array<i64: 2, 64, 8>}, {transform_indices = @transform_2, window_bounds = array<i64: 4, 64, 8>}, {pipeline_mode = #tpu.pipeline_mode<synchronous>, transform_indices = @transform_3, window_bounds = array<i64: 1, 32>}, {transform_indices = @transform_4, window_bounds = array<i64: 4, 64, 32>}, {transform_indices = @transform_5, window_bounds = array<i64: 4, 64, 32>}]} {
    %c0 = arith.constant 0 : index
    %0 = memref.load %arg1[%c0] : memref<3xf32, #tpu.memory_space<smem>>
    %c1 = arith.constant 1 : index
    %1 = memref.load %arg1[%c1] : memref<3xf32, #tpu.memory_space<smem>>
    %c2 = arith.constant 2 : index
    %2 = memref.load %arg1[%c2] : memref<3xf32, #tpu.memory_space<smem>>
    %c0_0 = arith.constant 0 : index
    %c0_1 = arith.constant 0 : index
    %c0_2 = arith.constant 0 : index
    %3 = vector.load %arg2[%c0_0, %c0_1, %c0_2] : memref<2x64x8xf32, #tpu.memory_space<vmem>>, vector<2x64x8xf32>
    %4 = vector.broadcast %0 : f32 to vector<2x64x8xf32>
    %5 = arith.subf %3, %4 : vector<2x64x8xf32>
    %6 = arith.truncf %5 : vector<2x64x8xf32> to vector<2x64x8xbf16>
    %c0_3 = arith.constant 0 : index
    %c0_4 = arith.constant 0 : index
    %c0_5 = arith.constant 0 : index
    %7 = vector.load %arg8[%c0_3, %c0_4, %c0_5] : memref<2x64x8xbf16, #tpu.memory_space<vmem>>, vector<2x64x8xbf16>
    tpu.vector_store %arg8[%c0_3, %c0_4, %c0_5], %6 {strides = array<i32>} : memref<2x64x8xbf16, #tpu.memory_space<vmem>>, vector<2x64x8xbf16>,
    %cst = arith.constant 0xFF800000 : f32
    %c0_i32 = arith.constant 0 : i32
    %c4_i32 = arith.constant 4 : i32
    %8 = arith.muli %arg0, %c4_i32 : i32
    %9 = arith.addi %8, %c0_i32 : i32
    %c2_i32 = arith.constant 2 : i32
    %c0_i32_6 = arith.constant 0 : i32
    %10 = arith.cmpi eq, %c2_i32, %c0_i32_6 : i32
    %c1_i32 = arith.constant 1 : i32
    %11 = arith.select %10, %c1_i32, %c2_i32 : i32
    %12 = arith.remsi %9, %11 : i32
    %c0_i32_7 = arith.constant 0 : i32
    %13 = arith.cmpi ne, %12, %c0_i32_7 : i32
    %c0_i32_8 = arith.constant 0 : i32
    %14 = arith.cmpi slt, %12, %c0_i32_8 : i32
    %c0_i32_9 = arith.constant 0 : i32
    %15 = arith.cmpi slt, %11, %c0_i32_9 : i32
    %16 = arith.xori %14, %15 : i1
    %17 = arith.andi %16, %13 : i1
    %18 = arith.addi %12, %11 : i32
    %19 = arith.select %17, %18, %12 : i32
    %20 = arith.index_cast %19 : i32 to index
    %c0_10 = arith.constant 0 : index
    %c0_11 = arith.constant 0 : index
    %21 = vector.load %arg8[%20, %c0_10, %c0_11] : memref<2x64x8xbf16, #tpu.memory_space<vmem>>, vector<1x64x8xbf16>
    %22 = vector.shape_cast %21 : vector<1x64x8xbf16> to vector<64x8xbf16>
    %23 = arith.index_cast %c0_i32 : i32 to index
    %c0_12 = arith.constant 0 : index
    %c0_13 = arith.constant 0 : index
    %24 = vector.load %arg3[%23, %c0_12, %c0_13] : memref<4x64x8xf32, #tpu.memory_space<vmem>>, vector<1x64x8xf32>
    %25 = vector.shape_cast %24 : vector<1x64x8xf32> to vector<64x8xf32>
    %26 = vector.broadcast %1 : f32 to vector<64x8xf32>
    %27 = arith.subf %25, %26 : vector<64x8xf32>
    %28 = arith.truncf %27 : vector<64x8xf32> to vector<64x8xbf16>
    %cst_14 = arith.constant dense<0.000000e+00> : vector<64x64xf32>
    %29 = tpu.matmul %22, %28, %cst_14 {dimension_numbers = #tpu.dot_dimension_numbers<[1], [1], [0], [0], [0, 0, 1, 0], [], []>} : vector<64x8xbf16>, vector<64x8xbf16>, vector<64x64xf32> -> vector<64x64xf32>
    %cst_15 = arith.constant 1.250000e-01 : f32
    %30 = vector.broadcast %cst_15 : f32 to vector<64x64xf32>
    %31 = arith.mulf %29, %30 : vector<64x64xf32>
    %32 = arith.index_cast %c0_i32 : i32 to index
    %c0_16 = arith.constant 0 : index
    %c0_17 = arith.constant 0 : index
    %33 = vector.load %arg7[%32, %c0_16, %c0_17] : memref<4x64x64xf32, #tpu.memory_space<vmem>>, vector<1x64x64xf32>
    %34 = vector.shape_cast %33 : vector<1x64x64xf32> to vector<64x64xf32>
    %35 = vector.shape_cast %31 : vector<64x64xf32> to vector<1x64x64xf32>
    tpu.vector_store %arg7[%32, %c0_16, %c0_17], %35 {strides = array<i32>} : memref<4x64x64xf32, #tpu.memory_space<vmem>>, vector<1x64x64xf32>,
    %36 = vector.shape_cast %31 : vector<64x64xf32> to vector<1x64x64xf32>
    %cst_18 = arith.constant dense<0xFF800000> : vector<1xf32>
    %37 = vector.multi_reduction <maximumf>, %36, %cst_18 [1, 2] : vector<1x64x64xf32> to vector<1xf32>
    %38 = vector.shape_cast %37 : vector<1xf32> to vector<1x1x1xf32>
    %39 = vector.extract %38[0, 0, 0] : f32 from vector<1x1x1xf32>
    %40 = arith.maximumf %cst, %39 : f32
    %c1_i32_19 = arith.constant 1 : i32
    %c4_i32_20 = arith.constant 4 : i32
    %41 = arith.muli %arg0, %c4_i32_20 : i32
    %42 = arith.addi %41, %c1_i32_19 : i32
    %c2_i32_21 = arith.constant 2 : i32
    %c0_i32_22 = arith.constant 0 : i32
    %43 = arith.cmpi eq, %c2_i32_21, %c0_i32_22 : i32
    %c1_i32_23 = arith.constant 1 : i32
    %44 = arith.select %43, %c1_i32_23, %c2_i32_21 : i32
    %45 = arith.remsi %42, %44 : i32
    %c0_i32_24 = arith.constant 0 : i32
    %46 = arith.cmpi ne, %45, %c0_i32_24 : i32
    %c0_i32_25 = arith.constant 0 : i32
    %47 = arith.cmpi slt, %45, %c0_i32_25 : i32
    %c0_i32_26 = arith.constant 0 : i32
    %48 = arith.cmpi slt, %44, %c0_i32_26 : i32
    %49 = arith.xori %47, %48 : i1
    %50 = arith.andi %49, %46 : i1
    %51 = arith.addi %45, %44 : i32
    %52 = arith.select %50, %51, %45 : i32
    %53 = arith.index_cast %52 : i32 to index
    %c0_27 = arith.constant 0 : index
    %c0_28 = arith.constant 0 : index
    %54 = vector.load %arg8[%53, %c0_27, %c0_28] : memref<2x64x8xbf16, #tpu.memory_space<vmem>>, vector<1x64x8xbf16>
    %55 = vector.shape_cast %54 : vector<1x64x8xbf16> to vector<64x8xbf16>
    %56 = arith.index_cast %c1_i32_19 : i32 to index
    %c0_29 = arith.constant 0 : index
    %c0_30 = arith.constant 0 : index
    %57 = vector.load %arg3[%56, %c0_29, %c0_30] : memref<4x64x8xf32, #tpu.memory_space<vmem>>, vector<1x64x8xf32>
    %58 = vector.shape_cast %57 : vector<1x64x8xf32> to vector<64x8xf32>
    %59 = vector.broadcast %1 : f32 to vector<64x8xf32>
    %60 = arith.subf %58, %59 : vector<64x8xf32>
    %61 = arith.truncf %60 : vector<64x8xf32> to vector<64x8xbf16>
    %cst_31 = arith.constant dense<0.000000e+00> : vector<64x64xf32>
    %62 = tpu.matmul %55, %61, %cst_31 {dimension_numbers = #tpu.dot_dimension_numbers<[1], [1], [0], [0], [0, 0, 1, 0], [], []>} : vector<64x8xbf16>, vector<64x8xbf16>, vector<64x64xf32> -> vector<64x64xf32>
    %cst_32 = arith.constant 1.250000e-01 : f32
    %63 = vector.broadcast %cst_32 : f32 to vector<64x64xf32>
    %64 = arith.mulf %62, %63 : vector<64x64xf32>
    %65 = arith.index_cast %c1_i32_19 : i32 to index
    %c0_33 = arith.constant 0 : index
    %c0_34 = arith.constant 0 : index
    %66 = vector.load %arg7[%65, %c0_33, %c0_34] : memref<4x64x64xf32, #tpu.memory_space<vmem>>, vector<1x64x64xf32>
    %67 = vector.shape_cast %66 : vector<1x64x64xf32> to vector<64x64xf32>
    %68 = vector.shape_cast %64 : vector<64x64xf32> to vector<1x64x64xf32>
    tpu.vector_store %arg7[%65, %c0_33, %c0_34], %68 {strides = array<i32>} : memref<4x64x64xf32, #tpu.memory_space<vmem>>, vector<1x64x64xf32>,
    %69 = vector.shape_cast %64 : vector<64x64xf32> to vector<1x64x64xf32>
    %cst_35 = arith.constant dense<0xFF800000> : vector<1xf32>
    %70 = vector.multi_reduction <maximumf>, %69, %cst_35 [1, 2] : vector<1x64x64xf32> to vector<1xf32>
    %71 = vector.shape_cast %70 : vector<1xf32> to vector<1x1x1xf32>
    %72 = vector.extract %71[0, 0, 0] : f32 from vector<1x1x1xf32>
    %73 = arith.maximumf %40, %72 : f32
    %c2_i32_36 = arith.constant 2 : i32
    %c4_i32_37 = arith.constant 4 : i32
    %74 = arith.muli %arg0, %c4_i32_37 : i32
    %75 = arith.addi %74, %c2_i32_36 : i32
    %c2_i32_38 = arith.constant 2 : i32
    %c0_i32_39 = arith.constant 0 : i32
    %76 = arith.cmpi eq, %c2_i32_38, %c0_i32_39 : i32
    %c1_i32_40 = arith.constant 1 : i32
    %77 = arith.select %76, %c1_i32_40, %c2_i32_38 : i32
    %78 = arith.remsi %75, %77 : i32
    %c0_i32_41 = arith.constant 0 : i32
    %79 = arith.cmpi ne, %78, %c0_i32_41 : i32
    %c0_i32_42 = arith.constant 0 : i32
    %80 = arith.cmpi slt, %78, %c0_i32_42 : i32
    %c0_i32_43 = arith.constant 0 : i32
    %81 = arith.cmpi slt, %77, %c0_i32_43 : i32
    %82 = arith.xori %80, %81 : i1
    %83 = arith.andi %82, %79 : i1
    %84 = arith.addi %78, %77 : i32
    %85 = arith.select %83, %84, %78 : i32
    %86 = arith.index_cast %85 : i32 to index
    %c0_44 = arith.constant 0 : index
    %c0_45 = arith.constant 0 : index
    %87 = vector.load %arg8[%86, %c0_44, %c0_45] : memref<2x64x8xbf16, #tpu.memory_space<vmem>>, vector<1x64x8xbf16>
    %88 = vector.shape_cast %87 : vector<1x64x8xbf16> to vector<64x8xbf16>
    %89 = arith.index_cast %c2_i32_36 : i32 to index
    %c0_46 = arith.constant 0 : index
    %c0_47 = arith.constant 0 : index
    %90 = vector.load %arg3[%89, %c0_46, %c0_47] : memref<4x64x8xf32, #tpu.memory_space<vmem>>, vector<1x64x8xf32>
    %91 = vector.shape_cast %90 : vector<1x64x8xf32> to vector<64x8xf32>
    %92 = vector.broadcast %1 : f32 to vector<64x8xf32>
    %93 = arith.subf %91, %92 : vector<64x8xf32>
    %94 = arith.truncf %93 : vector<64x8xf32> to vector<64x8xbf16>
    %cst_48 = arith.constant dense<0.000000e+00> : vector<64x64xf32>
    %95 = tpu.matmul %88, %94, %cst_48 {dimension_numbers = #tpu.dot_dimension_numbers<[1], [1], [0], [0], [0, 0, 1, 0], [], []>} : vector<64x8xbf16>, vector<64x8xbf16>, vector<64x64xf32> -> vector<64x64xf32>
    %cst_49 = arith.constant 1.250000e-01 : f32
    %96 = vector.broadcast %cst_49 : f32 to vector<64x64xf32>
    %97 = arith.mulf %95, %96 : vector<64x64xf32>
    %98 = arith.index_cast %c2_i32_36 : i32 to index
    %c0_50 = arith.constant 0 : index
    %c0_51 = arith.constant 0 : index
    %99 = vector.load %arg7[%98, %c0_50, %c0_51] : memref<4x64x64xf32, #tpu.memory_space<vmem>>, vector<1x64x64xf32>
    %100 = vector.shape_cast %99 : vector<1x64x64xf32> to vector<64x64xf32>
    %101 = vector.shape_cast %97 : vector<64x64xf32> to vector<1x64x64xf32>
    tpu.vector_store %arg7[%98, %c0_50, %c0_51], %101 {strides = array<i32>} : memref<4x64x64xf32, #tpu.memory_space<vmem>>, vector<1x64x64xf32>,
    %102 = vector.shape_cast %97 : vector<64x64xf32> to vector<1x64x64xf32>
    %cst_52 = arith.constant dense<0xFF800000> : vector<1xf32>
    %103 = vector.multi_reduction <maximumf>, %102, %cst_52 [1, 2] : vector<1x64x64xf32> to vector<1xf32>
    %104 = vector.shape_cast %103 : vector<1xf32> to vector<1x1x1xf32>
    %105 = vector.extract %104[0, 0, 0] : f32 from vector<1x1x1xf32>
    %106 = arith.maximumf %73, %105 : f32
    %c3_i32 = arith.constant 3 : i32
    %c4_i32_53 = arith.constant 4 : i32
    %107 = arith.muli %arg0, %c4_i32_53 : i32
    %108 = arith.addi %107, %c3_i32 : i32
    %c2_i32_54 = arith.constant 2 : i32
    %c0_i32_55 = arith.constant 0 : i32
    %109 = arith.cmpi eq, %c2_i32_54, %c0_i32_55 : i32
    %c1_i32_56 = arith.constant 1 : i32
    %110 = arith.select %109, %c1_i32_56, %c2_i32_54 : i32
    %111 = arith.remsi %108, %110 : i32
    %c0_i32_57 = arith.constant 0 : i32
    %112 = arith.cmpi ne, %111, %c0_i32_57 : i32
    %c0_i32_58 = arith.constant 0 : i32
    %113 = arith.cmpi slt, %111, %c0_i32_58 : i32
    %c0_i32_59 = arith.constant 0 : i32
    %114 = arith.cmpi slt, %110, %c0_i32_59 : i32
    %115 = arith.xori %113, %114 : i1
    %116 = arith.andi %115, %112 : i1
    %117 = arith.addi %111, %110 : i32
    %118 = arith.select %116, %117, %111 : i32
    %119 = arith.index_cast %118 : i32 to index
    %c0_60 = arith.constant 0 : index
    %c0_61 = arith.constant 0 : index
    %120 = vector.load %arg8[%119, %c0_60, %c0_61] : memref<2x64x8xbf16, #tpu.memory_space<vmem>>, vector<1x64x8xbf16>
    %121 = vector.shape_cast %120 : vector<1x64x8xbf16> to vector<64x8xbf16>
    %122 = arith.index_cast %c3_i32 : i32 to index
    %c0_62 = arith.constant 0 : index
    %c0_63 = arith.constant 0 : index
    %123 = vector.load %arg3[%122, %c0_62, %c0_63] : memref<4x64x8xf32, #tpu.memory_space<vmem>>, vector<1x64x8xf32>
    %124 = vector.shape_cast %123 : vector<1x64x8xf32> to vector<64x8xf32>
    %125 = vector.broadcast %1 : f32 to vector<64x8xf32>
    %126 = arith.subf %124, %125 : vector<64x8xf32>
    %127 = arith.truncf %126 : vector<64x8xf32> to vector<64x8xbf16>
    %cst_64 = arith.constant dense<0.000000e+00> : vector<64x64xf32>
    %128 = tpu.matmul %121, %127, %cst_64 {dimension_numbers = #tpu.dot_dimension_numbers<[1], [1], [0], [0], [0, 0, 1, 0], [], []>} : vector<64x8xbf16>, vector<64x8xbf16>, vector<64x64xf32> -> vector<64x64xf32>
    %cst_65 = arith.constant 1.250000e-01 : f32
    %129 = vector.broadcast %cst_65 : f32 to vector<64x64xf32>
    %130 = arith.mulf %128, %129 : vector<64x64xf32>
    %131 = arith.index_cast %c3_i32 : i32 to index
    %c0_66 = arith.constant 0 : index
    %c0_67 = arith.constant 0 : index
    %132 = vector.load %arg7[%131, %c0_66, %c0_67] : memref<4x64x64xf32, #tpu.memory_space<vmem>>, vector<1x64x64xf32>
    %133 = vector.shape_cast %132 : vector<1x64x64xf32> to vector<64x64xf32>
    %134 = vector.shape_cast %130 : vector<64x64xf32> to vector<1x64x64xf32>
    tpu.vector_store %arg7[%131, %c0_66, %c0_67], %134 {strides = array<i32>} : memref<4x64x64xf32, #tpu.memory_space<vmem>>, vector<1x64x64xf32>,
    %135 = vector.shape_cast %130 : vector<64x64xf32> to vector<1x64x64xf32>
    %cst_68 = arith.constant dense<0xFF800000> : vector<1xf32>
    %136 = vector.multi_reduction <maximumf>, %135, %cst_68 [1, 2] : vector<1x64x64xf32> to vector<1xf32>
    %137 = vector.shape_cast %136 : vector<1xf32> to vector<1x1x1xf32>
    %138 = vector.extract %137[0, 0, 0] : f32 from vector<1x1x1xf32>
    %139 = arith.maximumf %106, %138 : f32
    %c4_i32_69 = arith.constant 4 : i32
    %cst_70 = arith.constant 0.000000e+00 : f32
    %c0_i32_71 = arith.constant 0 : i32
    %140 = arith.index_cast %c0_i32_71 : i32 to index
    %c0_72 = arith.constant 0 : index
    %c0_73 = arith.constant 0 : index
    %141 = vector.load %arg7[%140, %c0_72, %c0_73] : memref<4x64x64xf32, #tpu.memory_space<vmem>>, vector<1x64x64xf32>
    %142 = vector.shape_cast %141 : vector<1x64x64xf32> to vector<64x64xf32>
    %143 = vector.broadcast %139 : f32 to vector<64x64xf32>
    %144 = arith.subf %142, %143 : vector<64x64xf32>
    %145 = math.exp %144 : vector<64x64xf32>
    %146 = arith.truncf %145 : vector<64x64xf32> to vector<64x64xbf16>
    %147 = arith.index_cast %c0_i32_71 : i32 to index
    %c0_74 = arith.constant 0 : index
    %c0_75 = arith.constant 0 : index
    %148 = vector.load %arg5[%147, %c0_74, %c0_75] : memref<4x64x32xf32, #tpu.memory_space<vmem>>, vector<1x64x32xf32>
    %149 = vector.shape_cast %148 : vector<1x64x32xf32> to vector<64x32xf32>
    %150 = arith.truncf %149 : vector<64x32xf32> to vector<64x32xbf16>
    %cst_76 = arith.constant dense<0.000000e+00> : vector<64x32xf32>
    %151 = tpu.matmul %146, %150, %cst_76 {dimension_numbers = #tpu.dot_dimension_numbers<[1], [0], [0], [1], [0, 0, 1, 1], [], []>} : vector<64x64xbf16>, vector<64x32xbf16>, vector<64x32xf32> -> vector<64x32xf32>
    %152 = arith.index_cast %c0_i32_71 : i32 to index
    %c0_77 = arith.constant 0 : index
    %c0_78 = arith.constant 0 : index
    %153 = vector.load %arg6[%152, %c0_77, %c0_78] : memref<4x64x32xf32, #tpu.memory_space<vmem>>, vector<1x64x32xf32>
    %154 = vector.shape_cast %153 : vector<1x64x32xf32> to vector<64x32xf32>
    %155 = vector.shape_cast %151 : vector<64x32xf32> to vector<1x64x32xf32>
    tpu.vector_store %arg6[%152, %c0_77, %c0_78], %155 {strides = array<i32>} : memref<4x64x32xf32, #tpu.memory_space<vmem>>, vector<1x64x32xf32>,
    %156 = vector.shape_cast %145 : vector<64x64xf32> to vector<1x64x64xf32>
    %cst_79 = arith.constant dense<0.000000e+00> : vector<1xf32>
    %157 = vector.multi_reduction <add>, %156, %cst_79 [1, 2] : vector<1x64x64xf32> to vector<1xf32>
    %158 = vector.shape_cast %157 : vector<1xf32> to vector<1x1x1xf32>
    %159 = vector.extract %158[0, 0, 0] : f32 from vector<1x1x1xf32>
    %160 = arith.addf %cst_70, %159 : f32
    %c1_i32_80 = arith.constant 1 : i32
    %161 = arith.index_cast %c1_i32_80 : i32 to index
    %c0_81 = arith.constant 0 : index
    %c0_82 = arith.constant 0 : index
    %162 = vector.load %arg7[%161, %c0_81, %c0_82] : memref<4x64x64xf32, #tpu.memory_space<vmem>>, vector<1x64x64xf32>
    %163 = vector.shape_cast %162 : vector<1x64x64xf32> to vector<64x64xf32>
    %164 = vector.broadcast %139 : f32 to vector<64x64xf32>
    %165 = arith.subf %163, %164 : vector<64x64xf32>
    %166 = math.exp %165 : vector<64x64xf32>
    %167 = arith.truncf %166 : vector<64x64xf32> to vector<64x64xbf16>
    %168 = arith.index_cast %c1_i32_80 : i32 to index
    %c0_83 = arith.constant 0 : index
    %c0_84 = arith.constant 0 : index
    %169 = vector.load %arg5[%168, %c0_83, %c0_84] : memref<4x64x32xf32, #tpu.memory_space<vmem>>, vector<1x64x32xf32>
    %170 = vector.shape_cast %169 : vector<1x64x32xf32> to vector<64x32xf32>
    %171 = arith.truncf %170 : vector<64x32xf32> to vector<64x32xbf16>
    %cst_85 = arith.constant dense<0.000000e+00> : vector<64x32xf32>
    %172 = tpu.matmul %167, %171, %cst_85 {dimension_numbers = #tpu.dot_dimension_numbers<[1], [0], [0], [1], [0, 0, 1, 1], [], []>} : vector<64x64xbf16>, vector<64x32xbf16>, vector<64x32xf32> -> vector<64x32xf32>
    %173 = arith.index_cast %c1_i32_80 : i32 to index
    %c0_86 = arith.constant 0 : index
    %c0_87 = arith.constant 0 : index
    %174 = vector.load %arg6[%173, %c0_86, %c0_87] : memref<4x64x32xf32, #tpu.memory_space<vmem>>, vector<1x64x32xf32>
    %175 = vector.shape_cast %174 : vector<1x64x32xf32> to vector<64x32xf32>
    %176 = vector.shape_cast %172 : vector<64x32xf32> to vector<1x64x32xf32>
    tpu.vector_store %arg6[%173, %c0_86, %c0_87], %176 {strides = array<i32>} : memref<4x64x32xf32, #tpu.memory_space<vmem>>, vector<1x64x32xf32>,
    %177 = vector.shape_cast %166 : vector<64x64xf32> to vector<1x64x64xf32>
    %cst_88 = arith.constant dense<0.000000e+00> : vector<1xf32>
    %178 = vector.multi_reduction <add>, %177, %cst_88 [1, 2] : vector<1x64x64xf32> to vector<1xf32>
    %179 = vector.shape_cast %178 : vector<1xf32> to vector<1x1x1xf32>
    %180 = vector.extract %179[0, 0, 0] : f32 from vector<1x1x1xf32>
    %181 = arith.addf %160, %180 : f32
    %c2_i32_89 = arith.constant 2 : i32
    %182 = arith.index_cast %c2_i32_89 : i32 to index
    %c0_90 = arith.constant 0 : index
    %c0_91 = arith.constant 0 : index
    %183 = vector.load %arg7[%182, %c0_90, %c0_91] : memref<4x64x64xf32, #tpu.memory_space<vmem>>, vector<1x64x64xf32>
    %184 = vector.shape_cast %183 : vector<1x64x64xf32> to vector<64x64xf32>
    %185 = vector.broadcast %139 : f32 to vector<64x64xf32>
    %186 = arith.subf %184, %185 : vector<64x64xf32>
    %187 = math.exp %186 : vector<64x64xf32>
    %188 = arith.truncf %187 : vector<64x64xf32> to vector<64x64xbf16>
    %189 = arith.index_cast %c2_i32_89 : i32 to index
    %c0_92 = arith.constant 0 : index
    %c0_93 = arith.constant 0 : index
    %190 = vector.load %arg5[%189, %c0_92, %c0_93] : memref<4x64x32xf32, #tpu.memory_space<vmem>>, vector<1x64x32xf32>
    %191 = vector.shape_cast %190 : vector<1x64x32xf32> to vector<64x32xf32>
    %192 = arith.truncf %191 : vector<64x32xf32> to vector<64x32xbf16>
    %cst_94 = arith.constant dense<0.000000e+00> : vector<64x32xf32>
    %193 = tpu.matmul %188, %192, %cst_94 {dimension_numbers = #tpu.dot_dimension_numbers<[1], [0], [0], [1], [0, 0, 1, 1], [], []>} : vector<64x64xbf16>, vector<64x32xbf16>, vector<64x32xf32> -> vector<64x32xf32>
    %194 = arith.index_cast %c2_i32_89 : i32 to index
    %c0_95 = arith.constant 0 : index
    %c0_96 = arith.constant 0 : index
    %195 = vector.load %arg6[%194, %c0_95, %c0_96] : memref<4x64x32xf32, #tpu.memory_space<vmem>>, vector<1x64x32xf32>
    %196 = vector.shape_cast %195 : vector<1x64x32xf32> to vector<64x32xf32>
    %197 = vector.shape_cast %193 : vector<64x32xf32> to vector<1x64x32xf32>
    tpu.vector_store %arg6[%194, %c0_95, %c0_96], %197 {strides = array<i32>} : memref<4x64x32xf32, #tpu.memory_space<vmem>>, vector<1x64x32xf32>,
    %198 = vector.shape_cast %187 : vector<64x64xf32> to vector<1x64x64xf32>
    %cst_97 = arith.constant dense<0.000000e+00> : vector<1xf32>
    %199 = vector.multi_reduction <add>, %198, %cst_97 [1, 2] : vector<1x64x64xf32> to vector<1xf32>
    %200 = vector.shape_cast %199 : vector<1xf32> to vector<1x1x1xf32>
    %201 = vector.extract %200[0, 0, 0] : f32 from vector<1x1x1xf32>
    %202 = arith.addf %181, %201 : f32
    %c3_i32_98 = arith.constant 3 : i32
    %203 = arith.index_cast %c3_i32_98 : i32 to index
    %c0_99 = arith.constant 0 : index
    %c0_100 = arith.constant 0 : index
    %204 = vector.load %arg7[%203, %c0_99, %c0_100] : memref<4x64x64xf32, #tpu.memory_space<vmem>>, vector<1x64x64xf32>
    %205 = vector.shape_cast %204 : vector<1x64x64xf32> to vector<64x64xf32>
    %206 = vector.broadcast %139 : f32 to vector<64x64xf32>
    %207 = arith.subf %205, %206 : vector<64x64xf32>
    %208 = math.exp %207 : vector<64x64xf32>
    %209 = arith.truncf %208 : vector<64x64xf32> to vector<64x64xbf16>
    %210 = arith.index_cast %c3_i32_98 : i32 to index
    %c0_101 = arith.constant 0 : index
    %c0_102 = arith.constant 0 : index
    %211 = vector.load %arg5[%210, %c0_101, %c0_102] : memref<4x64x32xf32, #tpu.memory_space<vmem>>, vector<1x64x32xf32>
    %212 = vector.shape_cast %211 : vector<1x64x32xf32> to vector<64x32xf32>
    %213 = arith.truncf %212 : vector<64x32xf32> to vector<64x32xbf16>
    %cst_103 = arith.constant dense<0.000000e+00> : vector<64x32xf32>
    %214 = tpu.matmul %209, %213, %cst_103 {dimension_numbers = #tpu.dot_dimension_numbers<[1], [0], [0], [1], [0, 0, 1, 1], [], []>} : vector<64x64xbf16>, vector<64x32xbf16>, vector<64x32xf32> -> vector<64x32xf32>
    %215 = arith.index_cast %c3_i32_98 : i32 to index
    %c0_104 = arith.constant 0 : index
    %c0_105 = arith.constant 0 : index
    %216 = vector.load %arg6[%215, %c0_104, %c0_105] : memref<4x64x32xf32, #tpu.memory_space<vmem>>, vector<1x64x32xf32>
    %217 = vector.shape_cast %216 : vector<1x64x32xf32> to vector<64x32xf32>
    %218 = vector.shape_cast %214 : vector<64x32xf32> to vector<1x64x32xf32>
    tpu.vector_store %arg6[%215, %c0_104, %c0_105], %218 {strides = array<i32>} : memref<4x64x32xf32, #tpu.memory_space<vmem>>, vector<1x64x32xf32>,
    %219 = vector.shape_cast %208 : vector<64x64xf32> to vector<1x64x64xf32>
    %cst_106 = arith.constant dense<0.000000e+00> : vector<1xf32>
    %220 = vector.multi_reduction <add>, %219, %cst_106 [1, 2] : vector<1x64x64xf32> to vector<1xf32>
    %221 = vector.shape_cast %220 : vector<1xf32> to vector<1x1x1xf32>
    %222 = vector.extract %221[0, 0, 0] : f32 from vector<1x1x1xf32>
    %223 = arith.addf %202, %222 : f32
    %c4_i32_107 = arith.constant 4 : i32
    %224 = vector.broadcast %223 : f32 to vector<1x1xf32>
    %cst_108 = arith.constant 1.000000e+00 : f32
    %225 = vector.broadcast %cst_108 : f32 to vector<1x1xf32>
    %226 = arith.divf %225, %224 : vector<1x1xf32>
    %c0_i32_109 = arith.constant 0 : i32
    %227 = arith.index_cast %c0_i32_109 : i32 to index
    %c0_110 = arith.constant 0 : index
    %c0_111 = arith.constant 0 : index
    %228 = vector.load %arg5[%227, %c0_110, %c0_111] : memref<4x64x32xf32, #tpu.memory_space<vmem>>, vector<1x64x32xf32>
    %229 = vector.shape_cast %228 : vector<1x64x32xf32> to vector<64x32xf32>
    %c0_112 = arith.constant 0 : index
    %c0_113 = arith.constant 0 : index
    %230 = vector.load %arg4[%c0_112, %c0_113] : memref<1x32xf32, #tpu.memory_space<vmem>>, vector<1x32xf32>
    %231 = vector.broadcast %230 : vector<1x32xf32> to vector<64x32xf32>
    %232 = arith.mulf %229, %231 : vector<64x32xf32>
    %cst_114 = arith.constant dense<0.000000e+00> : vector<64xf32>
    %233 = vector.multi_reduction <add>, %232, %cst_114 [1] : vector<64x32xf32> to vector<64xf32>
    %234 = vector.shape_cast %233 : vector<64xf32> to vector<64x1xf32>
    %235 = vector.broadcast %2 : f32 to vector<64x1xf32>
    %236 = arith.addf %234, %235 : vector<64x1xf32>
    %237 = vector.shape_cast %236 : vector<64x1xf32> to vector<1x64x1xf32>
    %cst_115 = arith.constant dense<0xFF800000> : vector<1xf32>
    %238 = vector.multi_reduction <maximumf>, %237, %cst_115 [1, 2] : vector<1x64x1xf32> to vector<1xf32>
    %239 = vector.shape_cast %238 : vector<1xf32> to vector<1x1x1xf32>
    %240 = vector.extract %239[0, 0, 0] : f32 from vector<1x1x1xf32>
    %241 = vector.broadcast %240 : f32 to vector<64x1xf32>
    %242 = arith.subf %236, %241 : vector<64x1xf32>
    %243 = math.exp %242 : vector<64x1xf32>
    %244 = vector.shape_cast %243 : vector<64x1xf32> to vector<1x64x1xf32>
    %cst_116 = arith.constant dense<0.000000e+00> : vector<1xf32>
    %245 = vector.multi_reduction <add>, %244, %cst_116 [1, 2] : vector<1x64x1xf32> to vector<1xf32>
    %246 = vector.shape_cast %245 : vector<1xf32> to vector<1x1x1xf32>
    %247 = vector.extract %246[0, 0, 0] : f32 from vector<1x1x1xf32>
    %248 = vector.broadcast %247 : f32 to vector<1x1xf32>
    %cst_117 = arith.constant 1.000000e+00 : f32
    %249 = vector.broadcast %cst_117 : f32 to vector<1x1xf32>
    %250 = arith.divf %249, %248 : vector<1x1xf32>
    %251 = vector.broadcast %250 : vector<1x1xf32> to vector<64x1xf32>
    %252 = arith.mulf %243, %251 : vector<64x1xf32>
    %253 = vector.broadcast %252 : vector<64x1xf32> to vector<64x32xf32>
    %254 = arith.mulf %229, %253 : vector<64x32xf32>
    %cst_118 = arith.constant dense<0.000000e+00> : vector<32xf32>
    %255 = vector.multi_reduction <add>, %254, %cst_118 [0] : vector<64x32xf32> to vector<32xf32>
    %256 = vector.shape_cast %255 : vector<32xf32> to vector<1x32xf32>
    %cst_119 = arith.constant 1.000000e-01 : f32
    %257 = vector.broadcast %cst_119 : f32 to vector<1x32xf32>
    %258 = arith.mulf %257, %256 : vector<1x32xf32>
    %259 = arith.index_cast %c0_i32_109 : i32 to index
    %c0_120 = arith.constant 0 : index
    %c0_121 = arith.constant 0 : index
    %260 = vector.load %arg6[%259, %c0_120, %c0_121] : memref<4x64x32xf32, #tpu.memory_space<vmem>>, vector<1x64x32xf32>
    %261 = vector.shape_cast %260 : vector<1x64x32xf32> to vector<64x32xf32>
    %262 = vector.broadcast %226 : vector<1x1xf32> to vector<64x32xf32>
    %263 = arith.mulf %261, %262 : vector<64x32xf32>
    %264 = vector.broadcast %258 : vector<1x32xf32> to vector<64x32xf32>
    %265 = arith.addf %263, %264 : vector<64x32xf32>
    %266 = arith.index_cast %c0_i32_109 : i32 to index
    %c0_122 = arith.constant 0 : index
    %c0_123 = arith.constant 0 : index
    %267 = vector.load %arg6[%266, %c0_122, %c0_123] : memref<4x64x32xf32, #tpu.memory_space<vmem>>, vector<1x64x32xf32>
    %268 = vector.shape_cast %267 : vector<1x64x32xf32> to vector<64x32xf32>
    %269 = vector.shape_cast %265 : vector<64x32xf32> to vector<1x64x32xf32>
    tpu.vector_store %arg6[%266, %c0_122, %c0_123], %269 {strides = array<i32>} : memref<4x64x32xf32, #tpu.memory_space<vmem>>, vector<1x64x32xf32>,
    %c1_i32_124 = arith.constant 1 : i32
    %270 = arith.index_cast %c1_i32_124 : i32 to index
    %c0_125 = arith.constant 0 : index
    %c0_126 = arith.constant 0 : index
    %271 = vector.load %arg5[%270, %c0_125, %c0_126] : memref<4x64x32xf32, #tpu.memory_space<vmem>>, vector<1x64x32xf32>
    %272 = vector.shape_cast %271 : vector<1x64x32xf32> to vector<64x32xf32>
    %c0_127 = arith.constant 0 : index
    %c0_128 = arith.constant 0 : index
    %273 = vector.load %arg4[%c0_127, %c0_128] : memref<1x32xf32, #tpu.memory_space<vmem>>, vector<1x32xf32>
    %274 = vector.broadcast %273 : vector<1x32xf32> to vector<64x32xf32>
    %275 = arith.mulf %272, %274 : vector<64x32xf32>
    %cst_129 = arith.constant dense<0.000000e+00> : vector<64xf32>
    %276 = vector.multi_reduction <add>, %275, %cst_129 [1] : vector<64x32xf32> to vector<64xf32>
    %277 = vector.shape_cast %276 : vector<64xf32> to vector<64x1xf32>
    %278 = vector.broadcast %2 : f32 to vector<64x1xf32>
    %279 = arith.addf %277, %278 : vector<64x1xf32>
    %280 = vector.shape_cast %279 : vector<64x1xf32> to vector<1x64x1xf32>
    %cst_130 = arith.constant dense<0xFF800000> : vector<1xf32>
    %281 = vector.multi_reduction <maximumf>, %280, %cst_130 [1, 2] : vector<1x64x1xf32> to vector<1xf32>
    %282 = vector.shape_cast %281 : vector<1xf32> to vector<1x1x1xf32>
    %283 = vector.extract %282[0, 0, 0] : f32 from vector<1x1x1xf32>
    %284 = vector.broadcast %283 : f32 to vector<64x1xf32>
    %285 = arith.subf %279, %284 : vector<64x1xf32>
    %286 = math.exp %285 : vector<64x1xf32>
    %287 = vector.shape_cast %286 : vector<64x1xf32> to vector<1x64x1xf32>
    %cst_131 = arith.constant dense<0.000000e+00> : vector<1xf32>
    %288 = vector.multi_reduction <add>, %287, %cst_131 [1, 2] : vector<1x64x1xf32> to vector<1xf32>
    %289 = vector.shape_cast %288 : vector<1xf32> to vector<1x1x1xf32>
    %290 = vector.extract %289[0, 0, 0] : f32 from vector<1x1x1xf32>
    %291 = vector.broadcast %290 : f32 to vector<1x1xf32>
    %cst_132 = arith.constant 1.000000e+00 : f32
    %292 = vector.broadcast %cst_132 : f32 to vector<1x1xf32>
    %293 = arith.divf %292, %291 : vector<1x1xf32>
    %294 = vector.broadcast %293 : vector<1x1xf32> to vector<64x1xf32>
    %295 = arith.mulf %286, %294 : vector<64x1xf32>
    %296 = vector.broadcast %295 : vector<64x1xf32> to vector<64x32xf32>
    %297 = arith.mulf %272, %296 : vector<64x32xf32>
    %cst_133 = arith.constant dense<0.000000e+00> : vector<32xf32>
    %298 = vector.multi_reduction <add>, %297, %cst_133 [0] : vector<64x32xf32> to vector<32xf32>
    %299 = vector.shape_cast %298 : vector<32xf32> to vector<1x32xf32>
    %cst_134 = arith.constant 1.000000e-01 : f32
    %300 = vector.broadcast %cst_134 : f32 to vector<1x32xf32>
    %301 = arith.mulf %300, %299 : vector<1x32xf32>
    %302 = arith.index_cast %c1_i32_124 : i32 to index
    %c0_135 = arith.constant 0 : index
    %c0_136 = arith.constant 0 : index
    %303 = vector.load %arg6[%302, %c0_135, %c0_136] : memref<4x64x32xf32, #tpu.memory_space<vmem>>, vector<1x64x32xf32>
    %304 = vector.shape_cast %303 : vector<1x64x32xf32> to vector<64x32xf32>
    %305 = vector.broadcast %226 : vector<1x1xf32> to vector<64x32xf32>
    %306 = arith.mulf %304, %305 : vector<64x32xf32>
    %307 = vector.broadcast %301 : vector<1x32xf32> to vector<64x32xf32>
    %308 = arith.addf %306, %307 : vector<64x32xf32>
    %309 = arith.index_cast %c1_i32_124 : i32 to index
    %c0_137 = arith.constant 0 : index
    %c0_138 = arith.constant 0 : index
    %310 = vector.load %arg6[%309, %c0_137, %c0_138] : memref<4x64x32xf32, #tpu.memory_space<vmem>>, vector<1x64x32xf32>
    %311 = vector.shape_cast %310 : vector<1x64x32xf32> to vector<64x32xf32>
    %312 = vector.shape_cast %308 : vector<64x32xf32> to vector<1x64x32xf32>
    tpu.vector_store %arg6[%309, %c0_137, %c0_138], %312 {strides = array<i32>} : memref<4x64x32xf32, #tpu.memory_space<vmem>>, vector<1x64x32xf32>,
    %c2_i32_139 = arith.constant 2 : i32
    %313 = arith.index_cast %c2_i32_139 : i32 to index
    %c0_140 = arith.constant 0 : index
    %c0_141 = arith.constant 0 : index
    %314 = vector.load %arg5[%313, %c0_140, %c0_141] : memref<4x64x32xf32, #tpu.memory_space<vmem>>, vector<1x64x32xf32>
    %315 = vector.shape_cast %314 : vector<1x64x32xf32> to vector<64x32xf32>
    %c0_142 = arith.constant 0 : index
    %c0_143 = arith.constant 0 : index
    %316 = vector.load %arg4[%c0_142, %c0_143] : memref<1x32xf32, #tpu.memory_space<vmem>>, vector<1x32xf32>
    %317 = vector.broadcast %316 : vector<1x32xf32> to vector<64x32xf32>
    %318 = arith.mulf %315, %317 : vector<64x32xf32>
    %cst_144 = arith.constant dense<0.000000e+00> : vector<64xf32>
    %319 = vector.multi_reduction <add>, %318, %cst_144 [1] : vector<64x32xf32> to vector<64xf32>
    %320 = vector.shape_cast %319 : vector<64xf32> to vector<64x1xf32>
    %321 = vector.broadcast %2 : f32 to vector<64x1xf32>
    %322 = arith.addf %320, %321 : vector<64x1xf32>
    %323 = vector.shape_cast %322 : vector<64x1xf32> to vector<1x64x1xf32>
    %cst_145 = arith.constant dense<0xFF800000> : vector<1xf32>
    %324 = vector.multi_reduction <maximumf>, %323, %cst_145 [1, 2] : vector<1x64x1xf32> to vector<1xf32>
    %325 = vector.shape_cast %324 : vector<1xf32> to vector<1x1x1xf32>
    %326 = vector.extract %325[0, 0, 0] : f32 from vector<1x1x1xf32>
    %327 = vector.broadcast %326 : f32 to vector<64x1xf32>
    %328 = arith.subf %322, %327 : vector<64x1xf32>
    %329 = math.exp %328 : vector<64x1xf32>
    %330 = vector.shape_cast %329 : vector<64x1xf32> to vector<1x64x1xf32>
    %cst_146 = arith.constant dense<0.000000e+00> : vector<1xf32>
    %331 = vector.multi_reduction <add>, %330, %cst_146 [1, 2] : vector<1x64x1xf32> to vector<1xf32>
    %332 = vector.shape_cast %331 : vector<1xf32> to vector<1x1x1xf32>
    %333 = vector.extract %332[0, 0, 0] : f32 from vector<1x1x1xf32>
    %334 = vector.broadcast %333 : f32 to vector<1x1xf32>
    %cst_147 = arith.constant 1.000000e+00 : f32
    %335 = vector.broadcast %cst_147 : f32 to vector<1x1xf32>
    %336 = arith.divf %335, %334 : vector<1x1xf32>
    %337 = vector.broadcast %336 : vector<1x1xf32> to vector<64x1xf32>
    %338 = arith.mulf %329, %337 : vector<64x1xf32>
    %339 = vector.broadcast %338 : vector<64x1xf32> to vector<64x32xf32>
    %340 = arith.mulf %315, %339 : vector<64x32xf32>
    %cst_148 = arith.constant dense<0.000000e+00> : vector<32xf32>
    %341 = vector.multi_reduction <add>, %340, %cst_148 [0] : vector<64x32xf32> to vector<32xf32>
    %342 = vector.shape_cast %341 : vector<32xf32> to vector<1x32xf32>
    %cst_149 = arith.constant 1.000000e-01 : f32
    %343 = vector.broadcast %cst_149 : f32 to vector<1x32xf32>
    %344 = arith.mulf %343, %342 : vector<1x32xf32>
    %345 = arith.index_cast %c2_i32_139 : i32 to index
    %c0_150 = arith.constant 0 : index
    %c0_151 = arith.constant 0 : index
    %346 = vector.load %arg6[%345, %c0_150, %c0_151] : memref<4x64x32xf32, #tpu.memory_space<vmem>>, vector<1x64x32xf32>
    %347 = vector.shape_cast %346 : vector<1x64x32xf32> to vector<64x32xf32>
    %348 = vector.broadcast %226 : vector<1x1xf32> to vector<64x32xf32>
    %349 = arith.mulf %347, %348 : vector<64x32xf32>
    %350 = vector.broadcast %344 : vector<1x32xf32> to vector<64x32xf32>
    %351 = arith.addf %349, %350 : vector<64x32xf32>
    %352 = arith.index_cast %c2_i32_139 : i32 to index
    %c0_152 = arith.constant 0 : index
    %c0_153 = arith.constant 0 : index
    %353 = vector.load %arg6[%352, %c0_152, %c0_153] : memref<4x64x32xf32, #tpu.memory_space<vmem>>, vector<1x64x32xf32>
    %354 = vector.shape_cast %353 : vector<1x64x32xf32> to vector<64x32xf32>
    %355 = vector.shape_cast %351 : vector<64x32xf32> to vector<1x64x32xf32>
    tpu.vector_store %arg6[%352, %c0_152, %c0_153], %355 {strides = array<i32>} : memref<4x64x32xf32, #tpu.memory_space<vmem>>, vector<1x64x32xf32>,
    %c3_i32_154 = arith.constant 3 : i32
    %356 = arith.index_cast %c3_i32_154 : i32 to index
    %c0_155 = arith.constant 0 : index
    %c0_156 = arith.constant 0 : index
    %357 = vector.load %arg5[%356, %c0_155, %c0_156] : memref<4x64x32xf32, #tpu.memory_space<vmem>>, vector<1x64x32xf32>
    %358 = vector.shape_cast %357 : vector<1x64x32xf32> to vector<64x32xf32>
    %c0_157 = arith.constant 0 : index
    %c0_158 = arith.constant 0 : index
    %359 = vector.load %arg4[%c0_157, %c0_158] : memref<1x32xf32, #tpu.memory_space<vmem>>, vector<1x32xf32>
    %360 = vector.broadcast %359 : vector<1x32xf32> to vector<64x32xf32>
    %361 = arith.mulf %358, %360 : vector<64x32xf32>
    %cst_159 = arith.constant dense<0.000000e+00> : vector<64xf32>
    %362 = vector.multi_reduction <add>, %361, %cst_159 [1] : vector<64x32xf32> to vector<64xf32>
    %363 = vector.shape_cast %362 : vector<64xf32> to vector<64x1xf32>
    %364 = vector.broadcast %2 : f32 to vector<64x1xf32>
    %365 = arith.addf %363, %364 : vector<64x1xf32>
    %366 = vector.shape_cast %365 : vector<64x1xf32> to vector<1x64x1xf32>
    %cst_160 = arith.constant dense<0xFF800000> : vector<1xf32>
    %367 = vector.multi_reduction <maximumf>, %366, %cst_160 [1, 2] : vector<1x64x1xf32> to vector<1xf32>
    %368 = vector.shape_cast %367 : vector<1xf32> to vector<1x1x1xf32>
    %369 = vector.extract %368[0, 0, 0] : f32 from vector<1x1x1xf32>
    %370 = vector.broadcast %369 : f32 to vector<64x1xf32>
    %371 = arith.subf %365, %370 : vector<64x1xf32>
    %372 = math.exp %371 : vector<64x1xf32>
    %373 = vector.shape_cast %372 : vector<64x1xf32> to vector<1x64x1xf32>
    %cst_161 = arith.constant dense<0.000000e+00> : vector<1xf32>
    %374 = vector.multi_reduction <add>, %373, %cst_161 [1, 2] : vector<1x64x1xf32> to vector<1xf32>
    %375 = vector.shape_cast %374 : vector<1xf32> to vector<1x1x1xf32>
    %376 = vector.extract %375[0, 0, 0] : f32 from vector<1x1x1xf32>
    %377 = vector.broadcast %376 : f32 to vector<1x1xf32>
    %cst_162 = arith.constant 1.000000e+00 : f32
    %378 = vector.broadcast %cst_162 : f32 to vector<1x1xf32>
    %379 = arith.divf %378, %377 : vector<1x1xf32>
    %380 = vector.broadcast %379 : vector<1x1xf32> to vector<64x1xf32>
    %381 = arith.mulf %372, %380 : vector<64x1xf32>
    %382 = vector.broadcast %381 : vector<64x1xf32> to vector<64x32xf32>
    %383 = arith.mulf %358, %382 : vector<64x32xf32>
    %cst_163 = arith.constant dense<0.000000e+00> : vector<32xf32>
    %384 = vector.multi_reduction <add>, %383, %cst_163 [0] : vector<64x32xf32> to vector<32xf32>
    %385 = vector.shape_cast %384 : vector<32xf32> to vector<1x32xf32>
    %cst_164 = arith.constant 1.000000e-01 : f32
    %386 = vector.broadcast %cst_164 : f32 to vector<1x32xf32>
    %387 = arith.mulf %386, %385 : vector<1x32xf32>
    %388 = arith.index_cast %c3_i32_154 : i32 to index
    %c0_165 = arith.constant 0 : index
    %c0_166 = arith.constant 0 : index
    %389 = vector.load %arg6[%388, %c0_165, %c0_166] : memref<4x64x32xf32, #tpu.memory_space<vmem>>, vector<1x64x32xf32>
    %390 = vector.shape_cast %389 : vector<1x64x32xf32> to vector<64x32xf32>
    %391 = vector.broadcast %226 : vector<1x1xf32> to vector<64x32xf32>
    %392 = arith.mulf %390, %391 : vector<64x32xf32>
    %393 = vector.broadcast %387 : vector<1x32xf32> to vector<64x32xf32>
    %394 = arith.addf %392, %393 : vector<64x32xf32>
    %395 = arith.index_cast %c3_i32_154 : i32 to index
    %c0_167 = arith.constant 0 : index
    %c0_168 = arith.constant 0 : index
    %396 = vector.load %arg6[%395, %c0_167, %c0_168] : memref<4x64x32xf32, #tpu.memory_space<vmem>>, vector<1x64x32xf32>
    %397 = vector.shape_cast %396 : vector<1x64x32xf32> to vector<64x32xf32>
    %398 = vector.shape_cast %394 : vector<64x32xf32> to vector<1x64x32xf32>
    tpu.vector_store %arg6[%395, %c0_167, %c0_168], %398 {strides = array<i32>} : memref<4x64x32xf32, #tpu.memory_space<vmem>>, vector<1x64x32xf32>,
    %c4_i32_169 = arith.constant 4 : i32
    return
  }
  func.func @transform_0(%arg0: i32) -> i32 {
    %c0_i32 = arith.constant 0 : i32
    %c0_i32_0 = arith.constant 0 : i32
    return %c0_i32 : i32
  }
  func.func @transform_1(%arg0: i32) -> (i32, i32, i32) {
    %c0_i32 = arith.constant 0 : i32
    %c0_i32_0 = arith.constant 0 : i32
    %c0_i32_1 = arith.constant 0 : i32
    %c0_i32_2 = arith.constant 0 : i32
    return %c0_i32, %c0_i32_0, %c0_i32_1 : i32, i32, i32
  }
  func.func @transform_2(%arg0: i32) -> (i32, i32, i32) {
    %c0_i32 = arith.constant 0 : i32
    %c0_i32_0 = arith.constant 0 : i32
    %c0_i32_1 = arith.constant 0 : i32
    return %arg0, %c0_i32, %c0_i32_0 : i32, i32, i32
  }
  func.func @transform_3(%arg0: i32) -> (i32, i32) {
    %c0_i32 = arith.constant 0 : i32
    %c0_i32_0 = arith.constant 0 : i32
    %c0_i32_1 = arith.constant 0 : i32
    return %c0_i32, %c0_i32_0 : i32, i32
  }
  func.func @transform_4(%arg0: i32) -> (i32, i32, i32) {
    %c0_i32 = arith.constant 0 : i32
    %c0_i32_0 = arith.constant 0 : i32
    %c0_i32_1 = arith.constant 0 : i32
    return %arg0, %c0_i32, %c0_i32_0 : i32, i32, i32
  }
  func.func @transform_5(%arg0: i32) -> (i32, i32, i32) {
    %c0_i32 = arith.constant 0 : i32
    %c0_i32_0 = arith.constant 0 : i32
    %c0_i32_1 = arith.constant 0 : i32
    return %arg0, %c0_i32, %c0_i32_0 : i32, i32, i32
  }
}

</mosaic_0001>

<bundles_post_ra>
// kernel: forward.3
= control target key start
LH: loop header
LB: loop body
LE: loop exit
PB: predicated region body
PF: predicated region fallthrough
CT: control target
= control target key end

     0   :  { %vm62_vm0 = vcmask 261120   ;;  %s444_s0 = inlined_call_operand.vmem [shape: f32[128,32], index: 0, kind: input, shape index: {}]   ;;  %s445_s1 = inlined_call_operand.vmem [shape: bf16[32,8], index: 1, kind: input, shape index: {}]   ;;  %s446_s2 = inlined_call_operand.vmem [shape: f32[1,8], index: 2, kind: input, shape index: {}]   ;;  %s447_s3 = inlined_call_operand.vmem [shape: f32[128,8], index: 3, kind: output, shape index: {0}]   ;;  %s448_s4 = inlined_call_operand.hbm [shape: f32[1,1,1], index: 4, kind: output, shape index: {1}]  }
   0x1   :  { %v233_v0 = vld [vmem:[%s445_s1 + $0x8] sm:$0xff]  ;;  %v232_v1 = vld [vmem:[%s445_s1] sm:$0xff] }
   0x2   :  { %v18_v2 = vld [vmem:[%s444_s0] sm:$0xff]  ;;  %v19_v3 = vld [vmem:[%s444_s0 + $0x8] sm:$0xff]  ;;  %93 = vmatpush.bf16.msra.mxu0 %v233_v0  ;;  %234 = vmatpush.bf16.msra.mxu1 %v233_v0 }
   0x3   :  { %v22_v4 = vld [vmem:[%s444_s0 + $0x20] sm:$0xff]  ;;  %v23_v5 = vld [vmem:[%s444_s0 + $0x28] sm:$0xff]  ;;  %235 = vmatpush.bf16.msra.mxu2 %v233_v0  ;;  %236 = vmatpush.bf16.msra.mxu3 %v233_v0  ;;  %v34_v10 = vpack.c.bf16 %v19_v3, %v18_v2 }
   0x4   :  { %v26_v6 = vld [vmem:[%s444_s0 + $0x40] sm:$0xff]  ;;  %v27_v7 = vld [vmem:[%s444_s0 + $0x48] sm:$0xff]  ;;  %v36_v11 = vpack.c.bf16 %v23_v5, %v22_v4 }
   0x5   :  { %v30_v8 = vld [vmem:[%s444_s0 + $0x60] sm:$0xff]  ;;  %v31_v9 = vld [vmem:[%s444_s0 + $0x68] sm:$0xff]  ;;  %v38_v12 = vpack.c.bf16 %v27_v7, %v26_v6 }
   0x6   :  { %94 = vmatpush.bf16.msra.mxu0 %v232_v1  ;;  %237 = vmatpush.bf16.msra.mxu1 %v232_v1  ;;  %v40_v13 = vpack.c.bf16 %v31_v9, %v30_v8 }
   0x7   :  { %10 = vsyncpa [#allocation3], 0  ;;  %238 = vmatpush.bf16.msra.mxu2 %v232_v1  ;;  %239 = vmatpush.bf16.msra.mxu3 %v232_v1  ;;  %v20_v14 = vld [vmem:[%s444_s0 + $0x10] sm:$0xff]  ;;  %v21_v15 = vld [vmem:[%s444_s0 + $0x18] sm:$0xff]  ;;  %vm136_vm1 = vcmask 64512   ;;  %s205_s29 = sshll.u32 %s448_s4, 4  ;;  %s206_s29 = int_to_ptr.hbm [resolvable:$true] %s205_s29 }
   0x8   :  { %v24_v16 = vld [vmem:[%s444_s0 + $0x30] sm:$0xff]  ;;  %v25_v17 = vld [vmem:[%s444_s0 + $0x38] sm:$0xff]  ;;  %v35_v22 = vpack.c.bf16 %v21_v15, %v20_v14  ;;  %v243_v26 = vld [vmem:[%s446_s2] ss:$0 sm:$0xff]  ;;  %vm194_vm2 = vcmask 0  }
   0x9   :  { %224 = vmatmul.msk.bf16.vlgmr.msra.gmra.mxu0 %vm62_vm0, %v34_v10  ;;  %226 = vmatmul.msk.bf16.vlgmr.msra.gmra.mxu1 %vm62_vm0, %v36_v11  ;;  %v28_v18 = vld [vmem:[%s444_s0 + $0x50] sm:$0xff]  ;;  %v29_v19 = vld [vmem:[%s444_s0 + $0x58] sm:$0xff]  ;;  %v37_v23 = vpack.c.bf16 %v25_v17, %v24_v16 }
   0xa   :  { %228 = vmatmul.msk.bf16.vlgmr.msra.gmra.mxu2 %vm62_vm0, %v38_v12  ;;  %230 = vmatmul.msk.bf16.vlgmr.msra.gmra.mxu3 %vm62_vm0, %v40_v13  ;;  %v32_v20 = vld [vmem:[%s444_s0 + $0x70] sm:$0xff]  ;;  %v33_v21 = vld [vmem:[%s444_s0 + $0x78] sm:$0xff]  ;;  %v39_v24 = vpack.c.bf16 %v29_v19, %v28_v18 }
   0xb   :  { %v41_v25 = vpack.c.bf16 %v33_v21, %v32_v20 }
  0x19   :  { %225 = vmatmul.msk.bf16.gmra.mxu0 %vm62_vm0, %v35_v22  ;;  %227 = vmatmul.msk.bf16.gmra.mxu1 %vm62_vm0, %v37_v23 }
  0x1a   :  { %229 = vmatmul.msk.bf16.gmra.mxu2 %vm62_vm0, %v39_v24  ;;  %231 = vmatmul.msk.bf16.gmra.mxu3 %vm62_vm0, %v41_v25 }
  0x86   :  { %v96_v27 = vpop.f32.mrf.mxu0  ;;  %v106_v28 = vpop.f32.mrf.mxu1 }
  0x87   :  { %v97_v29 = vadd.f32 %v243_v26, %v96_v27  ;;  %v107_v30 = vadd.f32 %v243_v26, %v106_v28 }
  0x89   :  { %137 = vst.msk [vmem:[%s447_s3] sm:$0xff] %vm136_vm1, %v97_v29  ;;  %v153_v48 = vsel %vm136_vm1, %v97_v29, 0.0  ;;  %v160_v62 = vsel %vm136_vm1, %v107_v30, 0.0 }
  0x8a   :  { %141 = vst.msk [vmem:[%s447_s3 + $0x20] sm:$0xff] %vm136_vm1, %v107_v30 }
  0x8d   :  { %v116_v31 = vpop.f32.mrf.mxu2  ;;  %v126_v32 = vpop.f32.mrf.mxu3 }
  0x8e   :  { %v98_v33 = vpop.f32.mrf.mxu0  ;;  %v108_v34 = vpop.f32.mrf.mxu1  ;;  %v117_v35 = vadd.f32 %v243_v26, %v116_v31  ;;  %v127_v38 = vadd.f32 %v243_v26, %v126_v32 }
  0x8f   :  { %v99_v36 = vadd.f32 %v243_v26, %v98_v33  ;;  %v109_v37 = vadd.f32 %v243_v26, %v108_v34 }
  0x90   :  { %145 = vst.msk [vmem:[%s447_s3 + $0x40] sm:$0xff] %vm136_vm1, %v117_v35  ;;  %v168_v10 = vsel %vm136_vm1, %v117_v35, 0.0  ;;  %v176_v18 = vsel %vm136_vm1, %v127_v38, 0.0 }
  0x91   :  { %138 = vst.msk [vmem:[%s447_s3 + $0x8] sm:$0xff] %vm136_vm1, %v99_v36  ;;  %v154_v47 = vsel %vm136_vm1, %v99_v36, 0.0  ;;  %v162_v0 = vsel %vm136_vm1, %v109_v37, 0.0 }
  0x92   :  { %142 = vst.msk [vmem:[%s447_s3 + $0x28] sm:$0xff] %vm136_vm1, %v109_v37  ;;  %v155_v52 = vadd.f32 %v154_v47, %v153_v48 }
  0x93   :  { %149 = vst.msk [vmem:[%s447_s3 + $0x60] sm:$0xff] %vm136_vm1, %v127_v38 }
  0x95   :  { %v118_v39 = vpop.f32.mrf.mxu2  ;;  %v128_v40 = vpop.f32.mrf.mxu3 }
  0x96   :  { %v101_v41 = vpop.f32.mrf.mxu0  ;;  %v111_v42 = vpop.f32.mrf.mxu1  ;;  %v119_v43 = vadd.f32 %v243_v26, %v118_v39  ;;  %v129_v46 = vadd.f32 %v243_v26, %v128_v40 }
  0x97   :  { %v102_v44 = vadd.f32 %v243_v26, %v101_v41  ;;  %v112_v45 = vadd.f32 %v243_v26, %v111_v42 }
  0x98   :  { %146 = vst.msk [vmem:[%s447_s3 + $0x48] sm:$0xff] %vm136_vm1, %v119_v43  ;;  %v170_v12 = vsel %vm136_vm1, %v119_v43, 0.0  ;;  %v178_v20 = vsel %vm136_vm1, %v129_v46, 0.0 }
  0x99   :  { %139 = vst.msk [vmem:[%s447_s3 + $0x10] sm:$0xff] %vm136_vm1, %v102_v44  ;;  %v156_v49 = vsel %vm136_vm1, %v102_v44, 0.0  ;;  %v164_v6 = vsel %vm136_vm1, %v112_v45, 0.0 }
  0x9a   :  { %143 = vst.msk [vmem:[%s447_s3 + $0x30] sm:$0xff] %vm136_vm1, %v112_v45  ;;  %v157_v59 = vadd.f32 %v156_v49, %v155_v52 }
  0x9b   :  { %150 = vst.msk [vmem:[%s447_s3 + $0x68] sm:$0xff] %vm136_vm1, %v129_v46 }
  0x9d   :  { %v121_v50 = vpop.f32.mrf.mxu2  ;;  %v131_v51 = vpop.f32.mrf.mxu3 }
  0x9e   :  { %v103_v53 = vpop.f32.mrf.mxu0  ;;  %v113_v54 = vpop.f32.mrf.mxu1  ;;  %v122_v55 = vadd.f32 %v243_v26, %v121_v50  ;;  %v132_v58 = vadd.f32 %v243_v26, %v131_v51 }
  0x9f   :  { %v104_v56 = vadd.f32 %v243_v26, %v103_v53  ;;  %v114_v57 = vadd.f32 %v243_v26, %v113_v54 }
  0xa0   :  { %147 = vst.msk [vmem:[%s447_s3 + $0x50] sm:$0xff] %vm136_vm1, %v122_v55  ;;  %v172_v14 = vsel %vm136_vm1, %v122_v55, 0.0  ;;  %v180_v22 = vsel %vm136_vm1, %v132_v58, 0.0 }
  0xa1   :  { %140 = vst.msk [vmem:[%s447_s3 + $0x18] sm:$0xff] %vm136_vm1, %v104_v56  ;;  %v158_v60 = vsel %vm136_vm1, %v104_v56, 0.0  ;;  %v166_v8 = vsel %vm136_vm1, %v114_v57, 0.0 }
  0xa2   :  { %v159_v61 = vadd.f32 %v158_v60, %v157_v59  ;;  %144 = vst.msk [vmem:[%s447_s3 + $0x38] sm:$0xff] %vm136_vm1, %v114_v57 }
  0xa3   :  { %151 = vst.msk [vmem:[%s447_s3 + $0x70] sm:$0xff] %vm136_vm1, %v132_v58 }
  0xa4   :  { %v161_v63 = vadd.f32 %v160_v62, %v159_v61 }
  0xa5   :  { %v123_v1 = vpop.f32.mrf.mxu2  ;;  %v133_v2 = vpop.f32.mrf.mxu3 }
  0xa6   :  { %v163_v3 = vadd.f32 %v162_v0, %v161_v63  ;;  %v124_v4 = vadd.f32 %v243_v26, %v123_v1  ;;  %v134_v5 = vadd.f32 %v243_v26, %v133_v2 }
  0xa8   :  { %v165_v7 = vadd.f32 %v164_v6, %v163_v3  ;;  %148 = vst.msk [vmem:[%s447_s3 + $0x58] sm:$0xff] %vm136_vm1, %v124_v4  ;;  %v174_v16 = vsel %vm136_vm1, %v124_v4, 0.0  ;;  %v182_v24 = vsel %vm136_vm1, %v134_v5, 0.0 }
  0xa9   :  { %152 = vst.msk [vmem:[%s447_s3 + $0x78] sm:$0xff] %vm136_vm1, %v134_v5  ;;  %s270_s3 = smov [#allocation2]  }
  0xaa   :  { %v167_v9 = vadd.f32 %v166_v8, %v165_v7  ;;  %s203_s1 = sshll.u32 %s270_s3, 4  ;;  %s204_s1 = int_to_ptr.vmem [resolvable:$true] %s203_s1 }
  0xac   :  { %v169_v11 = vadd.f32 %v168_v10, %v167_v9 }
  0xae   :  { %v171_v13 = vadd.f32 %v170_v12, %v169_v11 }
  0xb0   :  { %v173_v15 = vadd.f32 %v172_v14, %v171_v13 }
  0xb2   :  { %v175_v17 = vadd.f32 %v174_v16, %v173_v15 }
  0xb4   :  { %v177_v19 = vadd.f32 %v176_v18, %v175_v17 }
  0xb6   :  { %v179_v21 = vadd.f32 %v178_v20, %v177_v19 }
  0xb8   :  { %v181_v23 = vadd.f32 %v180_v22, %v179_v21 }
  0xba   :  { %v183_v25 = vadd.f32 %v182_v24, %v181_v23 }
  0xbc   :  { %184 = vadd.xlane.f32.xlu0 %v183_v25 }
 0x12f   :  { %v185_v26 = vpop.xlane.xlu0 %184 }
 0x130   :  { %v186_v27 = vrot.slane %v185_v26, 4 }
 0x132   :  { %v187_v28 = vadd.f32 %v186_v27, %v185_v26 }
 0x134   :  { %v188_v29 = vrot.slane %v187_v28, 2 }
 0x136   :  { %v189_v30 = vadd.f32 %v188_v29, %v187_v28 }
 0x138   :  { %v190_v31 = vrot.slane %v189_v30, 1 }
 0x13a   :  { %v191_v32 = vadd.f32 %v190_v31, %v189_v30 }
 0x13c   :  { %240 = vpush %v191_v32 }
 0x16d   :  { %s241_s30 = spop %240 }
 0x16e   :  { %v193_v33 = vstv %s241_s30 }
 0x16f   :  { %195 = vst.msk [vmem:[#allocation2] sm:$0x1] %vm194_vm2, %v193_v33 }
 0x170   :  { %208 = dma.vmem_to_hbm [thread:$0]  %s204_s1, 16, %s206_s29, [#allocation3]  }
 0x171   :  { %268 = dma.done.wait [#allocation3], 16  }
 0x172   :  { %269 = vsyncadd [#allocation3], 4294967280 }
 0x173   :  { %215 = vsyncpa [#allocation3], 1 }

// kernel: forward.4
= control target key start
LH: loop header
LB: loop body
LE: loop exit
PB: predicated region body
PF: predicated region fallthrough
CT: control target
= control target key end

     0   :  { %s1533_s0 = inlined_call_operand.vmem [shape: f32[512,32], index: 0, kind: input, shape index: {}]   ;;  %s1534_s1 = inlined_call_operand.vmem [shape: bf16[32,8], index: 1, kind: input, shape index: {}]   ;;  %s1535_s2 = inlined_call_operand.vmem [shape: f32[1,8], index: 2, kind: input, shape index: {}]   ;;  %s1536_s3 = inlined_call_operand.vmem [shape: f32[512,8], index: 3, kind: output, shape index: {0}]   ;;  %s1537_s4 = inlined_call_operand.hbm [shape: f32[1,1,1], index: 4, kind: output, shape index: {1}]  }
   0x1   :  { %v665_v0 = vld [vmem:[%s1534_s1 + $0x8] sm:$0xff]  ;;  %v664_v1 = vld [vmem:[%s1534_s1] sm:$0xff] }
   0x2   :  { %v18_v2 = vld [vmem:[%s1533_s0] sm:$0xff]  ;;  %237 = vmatpush.bf16.msra.mxu0 %v665_v0  ;;  %v19_v3 = vld [vmem:[%s1533_s0 + $0x8] sm:$0xff]  ;;  %666 = vmatpush.bf16.msra.mxu1 %v665_v0 }
   0x3   :  { %v34_v4 = vld [vmem:[%s1533_s0 + $0x80] sm:$0xff]  ;;  %v35_v5 = vld [vmem:[%s1533_s0 + $0x88] sm:$0xff]  ;;  %667 = vmatpush.bf16.msra.mxu2 %v665_v0  ;;  %668 = vmatpush.bf16.msra.mxu3 %v665_v0 }
   0x4   :  { %10 = vsyncpa [#allocation3], 0  ;;  %v82_v6 = vpack.c.bf16 %v19_v3, %v18_v2  ;;  %v90_v7 = vpack.c.bf16 %v35_v5, %v34_v4  ;;  %vm134_vm0 = vcmask 261120   ;;  %v20_v8 = vld [vmem:[%s1533_s0 + $0x10] sm:$0xff]  ;;  %v21_v9 = vld [vmem:[%s1533_s0 + $0x18] sm:$0xff]  ;;  %vm400_vm1 = vcmask 64512  }
   0x5   :  { %v36_v10 = vld [vmem:[%s1533_s0 + $0x90] sm:$0xff]  ;;  %v37_v11 = vld [vmem:[%s1533_s0 + $0x98] sm:$0xff]  ;;  %v83_v12 = vpack.c.bf16 %v21_v9, %v20_v8  ;;  %v50_v14 = vld [vmem:[%s1533_s0 + $0x100] sm:$0xff]  ;;  %s613_s27 = sshll.u32 %s1537_s4, 4  ;;  %vm602_vm2 = vcmask 0   ;;  %s614_s27 = int_to_ptr.hbm [resolvable:$true] %s613_s27 }
   0x6   :  { %238 = vmatpush.bf16.msra.mxu0 %v664_v1  ;;  %669 = vmatpush.bf16.msra.mxu1 %v664_v1  ;;  %v91_v13 = vpack.c.bf16 %v37_v11, %v36_v10  ;;  %v51_v15 = vld [vmem:[%s1533_s0 + $0x108] sm:$0xff]  ;;  %v22_v17 = vld [vmem:[%s1533_s0 + $0x20] sm:$0xff]  ;;  %v52_v23 = vld [vmem:[%s1533_s0 + $0x110] sm:$0xff] }
   0x7   :  { %670 = vmatpush.bf16.msra.mxu2 %v664_v1  ;;  %671 = vmatpush.bf16.msra.mxu3 %v664_v1  ;;  %v98_v16 = vpack.c.bf16 %v51_v15, %v50_v14  ;;  %v23_v18 = vld [vmem:[%s1533_s0 + $0x28] sm:$0xff]  ;;  %v38_v19 = vld [vmem:[%s1533_s0 + $0xa0] sm:$0xff]  ;;  %v53_v24 = vld [vmem:[%s1533_s0 + $0x118] sm:$0xff] }
   0x8   :  { %v39_v20 = vld [vmem:[%s1533_s0 + $0xa8] sm:$0xff]  ;;  %v84_v21 = vpack.c.bf16 %v23_v18, %v22_v17  ;;  %v99_v25 = vpack.c.bf16 %v53_v24, %v52_v23  ;;  %v24_v26 = vld [vmem:[%s1533_s0 + $0x30] sm:$0xff]  ;;  %v25_v27 = vld [vmem:[%s1533_s0 + $0x38] sm:$0xff] }
   0x9   :  { %632 = vmatmul.msk.bf16.vlgmr.msra.gmra.mxu0 %vm134_vm0, %v82_v6  ;;  %640 = vmatmul.msk.bf16.vlgmr.msra.gmra.mxu1 %vm134_vm0, %v90_v7  ;;  %v92_v22 = vpack.c.bf16 %v39_v20, %v38_v19  ;;  %v40_v28 = vld [vmem:[%s1533_s0 + $0xb0] sm:$0xff]  ;;  %v41_v29 = vld [vmem:[%s1533_s0 + $0xb8] sm:$0xff]  ;;  %v85_v30 = vpack.c.bf16 %v25_v27, %v24_v26  ;;  %v54_v32 = vld [vmem:[%s1533_s0 + $0x120] sm:$0xff] }
   0xa   :  { %648 = vmatmul.msk.bf16.vlgmr.msra.gmra.mxu2 %vm134_vm0, %v98_v16  ;;  %v93_v31 = vpack.c.bf16 %v41_v29, %v40_v28  ;;  %v55_v33 = vld [vmem:[%s1533_s0 + $0x128] sm:$0xff]  ;;  %v66_v34 = vld [vmem:[%s1533_s0 + $0x180] sm:$0xff]  ;;  %v56_v44 = vld [vmem:[%s1533_s0 + $0x130] sm:$0xff] }
   0xb   :  { %v100_v35 = vpack.c.bf16 %v55_v33, %v54_v32  ;;  %v67_v36 = vld [vmem:[%s1533_s0 + $0x188] sm:$0xff]  ;;  %v26_v38 = vld [vmem:[%s1533_s0 + $0x40] sm:$0xff]  ;;  %v57_v45 = vld [vmem:[%s1533_s0 + $0x138] sm:$0xff] }
   0xc   :  { %v106_v37 = vpack.c.bf16 %v67_v36, %v66_v34  ;;  %v27_v39 = vld [vmem:[%s1533_s0 + $0x48] sm:$0xff]  ;;  %v42_v40 = vld [vmem:[%s1533_s0 + $0xc0] sm:$0xff]  ;;  %v68_v46 = vld [vmem:[%s1533_s0 + $0x190] sm:$0xff]  ;;  %v101_v47 = vpack.c.bf16 %v57_v45, %v56_v44 }
   0xd   :  { %v43_v41 = vld [vmem:[%s1533_s0 + $0xc8] sm:$0xff]  ;;  %v86_v42 = vpack.c.bf16 %v27_v39, %v26_v38  ;;  %v69_v48 = vld [vmem:[%s1533_s0 + $0x198] sm:$0xff]  ;;  %v28_v50 = vld [vmem:[%s1533_s0 + $0x50] sm:$0xff] }
   0xe   :  { %656 = vmatmul.msk.bf16.vlgmr.msra.gmra.mxu3 %vm134_vm0, %v106_v37  ;;  %v94_v43 = vpack.c.bf16 %v43_v41, %v42_v40  ;;  %v107_v49 = vpack.c.bf16 %v69_v48, %v68_v46  ;;  %v29_v51 = vld [vmem:[%s1533_s0 + $0x58] sm:$0xff]  ;;  %v44_v52 = vld [vmem:[%s1533_s0 + $0xd0] sm:$0xff]  ;;  %v58_v56 = vld [vmem:[%s1533_s0 + $0x140] sm:$0xff] }
   0xf   :  { %v45_v53 = vld [vmem:[%s1533_s0 + $0xd8] sm:$0xff]  ;;  %v87_v54 = vpack.c.bf16 %v29_v51, %v28_v50  ;;  %v59_v57 = vld [vmem:[%s1533_s0 + $0x148] sm:$0xff]  ;;  %v70_v58 = vld [vmem:[%s1533_s0 + $0x1a0] sm:$0xff] }
  0x10   :  { %v95_v55 = vpack.c.bf16 %v45_v53, %v44_v52  ;;  %v102_v59 = vpack.c.bf16 %v59_v57, %v58_v56  ;;  %v71_v60 = vld [vmem:[%s1533_s0 + $0x1a8] sm:$0xff]  ;;  %v30_v62 = vld [vmem:[%s1533_s0 + $0x60] sm:$0xff]  ;;  %v60_v4 = vld [vmem:[%s1533_s0 + $0x150] sm:$0xff] }
  0x11   :  { %v108_v61 = vpack.c.bf16 %v71_v60, %v70_v58  ;;  %v31_v63 = vld [vmem:[%s1533_s0 + $0x68] sm:$0xff]  ;;  %v46_v0 = vld [vmem:[%s1533_s0 + $0xe0] sm:$0xff]  ;;  %v61_v5 = vld [vmem:[%s1533_s0 + $0x158] sm:$0xff] }
  0x12   :  { %v47_v1 = vld [vmem:[%s1533_s0 + $0xe8] sm:$0xff]  ;;  %v88_v2 = vpack.c.bf16 %v31_v63, %v30_v62  ;;  %v72_v6 = vld [vmem:[%s1533_s0 + $0x1b0] sm:$0xff]  ;;  %v103_v7 = vpack.c.bf16 %v61_v5, %v60_v4  ;;  %v73_v8 = vld [vmem:[%s1533_s0 + $0x1b8] sm:$0xff] }
  0x13   :  { %v96_v3 = vpack.c.bf16 %v47_v1, %v46_v0  ;;  %v109_v9 = vpack.c.bf16 %v73_v8, %v72_v6  ;;  %v32_v10 = vld [vmem:[%s1533_s0 + $0x70] sm:$0xff]  ;;  %v33_v11 = vld [vmem:[%s1533_s0 + $0x78] sm:$0xff]  ;;  %v62_v16 = vld [vmem:[%s1533_s0 + $0x160] sm:$0xff] }
  0x14   :  { %v89_v14 = vpack.c.bf16 %v33_v11, %v32_v10  ;;  %v63_v17 = vld [vmem:[%s1533_s0 + $0x168] sm:$0xff]  ;;  %v74_v18 = vld [vmem:[%s1533_s0 + $0x1c0] sm:$0xff]  ;;  %v64_v27 = vld [vmem:[%s1533_s0 + $0x170] sm:$0xff] }
  0x15   :  { %v104_v19 = vpack.c.bf16 %v63_v17, %v62_v16  ;;  %v75_v20 = vld [vmem:[%s1533_s0 + $0x1c8] sm:$0xff]  ;;  %v65_v28 = vld [vmem:[%s1533_s0 + $0x178] sm:$0xff]  ;;  %v76_v29 = vld [vmem:[%s1533_s0 + $0x1d0] sm:$0xff] }
  0x16   :  { %v78_v44 = vld [vmem:[%s1533_s0 + $0x1e0] sm:$0xff]  ;;  %v79_v45 = vld [vmem:[%s1533_s0 + $0x1e8] sm:$0xff]  ;;  %v80_v63 = vld [vmem:[%s1533_s0 + $0x1f0] sm:$0xff] }
  0x17   :  { %v81_v0 = vld [vmem:[%s1533_s0 + $0x1f8] sm:$0xff] }
  0x19   :  { %633 = vmatmul.msk.bf16.gmra.mxu0 %vm134_vm0, %v83_v12  ;;  %641 = vmatmul.msk.bf16.gmra.mxu1 %vm134_vm0, %v91_v13  ;;  %v48_v12 = vld [vmem:[%s1533_s0 + $0xf0] sm:$0xff]  ;;  %v49_v13 = vld [vmem:[%s1533_s0 + $0xf8] sm:$0xff] }
  0x1a   :  { %649 = vmatmul.msk.bf16.gmra.mxu2 %vm134_vm0, %v99_v25  ;;  %v97_v15 = vpack.c.bf16 %v49_v13, %v48_v12 }
  0x1e   :  { %657 = vmatmul.msk.bf16.gmra.mxu3 %vm134_vm0, %v107_v49 }
  0x29   :  { %634 = vmatmul.msk.bf16.gmra.mxu0 %vm134_vm0, %v84_v21  ;;  %642 = vmatmul.msk.bf16.gmra.mxu1 %vm134_vm0, %v92_v22  ;;  %v110_v21 = vpack.c.bf16 %v75_v20, %v74_v18  ;;  %v933_v22 = vld [vmem:[%s1535_s2] ss:$0 sm:$0xff] }
  0x2a   :  { %650 = vmatmul.msk.bf16.gmra.mxu2 %vm134_vm0, %v100_v35 }
  0x2e   :  { %658 = vmatmul.msk.bf16.gmra.mxu3 %vm134_vm0, %v108_v61 }
  0x39   :  { %635 = vmatmul.msk.bf16.gmra.mxu0 %vm134_vm0, %v85_v30  ;;  %643 = vmatmul.msk.bf16.gmra.mxu1 %vm134_vm0, %v93_v31  ;;  %v105_v30 = vpack.c.bf16 %v65_v28, %v64_v27  ;;  %v77_v31 = vld [vmem:[%s1533_s0 + $0x1d8] sm:$0xff] }
  0x3a   :  { %651 = vmatmul.msk.bf16.gmra.mxu2 %vm134_vm0, %v101_v47  ;;  %v111_v32 = vpack.c.bf16 %v77_v31, %v76_v29  ;;  %v112_v47 = vpack.c.bf16 %v79_v45, %v78_v44 }
  0x3e   :  { %659 = vmatmul.msk.bf16.gmra.mxu3 %vm134_vm0, %v109_v9 }
  0x49   :  { %636 = vmatmul.msk.bf16.gmra.mxu0 %vm134_vm0, %v86_v42  ;;  %644 = vmatmul.msk.bf16.gmra.mxu1 %vm134_vm0, %v94_v43 }
  0x4a   :  { %652 = vmatmul.msk.bf16.gmra.mxu2 %vm134_vm0, %v102_v59 }
  0x4e   :  { %660 = vmatmul.msk.bf16.gmra.mxu3 %vm134_vm0, %v110_v21 }
  0x59   :  { %637 = vmatmul.msk.bf16.gmra.mxu0 %vm134_vm0, %v87_v54  ;;  %645 = vmatmul.msk.bf16.gmra.mxu1 %vm134_vm0, %v95_v55 }
  0x5a   :  { %653 = vmatmul.msk.bf16.gmra.mxu2 %vm134_vm0, %v103_v7 }
  0x5e   :  { %661 = vmatmul.msk.bf16.gmra.mxu3 %vm134_vm0, %v111_v32 }
  0x69   :  { %638 = vmatmul.msk.bf16.gmra.mxu0 %vm134_vm0, %v88_v2  ;;  %646 = vmatmul.msk.bf16.gmra.mxu1 %vm134_vm0, %v96_v3  ;;  %v113_v2 = vpack.c.bf16 %v81_v0, %v80_v63 }
  0x6a   :  { %654 = vmatmul.msk.bf16.gmra.mxu2 %vm134_vm0, %v104_v19 }
  0x6e   :  { %662 = vmatmul.msk.bf16.gmra.mxu3 %vm134_vm0, %v112_v47 }
  0x79   :  { %639 = vmatmul.msk.bf16.gmra.mxu0 %vm134_vm0, %v89_v14  ;;  %647 = vmatmul.msk.bf16.gmra.mxu1 %vm134_vm0, %v97_v15 }
  0x7a   :  { %655 = vmatmul.msk.bf16.gmra.mxu2 %vm134_vm0, %v105_v30 }
  0x7e   :  { %663 = vmatmul.msk.bf16.gmra.mxu3 %vm134_vm0, %v113_v2 }
  0x86   :  { %v240_v23 = vpop.f32.mrf.mxu0  ;;  %v280_v24 = vpop.f32.mrf.mxu1 }
  0x87   :  { %v241_v25 = vadd.f32 %v933_v22, %v240_v23  ;;  %v937_v26 = vadd.f32 %v933_v22, %v280_v24 }
  0x89   :  { %401 = vst.msk [vmem:[%s1536_s3] sm:$0xff] %vm400_vm1, %v241_v25  ;;  %v465_v37 = vsel %vm400_vm1, %v241_v25, 0.0 }
  0x8a   :  { %417 = vst.msk [vmem:[%s1536_s3 + $0x80] sm:$0xff] %vm400_vm1, %v937_v26 }
  0x8d   :  { %v320_v53 = vpop.f32.mrf.mxu2 }
  0x8e   :  { %v242_v33 = vpop.f32.mrf.mxu0  ;;  %v282_v34 = vpop.f32.mrf.mxu1  ;;  %v1013_v56 = vadd.f32 %v933_v22, %v320_v53 }
  0x8f   :  { %v243_v35 = vadd.f32 %v933_v22, %v242_v33  ;;  %v964_v36 = vadd.f32 %v933_v22, %v282_v34 }
  0x90   :  { %433 = vst.msk [vmem:[%s1536_s3 + $0x100] sm:$0xff] %vm400_vm1, %v1013_v56 }
  0x91   :  { %402 = vst.msk [vmem:[%s1536_s3 + $0x8] sm:$0xff] %vm400_vm1, %v243_v35  ;;  %v466_v38 = vsel %vm400_vm1, %v243_v35, 0.0  ;;  %v360_v21 = vpop.f32.mrf.mxu3 }
  0x92   :  { %v467_v39 = vadd.f32 %v466_v38, %v465_v37  ;;  %418 = vst.msk [vmem:[%s1536_s3 + $0x88] sm:$0xff] %vm400_vm1, %v964_v36  ;;  %v1119_v24 = vadd.f32 %v933_v22, %v360_v21 }
  0x94   :  { %449 = vst.msk [vmem:[%s1536_s3 + $0x180] sm:$0xff] %vm400_vm1, %v1119_v24 }
  0x95   :  { %v322_v61 = vpop.f32.mrf.mxu2 }
  0x96   :  { %v245_v40 = vpop.f32.mrf.mxu0  ;;  %v285_v41 = vpop.f32.mrf.mxu1  ;;  %v1025_v62 = vadd.f32 %v933_v22, %v322_v61 }
  0x97   :  { %v246_v42 = vadd.f32 %v933_v22, %v245_v40  ;;  %v979_v43 = vadd.f32 %v933_v22, %v285_v41 }
  0x98   :  { %434 = vst.msk [vmem:[%s1536_s3 + $0x108] sm:$0xff] %vm400_vm1, %v1025_v62 }
  0x99   :  { %403 = vst.msk [vmem:[%s1536_s3 + $0x10] sm:$0xff] %vm400_vm1, %v246_v42  ;;  %v468_v46 = vsel %vm400_vm1, %v246_v42, 0.0  ;;  %v362_v31 = vpop.f32.mrf.mxu3 }
  0x9a   :  { %v469_v48 = vadd.f32 %v468_v46, %v467_v39  ;;  %419 = vst.msk [vmem:[%s1536_s3 + $0x90] sm:$0xff] %vm400_vm1, %v979_v43  ;;  %v1141_v33 = vadd.f32 %v933_v22, %v362_v31 }
  0x9c   :  { %450 = vst.msk [vmem:[%s1536_s3 + $0x188] sm:$0xff] %vm400_vm1, %v1141_v33 }
  0x9d   :  { %v325_v8 = vpop.f32.mrf.mxu2 }
  0x9e   :  { %v247_v49 = vpop.f32.mrf.mxu0  ;;  %v287_v50 = vpop.f32.mrf.mxu1  ;;  %v1068_v9 = vadd.f32 %v933_v22, %v325_v8 }
  0x9f   :  { %v248_v51 = vadd.f32 %v933_v22, %v247_v49  ;;  %v1000_v52 = vadd.f32 %v933_v22, %v287_v50 }
  0xa0   :  { %435 = vst.msk [vmem:[%s1536_s3 + $0x110] sm:$0xff] %vm400_vm1, %v1068_v9 }
  0xa1   :  { %404 = vst.msk [vmem:[%s1536_s3 + $0x18] sm:$0xff] %vm400_vm1, %v248_v51  ;;  %v470_v54 = vsel %vm400_vm1, %v248_v51, 0.0  ;;  %v365_v40 = vpop.f32.mrf.mxu3 }
  0xa2   :  { %v471_v55 = vadd.f32 %v470_v54, %v469_v48  ;;  %420 = vst.msk [vmem:[%s1536_s3 + $0x98] sm:$0xff] %vm400_vm1, %v1000_v52  ;;  %v1180_v42 = vadd.f32 %v933_v22, %v365_v40 }
  0xa4   :  { %451 = vst.msk [vmem:[%s1536_s3 + $0x190] sm:$0xff] %vm400_vm1, %v1180_v42 }
  0xa5   :  { %v327_v14 = vpop.f32.mrf.mxu2 }
  0xa6   :  { %v250_v57 = vpop.f32.mrf.mxu0  ;;  %v290_v58 = vpop.f32.mrf.mxu1  ;;  %v1082_v15 = vadd.f32 %v933_v22, %v327_v14 }
  0xa7   :  { %v251_v59 = vadd.f32 %v933_v22, %v250_v57  ;;  %v1022_v60 = vadd.f32 %v933_v22, %v290_v58 }
  0xa8   :  { %436 = vst.msk [vmem:[%s1536_s3 + $0x118] sm:$0xff] %vm400_vm1, %v1082_v15 }
  0xa9   :  { %405 = vst.msk [vmem:[%s1536_s3 + $0x20] sm:$0xff] %vm400_vm1, %v251_v59  ;;  %v472_v1 = vsel %vm400_vm1, %v251_v59, 0.0  ;;  %v367_v49 = vpop.f32.mrf.mxu3 }
  0xaa   :  { %v1038_v3 = vadd.f32 %v472_v1, %v471_v55  ;;  %421 = vst.msk [vmem:[%s1536_s3 + $0xa0] sm:$0xff] %vm400_vm1, %v1022_v60  ;;  %v1200_v51 = vadd.f32 %v933_v22, %v367_v49 }
  0xac   :  { %452 = vst.msk [vmem:[%s1536_s3 + $0x198] sm:$0xff] %vm400_vm1, %v1200_v51 }
  0xad   :  { %v330_v20 = vpop.f32.mrf.mxu2 }
  0xae   :  { %v252_v4 = vpop.f32.mrf.mxu0  ;;  %v292_v5 = vpop.f32.mrf.mxu1  ;;  %v1116_v23 = vadd.f32 %v933_v22, %v330_v20 }
  0xaf   :  { %v1052_v6 = vadd.f32 %v933_v22, %v252_v4  ;;  %v1055_v7 = vadd.f32 %v933_v22, %v292_v5 }
  0xb0   :  { %437 = vst.msk [vmem:[%s1536_s3 + $0x120] sm:$0xff] %vm400_vm1, %v1116_v23 }
  0xb1   :  { %406 = vst.msk [vmem:[%s1536_s3 + $0x28] sm:$0xff] %vm400_vm1, %v1052_v6  ;;  %v370_v59 = vpop.f32.mrf.mxu3  ;;  %v474_v14 = vsel %vm400_vm1, %v1052_v6, 0.0 }
  0xb2   :  { %422 = vst.msk [vmem:[%s1536_s3 + $0xa8] sm:$0xff] %vm400_vm1, %v1055_v7  ;;  %v1242_v8 = vadd.f32 %v933_v22, %v370_v59  ;;  %v475_v6 = vadd.f32 %v474_v14, %v1038_v3 }
  0xb4   :  { %453 = vst.msk [vmem:[%s1536_s3 + $0x1a0] sm:$0xff] %vm400_vm1, %v1242_v8 }
  0xb5   :  { %v332_v30 = vpop.f32.mrf.mxu2 }
  0xb6   :  { %v255_v10 = vpop.f32.mrf.mxu0  ;;  %v295_v11 = vpop.f32.mrf.mxu1  ;;  %v1138_v32 = vadd.f32 %v933_v22, %v332_v30 }
  0xb7   :  { %v1076_v12 = vadd.f32 %v933_v22, %v255_v10  ;;  %v1079_v13 = vadd.f32 %v933_v22, %v295_v11 }
  0xb8   :  { %438 = vst.msk [vmem:[%s1536_s3 + $0x128] sm:$0xff] %vm400_vm1, %v1138_v32 }
  0xb9   :  { %407 = vst.msk [vmem:[%s1536_s3 + $0x30] sm:$0xff] %vm400_vm1, %v1076_v12  ;;  %v372_v5 = vpop.f32.mrf.mxu3 }
  0xba   :  { %423 = vst.msk [vmem:[%s1536_s3 + $0xb0] sm:$0xff] %vm400_vm1, %v1079_v13  ;;  %v1257_v11 = vadd.f32 %v933_v22, %v372_v5 }
  0xbc   :  { %454 = vst.msk [vmem:[%s1536_s3 + $0x1a8] sm:$0xff] %vm400_vm1, %v1257_v11 }
  0xbd   :  { %v335_v39 = vpop.f32.mrf.mxu2 }
  0xbe   :  { %v257_v16 = vpop.f32.mrf.mxu0  ;;  %v297_v17 = vpop.f32.mrf.mxu1  ;;  %v1177_v41 = vadd.f32 %v933_v22, %v335_v39 }
  0xbf   :  { %v1100_v18 = vadd.f32 %v933_v22, %v257_v16  ;;  %v1103_v19 = vadd.f32 %v933_v22, %v297_v17  ;;  %v476_v16 = vsel %vm400_vm1, %v1076_v12, 0.0 }
  0xc0   :  { %439 = vst.msk [vmem:[%s1536_s3 + $0x130] sm:$0xff] %vm400_vm1, %v1177_v41  ;;  %v477_v31 = vadd.f32 %v476_v16, %v475_v6 }
  0xc1   :  { %408 = vst.msk [vmem:[%s1536_s3 + $0x38] sm:$0xff] %vm400_vm1, %v1100_v18  ;;  %v478_v21 = vsel %vm400_vm1, %v1100_v18, 0.0  ;;  %v375_v30 = vpop.f32.mrf.mxu3 }
  0xc2   :  { %424 = vst.msk [vmem:[%s1536_s3 + $0xb8] sm:$0xff] %vm400_vm1, %v1103_v19 }
  0xc5   :  { %v337_v48 = vpop.f32.mrf.mxu2 }
  0xc6   :  { %v260_v25 = vpop.f32.mrf.mxu0  ;;  %v300_v27 = vpop.f32.mrf.mxu1  ;;  %v1197_v50 = vadd.f32 %v933_v22, %v337_v48 }
  0xc7   :  { %v1132_v28 = vadd.f32 %v933_v22, %v260_v25  ;;  %v1135_v29 = vadd.f32 %v933_v22, %v300_v27 }
  0xc8   :  { %440 = vst.msk [vmem:[%s1536_s3 + $0x138] sm:$0xff] %vm400_vm1, %v1197_v50 }
  0xc9   :  { %409 = vst.msk [vmem:[%s1536_s3 + $0x40] sm:$0xff] %vm400_vm1, %v1132_v28  ;;  %v480_v3 = vsel %vm400_vm1, %v1132_v28, 0.0 }
  0xca   :  { %425 = vst.msk [vmem:[%s1536_s3 + $0xc0] sm:$0xff] %vm400_vm1, %v1135_v29 }
  0xcd   :  { %v340_v58 = vpop.f32.mrf.mxu2 }
  0xce   :  { %v262_v34 = vpop.f32.mrf.mxu0  ;;  %v302_v35 = vpop.f32.mrf.mxu1  ;;  %v1239_v2 = vadd.f32 %v933_v22, %v340_v58 }
  0xcf   :  { %v263_v37 = vadd.f32 %v933_v22, %v262_v34  ;;  %v1165_v38 = vadd.f32 %v933_v22, %v302_v35  ;;  %v479_v34 = vadd.f32 %v478_v21, %v477_v31  ;;  %v377_v58 = vpop.f32.mrf.mxu3 }
  0xd0   :  { %441 = vst.msk [vmem:[%s1536_s3 + $0x140] sm:$0xff] %vm400_vm1, %v1239_v2 }
  0xd1   :  { %410 = vst.msk [vmem:[%s1536_s3 + $0x48] sm:$0xff] %vm400_vm1, %v263_v37  ;;  %v482_v18 = vsel %vm400_vm1, %v263_v37, 0.0  ;;  %v481_v35 = vadd.f32 %v480_v3, %v479_v34  ;;  %v1312_v37 = vadd.f32 %v933_v22, %v375_v30  ;;  %v496_v3 = vsel %vm400_vm1, %v937_v26, 0.0 }
  0xd2   :  { %426 = vst.msk [vmem:[%s1536_s3 + $0xc8] sm:$0xff] %vm400_vm1, %v1165_v38 }
  0xd3   :  { %v483_v40 = vadd.f32 %v482_v18, %v481_v35  ;;  %455 = vst.msk [vmem:[%s1536_s3 + $0x1b0] sm:$0xff] %vm400_vm1, %v1312_v37  ;;  %v498_v18 = vsel %vm400_vm1, %v964_v36, 0.0  ;;  %v502_v36 = vsel %vm400_vm1, %v1000_v52, 0.0 }
  0xd5   :  { %v342_v4 = vpop.f32.mrf.mxu2 }
  0xd6   :  { %v265_v44 = vpop.f32.mrf.mxu0  ;;  %v305_v45 = vpop.f32.mrf.mxu1  ;;  %v1249_v10 = vadd.f32 %v933_v22, %v342_v4 }
  0xd7   :  { %v266_v46 = vadd.f32 %v933_v22, %v265_v44  ;;  %v1194_v47 = vadd.f32 %v933_v22, %v305_v45 }
  0xd8   :  { %442 = vst.msk [vmem:[%s1536_s3 + $0x148] sm:$0xff] %vm400_vm1, %v1249_v10 }
  0xd9   :  { %411 = vst.msk [vmem:[%s1536_s3 + $0x50] sm:$0xff] %vm400_vm1, %v266_v46  ;;  %v484_v39 = vsel %vm400_vm1, %v266_v46, 0.0 }
  0xda   :  { %427 = vst.msk [vmem:[%s1536_s3 + $0xd0] sm:$0xff] %vm400_vm1, %v1194_v47  ;;  %v485_v59 = vadd.f32 %v484_v39, %v483_v40  ;;  %v500_v39 = vsel %vm400_vm1, %v979_v43, 0.0 }
  0xdd   :  { %v345_v27 = vpop.f32.mrf.mxu2 }
  0xde   :  { %v267_v53 = vpop.f32.mrf.mxu0  ;;  %v307_v54 = vpop.f32.mrf.mxu1 }
  0xdf   :  { %v268_v55 = vadd.f32 %v933_v22, %v267_v53  ;;  %v1223_v57 = vadd.f32 %v933_v22, %v307_v54  ;;  %v1309_v53 = vadd.f32 %v933_v22, %v345_v27 }
  0xe1   :  { %412 = vst.msk [vmem:[%s1536_s3 + $0x58] sm:$0xff] %vm400_vm1, %v268_v55  ;;  %v486_v45 = vsel %vm400_vm1, %v268_v55, 0.0 }
  0xe2   :  { %428 = vst.msk [vmem:[%s1536_s3 + $0xd8] sm:$0xff] %vm400_vm1, %v1223_v57 }
  0xe3   :  { %443 = vst.msk [vmem:[%s1536_s3 + $0x150] sm:$0xff] %vm400_vm1, %v1309_v53 }
  0xe5   :  { %v347_v54 = vpop.f32.mrf.mxu2 }
  0xe6   :  { %v270_v61 = vpop.f32.mrf.mxu0  ;;  %v310_v63 = vpop.f32.mrf.mxu1  ;;  %v1320_v55 = vadd.f32 %v933_v22, %v347_v54 }
  0xe7   :  { %v271_v0 = vadd.f32 %v933_v22, %v270_v61  ;;  %v1236_v1 = vadd.f32 %v933_v22, %v310_v63  ;;  %v487_v61 = vadd.f32 %v486_v45, %v485_v59  ;;  %v1328_v63 = vadd.f32 %v933_v22, %v377_v58 }
  0xe8   :  { %444 = vst.msk [vmem:[%s1536_s3 + $0x158] sm:$0xff] %vm400_vm1, %v1320_v55  ;;  %v504_v58 = vsel %vm400_vm1, %v1022_v60, 0.0  ;;  %v506_v59 = vsel %vm400_vm1, %v1055_v7, 0.0  ;;  %v508_v60 = vsel %vm400_vm1, %v1079_v13, 0.0  ;;  %v516_v7 = vsel %vm400_vm1, %v1194_v47, 0.0 }
  0xe9   :  { %413 = vst.msk [vmem:[%s1536_s3 + $0x60] sm:$0xff] %vm400_vm1, %v271_v0  ;;  %v488_v46 = vsel %vm400_vm1, %v271_v0, 0.0 }
  0xea   :  { %429 = vst.msk [vmem:[%s1536_s3 + $0xe0] sm:$0xff] %vm400_vm1, %v1236_v1  ;;  %v489_v4 = vadd.f32 %v488_v46, %v487_v61 }
  0xeb   :  { %456 = vst.msk [vmem:[%s1536_s3 + $0x1b8] sm:$0xff] %vm400_vm1, %v1328_v63 }
  0xed   :  { %v350_v21 = vpop.f32.mrf.mxu2 }
  0xee   :  { %v272_v17 = vpop.f32.mrf.mxu0  ;;  %v312_v20 = vpop.f32.mrf.mxu1  ;;  %v1370_v40 = vadd.f32 %v933_v22, %v350_v21 }
  0xef   :  { %v273_v12 = vadd.f32 %v933_v22, %v272_v17  ;;  %v1288_v25 = vadd.f32 %v933_v22, %v312_v20 }
  0xf0   :  { %445 = vst.msk [vmem:[%s1536_s3 + $0x160] sm:$0xff] %vm400_vm1, %v1370_v40 }
  0xf1   :  { %414 = vst.msk [vmem:[%s1536_s3 + $0x68] sm:$0xff] %vm400_vm1, %v273_v12  ;;  %v490_v0 = vsel %vm400_vm1, %v273_v12, 0.0  ;;  %v380_v12 = vpop.f32.mrf.mxu3 }
  0xf2   :  { %430 = vst.msk [vmem:[%s1536_s3 + $0xe8] sm:$0xff] %vm400_vm1, %v1288_v25  ;;  %v491_v14 = vadd.f32 %v490_v0, %v489_v4 }
  0xf6   :  { %v275_v44 = vpop.f32.mrf.mxu0  ;;  %v315_v28 = vpop.f32.mrf.mxu1 }
  0xf7   :  { %v276_v48 = vadd.f32 %v933_v22, %v275_v44  ;;  %v1306_v49 = vadd.f32 %v933_v22, %v315_v28  ;;  %v1373_v44 = vadd.f32 %v933_v22, %v380_v12  ;;  %v352_v28 = vpop.f32.mrf.mxu2 }
  0xf8   :  { %v1376_v54 = vadd.f32 %v933_v22, %v352_v28 }
  0xf9   :  { %415 = vst.msk [vmem:[%s1536_s3 + $0x70] sm:$0xff] %vm400_vm1, %v276_v48  ;;  %v492_v5 = vsel %vm400_vm1, %v276_v48, 0.0  ;;  %v382_v45 = vpop.f32.mrf.mxu3 }
  0xfa   :  { %431 = vst.msk [vmem:[%s1536_s3 + $0xf0] sm:$0xff] %vm400_vm1, %v1306_v49  ;;  %v493_v27 = vadd.f32 %v492_v5, %v491_v14  ;;  %v1379_v26 = vadd.f32 %v933_v22, %v382_v45  ;;  %v510_v5 = vsel %vm400_vm1, %v1103_v19, 0.0 }
  0xfb   :  { %457 = vst.msk [vmem:[%s1536_s3 + $0x1c0] sm:$0xff] %vm400_vm1, %v1373_v44 }
  0xfc   :  { %446 = vst.msk [vmem:[%s1536_s3 + $0x168] sm:$0xff] %vm400_vm1, %v1376_v54 }
  0xfd   :  { %458 = vst.msk [vmem:[%s1536_s3 + $0x1c8] sm:$0xff] %vm400_vm1, %v1379_v26 }
  0xfe   :  { %v277_v16 = vpop.f32.mrf.mxu0  ;;  %v317_v6 = vpop.f32.mrf.mxu1 }
  0xff   :  { %v278_v17 = vadd.f32 %v933_v22, %v277_v16  ;;  %v318_v20 = vadd.f32 %v933_v22, %v317_v6  ;;  %v355_v61 = vpop.f32.mrf.mxu2  ;;  %v512_v16 = vsel %vm400_vm1, %v1135_v29, 0.0 }
 0x100   :  { %v356_v13 = vadd.f32 %v933_v22, %v355_v61 }
 0x101   :  { %416 = vst.msk [vmem:[%s1536_s3 + $0x78] sm:$0xff] %vm400_vm1, %v278_v17  ;;  %v494_v30 = vsel %vm400_vm1, %v278_v17, 0.0  ;;  %v385_v0 = vpop.f32.mrf.mxu3  ;;  %v514_v17 = vsel %vm400_vm1, %v1165_v38, 0.0  ;;  %v518_v38 = vsel %vm400_vm1, %v1223_v57, 0.0  ;;  %v526_v28 = vsel %vm400_vm1, %v318_v20, 0.0 }
 0x102   :  { %v495_v31 = vadd.f32 %v494_v30, %v493_v27  ;;  %432 = vst.msk [vmem:[%s1536_s3 + $0xf8] sm:$0xff] %vm400_vm1, %v318_v20  ;;  %v1419_v12 = vadd.f32 %v933_v22, %v385_v0  ;;  %v534_v20 = vsel %vm400_vm1, %v1082_v15, 0.0  ;;  %v540_v15 = vsel %vm400_vm1, %v1177_v41, 0.0 }
 0x103   :  { %447 = vst.msk [vmem:[%s1536_s3 + $0x170] sm:$0xff] %vm400_vm1, %v356_v13 }
 0x104   :  { %v497_v34 = vadd.f32 %v496_v3, %v495_v31  ;;  %459 = vst.msk [vmem:[%s1536_s3 + $0x1d0] sm:$0xff] %vm400_vm1, %v1419_v12  ;;  %v520_v3 = vsel %vm400_vm1, %v1236_v1, 0.0 }
 0x106   :  { %v499_v35 = vadd.f32 %v498_v18, %v497_v34  ;;  %v522_v34 = vsel %vm400_vm1, %v1288_v25, 0.0  ;;  %v532_v25 = vsel %vm400_vm1, %v1068_v9, 0.0 }
 0x107   :  { %v357_v27 = vpop.f32.mrf.mxu2 }
 0x108   :  { %v501_v48 = vadd.f32 %v500_v39, %v499_v35  ;;  %v358_v31 = vadd.f32 %v933_v22, %v357_v27  ;;  %v524_v35 = vsel %vm400_vm1, %v1306_v49, 0.0 }
 0x109   :  { %v387_v30 = vpop.f32.mrf.mxu3 }
 0x10a   :  { %v503_v43 = vadd.f32 %v502_v36, %v501_v48  ;;  %v1423_v29 = vadd.f32 %v933_v22, %v387_v30  ;;  %448 = vst.msk [vmem:[%s1536_s3 + $0x178] sm:$0xff] %vm400_vm1, %v358_v31  ;;  %v528_v48 = vsel %vm400_vm1, %v1013_v56, 0.0 }
 0x10c   :  { %v505_v52 = vadd.f32 %v504_v58, %v503_v43  ;;  %460 = vst.msk [vmem:[%s1536_s3 + $0x1d8] sm:$0xff] %vm400_vm1, %v1423_v29  ;;  %v530_v43 = vsel %vm400_vm1, %v1025_v62, 0.0  ;;  %v536_v62 = vsel %vm400_vm1, %v1116_v23, 0.0  ;;  %v546_v23 = vsel %vm400_vm1, %v1249_v10, 0.0 }
 0x10d   :  { %v552_v10 = vsel %vm400_vm1, %v1370_v40, 0.0  ;;  %v564_v40 = vsel %vm400_vm1, %v1180_v42, 0.0  ;;  %v574_v42 = vsel %vm400_vm1, %v1328_v63, 0.0 }
 0x10e   :  { %v507_v46 = vadd.f32 %v506_v59, %v505_v52 }
 0x110   :  { %v509_v4 = vadd.f32 %v508_v60, %v507_v46  ;;  %v538_v60 = vsel %vm400_vm1, %v1138_v32, 0.0  ;;  %v548_v32 = vsel %vm400_vm1, %v1309_v53, 0.0 }
 0x111   :  { %v390_v1 = vpop.f32.mrf.mxu3 }
 0x112   :  { %v511_v14 = vadd.f32 %v510_v5, %v509_v4  ;;  %v391_v52 = vadd.f32 %v933_v22, %v390_v1  ;;  %v542_v5 = vsel %vm400_vm1, %v1197_v50, 0.0  ;;  %v550_v50 = vsel %vm400_vm1, %v1320_v55, 0.0 }
 0x113   :  { %v556_v55 = vsel %vm400_vm1, %v356_v13, 0.0 }
 0x114   :  { %v513_v6 = vadd.f32 %v512_v16, %v511_v14  ;;  %461 = vst.msk [vmem:[%s1536_s3 + $0x1e0] sm:$0xff] %vm400_vm1, %v391_v52  ;;  %v544_v16 = vsel %vm400_vm1, %v1239_v2, 0.0 }
 0x116   :  { %v515_v21 = vadd.f32 %v514_v17, %v513_v6 }
 0x118   :  { %v517_v19 = vadd.f32 %v516_v7, %v515_v21 }
 0x119   :  { %v392_v59 = vpop.f32.mrf.mxu3 }
 0x11a   :  { %v519_v47 = vadd.f32 %v518_v38, %v517_v19  ;;  %v393_v46 = vadd.f32 %v933_v22, %v392_v59  ;;  %v558_v38 = vsel %vm400_vm1, %v358_v31, 0.0  ;;  %v568_v31 = vsel %vm400_vm1, %v1242_v8, 0.0 }
 0x11b   :  { %v578_v8 = vsel %vm400_vm1, %v1379_v26, 0.0 }
 0x11c   :  { %v521_v57 = vadd.f32 %v520_v3, %v519_v47  ;;  %462 = vst.msk [vmem:[%s1536_s3 + $0x1e8] sm:$0xff] %vm400_vm1, %v393_v46  ;;  %v560_v3 = vsel %vm400_vm1, %v1119_v24, 0.0  ;;  %v570_v24 = vsel %vm400_vm1, %v1257_v11, 0.0  ;;  %v580_v11 = vsel %vm400_vm1, %v1419_v12, 0.0 }
 0x11d   :  { %v586_v59 = vsel %vm400_vm1, %v393_v46, 0.0 }
 0x11e   :  { %v523_v18 = vadd.f32 %v522_v34, %v521_v57  ;;  %v562_v34 = vsel %vm400_vm1, %v1141_v33, 0.0  ;;  %v572_v33 = vsel %vm400_vm1, %v1312_v37, 0.0  ;;  %v582_v37 = vsel %vm400_vm1, %v1423_v29, 0.0 }
 0x120   :  { %v525_v39 = vadd.f32 %v524_v35, %v523_v18 }
 0x121   :  { %v395_v0 = vpop.f32.mrf.mxu3 }
 0x122   :  { %v527_v45 = vadd.f32 %v526_v28, %v525_v39  ;;  %v396_v21 = vadd.f32 %v933_v22, %v395_v0 }
 0x124   :  { %v529_v36 = vadd.f32 %v528_v48, %v527_v45  ;;  %463 = vst.msk [vmem:[%s1536_s3 + $0x1f0] sm:$0xff] %vm400_vm1, %v396_v21 }
 0x126   :  { %v531_v58 = vadd.f32 %v530_v43, %v529_v36 }
 0x128   :  { %v533_v49 = vadd.f32 %v532_v25, %v531_v58  ;;  %v584_v25 = vsel %vm400_vm1, %v391_v52, 0.0 }
 0x129   :  { %v397_v41 = vpop.f32.mrf.mxu3 }
 0x12a   :  { %v535_v56 = vadd.f32 %v534_v20, %v533_v49  ;;  %v398_v27 = vadd.f32 %v933_v22, %v397_v41  ;;  %v554_v22 = vsel %vm400_vm1, %v1376_v54, 0.0  ;;  %v566_v54 = vsel %vm400_vm1, %v1200_v51, 0.0 }
 0x12b   :  { %v576_v51 = vsel %vm400_vm1, %v1373_v44, 0.0  ;;  %v588_v44 = vsel %vm400_vm1, %v396_v21, 0.0 }
 0x12c   :  { %v537_v9 = vadd.f32 %v536_v62, %v535_v56  ;;  %464 = vst.msk [vmem:[%s1536_s3 + $0x1f8] sm:$0xff] %vm400_vm1, %v398_v27  ;;  %v590_v26 = vsel %vm400_vm1, %v398_v27, 0.0  ;;  %s702_s3 = smov [#allocation2]  }
 0x12d   :  { %s611_s25 = sshll.u32 %s702_s3, 4  ;;  %s612_s25 = int_to_ptr.vmem [resolvable:$true] %s611_s25 }
 0x12e   :  { %v539_v61 = vadd.f32 %v538_v60, %v537_v9 }
 0x130   :  { %v541_v4 = vadd.f32 %v540_v15, %v539_v61 }
 0x132   :  { %v543_v14 = vadd.f32 %v542_v5, %v541_v4 }
 0x134   :  { %v545_v6 = vadd.f32 %v544_v16, %v543_v14 }
 0x136   :  { %v547_v17 = vadd.f32 %v546_v23, %v545_v6 }
 0x138   :  { %v549_v7 = vadd.f32 %v548_v32, %v547_v17 }
 0x13a   :  { %v551_v2 = vadd.f32 %v550_v50, %v549_v7 }
 0x13c   :  { %v553_v53 = vadd.f32 %v552_v10, %v551_v2 }
 0x13e   :  { %v555_v30 = vadd.f32 %v554_v22, %v553_v53 }
 0x140   :  { %v557_v19 = vadd.f32 %v556_v55, %v555_v30 }
 0x142   :  { %v559_v47 = vadd.f32 %v558_v38, %v557_v19 }
 0x144   :  { %v561_v57 = vadd.f32 %v560_v3, %v559_v47 }
 0x146   :  { %v563_v18 = vadd.f32 %v562_v34, %v561_v57 }
 0x148   :  { %v565_v35 = vadd.f32 %v564_v40, %v563_v18 }
 0x14a   :  { %v567_v13 = vadd.f32 %v566_v54, %v565_v35 }
 0x14c   :  { %v569_v1 = vadd.f32 %v568_v31, %v567_v13 }
 0x14e   :  { %v571_v39 = vadd.f32 %v570_v24, %v569_v1 }
 0x150   :  { %v573_v28 = vadd.f32 %v572_v33, %v571_v39 }
 0x152   :  { %v575_v45 = vadd.f32 %v574_v42, %v573_v28 }
 0x154   :  { %v577_v48 = vadd.f32 %v576_v51, %v575_v45 }
 0x156   :  { %v579_v36 = vadd.f32 %v578_v8, %v577_v48 }
 0x158   :  { %v581_v43 = vadd.f32 %v580_v11, %v579_v36 }
 0x15a   :  { %v583_v58 = vadd.f32 %v582_v37, %v581_v43 }
 0x15c   :  { %v585_v63 = vadd.f32 %v584_v25, %v583_v58 }
 0x15e   :  { %v587_v49 = vadd.f32 %v586_v59, %v585_v63 }
 0x160   :  { %v589_v20 = vadd.f32 %v588_v44, %v587_v49 }
 0x162   :  { %v591_v56 = vadd.f32 %v590_v26, %v589_v20 }
 0x164   :  { %592 = vadd.xlane.f32.xlu0 %v591_v56 }
 0x1d7   :  { %v593_v62 = vpop.xlane.xlu0 %592 }
 0x1d8   :  { %v594_v12 = vrot.slane %v593_v62, 4 }
 0x1da   :  { %v595_v9 = vadd.f32 %v594_v12, %v593_v62 }
 0x1dc   :  { %v596_v60 = vrot.slane %v595_v9, 2 }
 0x1de   :  { %v597_v61 = vadd.f32 %v596_v60, %v595_v9 }
 0x1e0   :  { %v598_v29 = vrot.slane %v597_v61, 1 }
 0x1e2   :  { %v599_v15 = vadd.f32 %v598_v29, %v597_v61 }
 0x1e4   :  { %672 = vpush %v599_v15 }
 0x215   :  { %s673_s28 = spop %672 }
 0x216   :  { %v601_v52 = vstv %s673_s28 }
 0x217   :  { %603 = vst.msk [vmem:[#allocation2] sm:$0x1] %vm602_vm2, %v601_v52 }
 0x218   :  { %616 = dma.vmem_to_hbm [thread:$0]  %s612_s25, 16, %s614_s27, [#allocation3]  }
 0x219   :  { %700 = dma.done.wait [#allocation3], 16  }
 0x21a   :  { %701 = vsyncadd [#allocation3], 4294967280 }
 0x21b   :  { %623 = vsyncpa [#allocation3], 1 }

// kernel: forward.5
= control target key start
LH: loop header
LB: loop body
LE: loop exit
PB: predicated region body
PF: predicated region fallthrough
CT: control target
= control target key end

     0   :  { %10 = vsyncpa [#allocation5], 0  ;;  %s2963_s18 = smov 0   ;;  %s4327_s0 = inlined_call_operand.vmem [shape: f32[3], index: 0, kind: input, shape index: {}]   ;;  %s4328_s1 = inlined_call_operand.vmem [shape: f32[2,64,8], index: 1, kind: input, shape index: {}]   ;;  %s4329_s2 = inlined_call_operand.vmem [shape: f32[8,64,8], index: 2, kind: input, shape index: {}]   ;;  %s4330_s3 = inlined_call_operand.vmem [shape: f32[1,32], index: 3, kind: input, shape index: {}]   ;;  %s4331_s4 = inlined_call_operand.vmem [shape: f32[8,64,32], index: 4, kind: input, shape index: {}]   ;;  %s4332_s5 = inlined_call_operand.vmem [shape: f32[8,64,32], index: 5, kind: output, shape index: {}]  }
   0x1 LB: > { %s2390_s19 = sadd.s32 4294967295, %s2930_s18   ;;  %p2392_p0 = scmp.ge.s32.totalorder %s2930_s18, 1  ;;  %s2930_s18 = sphi %s2963_s18, %s16_s18  }
   0x2   : > { %p162_p1 = scmp.lt.s32.totalorder %s2930_s18, 3  ;;  %s174_s22 = sshll.u32 %s4327_s0, 4  ;;  %s175_s22 = int_to_ptr.vmem [resolvable:$true] %s174_s22 }
   0x3   : > { %p2734_p3 = scmp.eq.s32.totalorder %s2390_s19, 0  ;;  %s2932_s23 = smov [#allocation4]  }
   0x4   : > { %p163_p2 = pnand %p2392_p0, %p162_p1 }
   0x6   : > { %p2730_p4 = pneg %p163_p2  ;;  %213 = sbr.rel (%p163_p2) target bundleno = 1575 (0x627), region = 40 }
   0x8   : > { %p2731_p5 = pnand %p2734_p3, %p2730_p4 }
   0xa   : > { %2733 = dma.vmem_to_smem (!%p2731_p5), %s175_s22, 16, %s2932_s23, [#allocation5]  }
   0xb   : > { %2925 = dma.done.wait (%p2734_p3), [#allocation5], 16  }
   0xc   : > { %2927 = vsyncadd (%p2734_p3), [#allocation5], 4294967280 }
   0xd   : > { %220 = sfence }
   0xe   : > { %s2974_s24 = sshll.u32 %s2390_s19, 2  ;;  %s2406_s25 = sld [smem:[#allocation4 + $0x1]]  ;;  %vm407_vm0 = vcmask 64512   ;;  %v276_v58 = vld [vmem:[%s4328_s1] sm:$0xff]  ;;  %v277_v59 = vld [vmem:[%s4328_s1 + $0x8] sm:$0xff]  ;;  %vm325_vm1 = vcmask 60416  }
   0xf   : > { %p252_p6 = scmp.lt.s32.totalorder %s2974_s24, 7  ;;  %s344_s26 = ssub.s32 0, %s2974_s24  ;;  %vm469_vm2 = vcmask 523264   ;;  %vm1072_vm3 = vcmask 261120   ;;  %vm1586_vm4 = vcmask 7168  }
  0x10   : > { %p343_p7 = scmp.lt.s32.totalorder %s2974_s24, 0  ;;  %s2409_s28 = smin.u32 %s2974_s24, %s344_s26 }
  0x11   : > { %s253_s27 = scalar_select %p252_p6, %s2974_s24, 7 }
  0x12   : > { %s346_s30 = sand.u32 1, %s2409_s28   ;;  %s2992_s9 = sadd.s32 1, %s2974_s24 }
  0x13   : > { %s2981_s29 = sshll.u32 %s253_s27, 6  ;;  %s347_s10 = ssub.s32 0, %s346_s30 }
  0x14   : > { %s2987_s8 = scalar_lea.vmem %s4329_s2, %s2981_s29  ;;  %v2989_v0 = vstv %s2406_s25  ;;  %s4334_s10 = smov (!%p343_p7, %s347_s10), %s346_s30 }
  0x15   : > { %v372_v1 = vld [vmem:[%s2987_s8 + $0x30] sm:$0xff]  ;;  %v373_v2 = vld [vmem:[%s2987_s8 + $0x38] sm:$0xff]  ;;  %v370_v15 = vld [vmem:[%s2987_s8 + $0x20] sm:$0xff]  ;;  %s3013_s11 = sld [smem:[#allocation4]]  ;;  %s504_s12 = ssub.s32 0, %s2992_s9 }
  0x16   : > { %v2445_v3 = vld [vmem:[%s2987_s8 + $0x70] sm:$0xff]  ;;  %v381_v4 = vsub.f32 %v372_v1, %v2989_v0  ;;  %v382_v5 = vsub.f32 %v373_v2, %v2989_v0  ;;  %v2446_v6 = vld [vmem:[%s2987_s8 + $0x78] sm:$0xff]  ;;  %v371_v19 = vld [vmem:[%s2987_s8 + $0x28] sm:$0xff]  ;;  %v379_v20 = vsub.f32 %v370_v15, %v2989_v0  ;;  %p2411_p8 = scmp.lt.s32.totalorder %s4334_s10, 0  ;;  %s3029_s13 = smin.u32 %s504_s12, %s2992_s9 }
  0x17   : > { %v541_v7 = vsub.f32 %v2445_v3, %v2989_v0  ;;  %v2478_v8 = vld [vmem:[%s2987_s8 + $0xb0] sm:$0xff]  ;;  %v2479_v9 = vld [vmem:[%s2987_s8 + $0xb8] sm:$0xff]  ;;  %v542_v10 = vsub.f32 %v2446_v6, %v2989_v0  ;;  %v2443_v21 = vld [vmem:[%s2987_s8 + $0x60] sm:$0xff]  ;;  %v380_v25 = vsub.f32 %v371_v19, %v2989_v0  ;;  %s353_s14 = sadd.s32 2, %s4334_s10  ;;  %p503_p9 = scmp.lt.s32.totalorder %s2992_s9, 0 }
  0x18   : > { %v701_v11 = vsub.f32 %v2478_v8, %v2989_v0  ;;  %v702_v12 = vsub.f32 %v2479_v9, %v2989_v0  ;;  %v2511_v13 = vld [vmem:[%s2987_s8 + $0xf0] sm:$0xff]  ;;  %v2512_v14 = vld [vmem:[%s2987_s8 + $0xf8] sm:$0xff]  ;;  %v386_v16 = vpack.c.bf16 %v382_v5, %v381_v4  ;;  %v2444_v22 = vld [vmem:[%s2987_s8 + $0x68] sm:$0xff]  ;;  %v539_v26 = vsub.f32 %v2443_v21, %v2989_v0  ;;  %s506_s15 = sand.u32 1, %s3029_s13   ;;  %s3049_s17 = sadd.s32 2, %s2974_s24 }
  0x19   : > { %v861_v17 = vsub.f32 %v2511_v13, %v2989_v0  ;;  %v862_v18 = vsub.f32 %v2512_v14, %v2989_v0  ;;  %v546_v23 = vpack.c.bf16 %v542_v10, %v541_v7  ;;  %v2476_v27 = vld [vmem:[%s2987_s8 + $0xa0] sm:$0xff]  ;;  %v2477_v28 = vld [vmem:[%s2987_s8 + $0xa8] sm:$0xff]  ;;  %v540_v32 = vsub.f32 %v2444_v22, %v2989_v0  ;;  %v368_v35 = vld [vmem:[%s2987_s8 + $0x10] sm:$0xff]  ;;  %s507_s16 = ssub.s32 0, %s506_s15  ;;  %s4336_s14 = smov (!%p2411_p8, %s353_s14), %s4334_s10 }
  0x1a   : > { %v706_v24 = vpack.c.bf16 %v702_v12, %v701_v11  ;;  %v2509_v29 = vld [vmem:[%s2987_s8 + $0xe0] sm:$0xff]  ;;  %v430_v30 = vsel %vm407_vm0, %v386_v16, 0  ;;  %v699_v33 = vsub.f32 %v2476_v27, %v2989_v0  ;;  %v2510_v34 = vld [vmem:[%s2987_s8 + $0xe8] sm:$0xff]  ;;  %v369_v36 = vld [vmem:[%s2987_s8 + $0x18] sm:$0xff]  ;;  %v385_v39 = vpack.c.bf16 %v380_v25, %v379_v20  ;;  %s4338_s16 = smov (!%p503_p9, %s507_s16), %s506_s15  ;;  %s664_s23 = ssub.s32 0, %s3049_s17 }
  0x1b   : > { %v866_v31 = vpack.c.bf16 %v862_v18, %v861_v17  ;;  %436 = vmatpush.bf16.xpose.msra.mxu0 %v430_v30  ;;  %v589_v37 = vsel %vm407_vm0, %v546_v23, 0  ;;  %v700_v40 = vsub.f32 %v2477_v28, %v2989_v0  ;;  %v2441_v41 = vld [vmem:[%s2987_s8 + $0x50] sm:$0xff]  ;;  %v2442_v42 = vld [vmem:[%s2987_s8 + $0x58] sm:$0xff]  ;;  %v545_v44 = vpack.c.bf16 %v540_v32, %v539_v26  ;;  %s3083_s25 = sadd.s32 3, %s2974_s24  ;;  %v3089_v6 = vld [vmem:[%s2987_s8] sm:$0xff]  ;;  %s3095_s26 = smin.u32 %s664_s23, %s3049_s17 }
  0x1c   : > { %v749_v38 = vsel %vm407_vm0, %v706_v24, 0  ;;  %595 = vmatpush.bf16.xpose.msra.mxu1 %v589_v37  ;;  %v859_v45 = vsub.f32 %v2509_v29, %v2989_v0  ;;  %v860_v46 = vsub.f32 %v2510_v34, %v2989_v0  ;;  %v377_v48 = vsub.f32 %v368_v35, %v2989_v0  ;;  %v2474_v50 = vld [vmem:[%s2987_s8 + $0x90] sm:$0xff]  ;;  %v2475_v51 = vld [vmem:[%s2987_s8 + $0x98] sm:$0xff]  ;;  %v3092_v7 = vld [vmem:[%s2987_s8 + $0x8] sm:$0xff]  ;;  %p663_p10 = scmp.lt.s32.totalorder %s3049_s17, 0  ;;  %s666_s6 = sand.u32 1, %s3095_s26  }
  0x1d   : > { %755 = vmatpush.bf16.xpose.msra.mxu2 %v749_v38  ;;  %v909_v43 = vsel %vm407_vm0, %v866_v31, 0  ;;  %v705_v47 = vpack.c.bf16 %v700_v40, %v699_v33  ;;  %v378_v49 = vsub.f32 %v369_v36, %v2989_v0  ;;  %v537_v53 = vsub.f32 %v2441_v41, %v2989_v0  ;;  %v2507_v55 = vld [vmem:[%s2987_s8 + $0xd0] sm:$0xff]  ;;  %v2508_v56 = vld [vmem:[%s2987_s8 + $0xd8] sm:$0xff]  ;;  %v284_v9 = vld [vmem:[%s4328_s1 + $0x40] sm:$0xff]  ;;  %s824_s7 = ssub.s32 0, %s3083_s25  ;;  %p2436_p11 = scmp.lt.s32.totalorder %s4338_s16, 0 }
  0x1e   : > { %915 = vmatpush.bf16.xpose.msra.mxu3 %v909_v43  ;;  %v865_v52 = vpack.c.bf16 %v860_v46, %v859_v45  ;;  %v538_v54 = vsub.f32 %v2442_v42, %v2989_v0  ;;  %v427_v57 = vsel %vm407_vm0, %v385_v39, 0  ;;  %v3076_v60 = vstv %s3013_s11  ;;  %v285_v10 = vld [vmem:[%s4328_s1 + $0x48] sm:$0xff]  ;;  %v3108_v13 = vld [vmem:[%s2987_s8 + $0x40] sm:$0xff]  ;;  %s667_s9 = ssub.s32 0, %s666_s6  ;;  %v278_v21 = vld [vmem:[%s4328_s1 + $0x10] sm:$0xff]  ;;  %s513_s12 = sadd.s32 2, %s4338_s16 }
  0x1f   : > { %v586_v61 = vsel %vm407_vm0, %v545_v44, 0  ;;  %v384_v62 = vpack.c.bf16 %v378_v49, %v377_v48  ;;  %v697_v63 = vsub.f32 %v2474_v50, %v2989_v0  ;;  %v698_v1 = vsub.f32 %v2475_v51, %v2989_v0  ;;  %v3111_v14 = vld [vmem:[%s2987_s8 + $0x48] sm:$0xff]  ;;  %v2472_v19 = vld [vmem:[%s2987_s8 + $0x80] sm:$0xff]  ;;  %s3131_s13 = smin.u32 %s824_s7, %s3083_s25  ;;  %v279_v26 = vld [vmem:[%s4328_s1 + $0x18] sm:$0xff]  ;;  %s4340_s9 = smov (!%p663_p10, %s667_s9), %s666_s6 }
  0x20   : > { %v746_v2 = vsel %vm407_vm0, %v705_v47, 0  ;;  %v544_v3 = vpack.c.bf16 %v538_v54, %v537_v53  ;;  %v857_v4 = vsub.f32 %v2507_v55, %v2989_v0  ;;  %v858_v5 = vsub.f32 %v2508_v56, %v2989_v0  ;;  %v2473_v20 = vld [vmem:[%s2987_s8 + $0x88] sm:$0xff]  ;;  %v286_v27 = vld [vmem:[%s4328_s1 + $0x50] sm:$0xff]  ;;  %v287_v28 = vld [vmem:[%s4328_s1 + $0x58] sm:$0xff]  ;;  %p823_p12 = scmp.lt.s32.totalorder %s3083_s25, 0  ;;  %s826_s26 = sand.u32 1, %s3131_s13  }
  0x21   : > { %v906_v8 = vsel %vm407_vm0, %v865_v52, 0  ;;  %v293_v11 = vsub.f32 %v276_v58, %v3076_v60  ;;  %v294_v12 = vsub.f32 %v277_v59, %v3076_v60  ;;  %v424_v15 = vsel %vm407_vm0, %v384_v62, 0  ;;  %v2505_v34 = vld [vmem:[%s2987_s8 + $0xc0] sm:$0xff]  ;;  %v2506_v35 = vld [vmem:[%s2987_s8 + $0xc8] sm:$0xff]  ;;  %p2469_p13 = scmp.lt.s32.totalorder %s4340_s9, 0  ;;  %s673_s8 = sadd.s32 2, %s4340_s9 }
  0x22   : > { %v704_v16 = vpack.c.bf16 %v698_v1, %v697_v63  ;;  %v375_v17 = vsub.f32 %v3089_v6, %v2989_v0  ;;  %v376_v18 = vsub.f32 %v3092_v7, %v2989_v0  ;;  %v583_v22 = vsel %vm407_vm0, %v544_v3, 0  ;;  %s827_s17 = ssub.s32 0, %s826_s26  ;;  %s4342_s12 = smov (!%p2436_p11, %s513_s12), %s4338_s16  ;;  %v281_v54 = vld [vmem:[%s4328_s1 + $0x28] sm:$0xff]  ;;  %v288_v55 = vld [vmem:[%s4328_s1 + $0x60] sm:$0xff] }
  0x23   : > { %437 = vmatpush.bf16.xpose.msra.mxu0 %v427_v57  ;;  %v864_v23 = vpack.c.bf16 %v858_v5, %v857_v4  ;;  %v301_v24 = vsub.f32 %v284_v9, %v3076_v60  ;;  %v302_v25 = vsub.f32 %v285_v10, %v3076_v60  ;;  %v535_v29 = vsub.f32 %v3108_v13, %v2989_v0  ;;  %s4344_s17 = smov (!%p823_p12, %s827_s17), %s826_s26  ;;  %s4346_s8 = smov (!%p2469_p13, %s673_s8), %s4340_s9  ;;  %v289_v56 = vld [vmem:[%s4328_s1 + $0x68] sm:$0xff]  ;;  %v283_v13 = vld [vmem:[%s4328_s1 + $0x38] sm:$0xff] }
  0x24   : > { %596 = vmatpush.bf16.xpose.msra.mxu1 %v586_v61  ;;  %v536_v30 = vsub.f32 %v3111_v14, %v2989_v0  ;;  %v309_v31 = vpack.c.bf16 %v293_v11, %v293_v11  ;;  %v310_v32 = vpack.c.bf16 %v294_v12, %v294_v12  ;;  %v695_v33 = vsub.f32 %v2472_v19, %v2989_v0  ;;  %p2502_p0 = scmp.lt.s32.totalorder %s4344_s17, 0  ;;  %s833_s9 = sadd.s32 2, %s4344_s17  ;;  %v282_v12 = vld [vmem:[%s4328_s1 + $0x30] sm:$0xff] }
  0x25   : > { %756 = vmatpush.bf16.xpose.msra.mxu2 %v746_v2  ;;  %v317_v36 = vpack.c.bf16 %v301_v24, %v301_v24  ;;  %v318_v37 = vpack.c.bf16 %v302_v25, %v302_v25  ;;  %v295_v38 = vsub.f32 %v278_v21, %v3076_v60  ;;  %v696_v39 = vsub.f32 %v2473_v20, %v2989_v0  ;;  %s2674_s10 = sshll.u32 %s4336_s14, 5  ;;  %s2679_s11 = sshll.u32 %s4342_s12, 5  ;;  %v290_v14 = vld [vmem:[%s4328_s1 + $0x70] sm:$0xff] }
  0x26   : > { %916 = vmatpush.bf16.xpose.msra.mxu3 %v906_v8  ;;  %326 = vst.msk [vmem:[#allocation3] sm:$0xf] %vm325_vm1, %v309_v31  ;;  %v296_v40 = vsub.f32 %v279_v26, %v3076_v60  ;;  %v303_v41 = vsub.f32 %v286_v27, %v3076_v60  ;;  %v304_v42 = vsub.f32 %v287_v28, %v3076_v60  ;;  %v743_v43 = vsel %vm407_vm0, %v704_v16, 0  ;;  %s4348_s9 = smov (!%p2502_p0, %s833_s9), %s4344_s17  ;;  %s2684_s13 = sshll.u32 %s4346_s8, 5 }
  0x27   : > { %v903_v44 = vsel %vm407_vm0, %v864_v23, 0  ;;  %327 = vst.msk [vmem:[#allocation3 + $0x4] sm:$0xf] %vm325_vm1, %v310_v32  ;;  %v311_v45 = vpack.c.bf16 %v295_v38, %v295_v38  ;;  %v855_v46 = vsub.f32 %v2505_v34, %v2989_v0  ;;  %v856_v47 = vsub.f32 %v2506_v35, %v2989_v0  ;;  %v280_v0 = vld [vmem:[%s4328_s1 + $0x20] sm:$0xff]  ;;  %s2689_s15 = sshll.u32 %s4348_s9, 5  ;;  %s3215_s14 = scalar_lea.vmem [#allocation3], %s2674_s10 }
  0x28   : > { %334 = vst.msk [vmem:[#allocation3 + $0x20] sm:$0xf] %vm325_vm1, %v317_v36  ;;  %v312_v48 = vpack.c.bf16 %v296_v40, %v296_v40  ;;  %v319_v49 = vpack.c.bf16 %v303_v41, %v303_v41  ;;  %v320_v50 = vpack.c.bf16 %v304_v42, %v304_v42  ;;  %v383_v51 = vpack.c.bf16 %v376_v18, %v375_v17  ;;  %s3218_s12 = scalar_lea.vmem [#allocation3], %s2679_s11  ;;  %s3221_s19 = scalar_lea.vmem [#allocation3], %s2684_s13 }
  0x29   : > { %335 = vst.msk [vmem:[#allocation3 + $0x24] sm:$0xf] %vm325_vm1, %v318_v37  ;;  %v543_v52 = vpack.c.bf16 %v536_v30, %v535_v29  ;;  %v703_v53 = vpack.c.bf16 %v696_v39, %v695_v33  ;;  %v297_v57 = vsub.f32 %v280_v0, %v3076_v60  ;;  %v298_v58 = vsub.f32 %v281_v54, %v3076_v60  ;;  %s3224_s20 = scalar_lea.vmem [#allocation3], %s2689_s15  ;;  %s3415_s25 = scalar_lea.vmem %s4331_s4, %s2981_s29 }
  0x2a   : > { %328 = vst.msk [vmem:[#allocation3 + $0x8] sm:$0xf] %vm325_vm1, %v311_v45  ;;  %v305_v59 = vsub.f32 %v288_v55, %v3076_v60  ;;  %v863_v61 = vpack.c.bf16 %v856_v47, %v855_v46  ;;  %v306_v62 = vsub.f32 %v289_v56, %v3076_v60  ;;  %v421_v3 = vsel %vm407_vm0, %v383_v51, 0  ;;  %s3638_s21 = scalar_lea.vmem %s4332_s5, %s2981_s29 }
  0x2b   : > { %438 = vmatpush.bf16.xpose.msra.mxu0 %v424_v15  ;;  %329 = vst.msk [vmem:[#allocation3 + $0xc] sm:$0xf] %vm325_vm1, %v312_v48  ;;  %v313_v63 = vpack.c.bf16 %v297_v57, %v297_v57  ;;  %v314_v1 = vpack.c.bf16 %v298_v58, %v298_v58  ;;  %v580_v5 = vsel %vm407_vm0, %v543_v52, 0  ;;  %v740_v6 = vsel %vm407_vm0, %v703_v53, 0  ;;  %v291_v15 = vld [vmem:[%s4328_s1 + $0x78] sm:$0xff] }
  0x2c   : > { %597 = vmatpush.bf16.xpose.msra.mxu1 %v583_v22  ;;  %336 = vst.msk [vmem:[#allocation3 + $0x28] sm:$0xf] %vm325_vm1, %v319_v49  ;;  %v321_v2 = vpack.c.bf16 %v305_v59, %v305_v59  ;;  %v322_v4 = vpack.c.bf16 %v306_v62, %v306_v62  ;;  %v900_v7 = vsel %vm407_vm0, %v863_v61, 0  ;;  %v299_v16 = vsub.f32 %v282_v12, %v3076_v60 }
  0x2d   : > { %757 = vmatpush.bf16.xpose.msra.mxu2 %v743_v43  ;;  %337 = vst.msk [vmem:[#allocation3 + $0x2c] sm:$0xf] %vm325_vm1, %v320_v50  ;;  %v300_v17 = vsub.f32 %v283_v13, %v3076_v60  ;;  %v307_v18 = vsub.f32 %v290_v14, %v3076_v60  ;;  %v308_v19 = vsub.f32 %v291_v15, %v3076_v60 }
  0x2e   : > { %917 = vmatpush.bf16.xpose.msra.mxu3 %v903_v44  ;;  %330 = vst.msk [vmem:[#allocation3 + $0x10] sm:$0xf] %vm325_vm1, %v313_v63  ;;  %v315_v20 = vpack.c.bf16 %v299_v16, %v299_v16 }
  0x2f   : > { %331 = vst.msk [vmem:[#allocation3 + $0x14] sm:$0xf] %vm325_vm1, %v314_v1  ;;  %v316_v21 = vpack.c.bf16 %v300_v17, %v300_v17  ;;  %v323_v22 = vpack.c.bf16 %v307_v18, %v307_v18  ;;  %v324_v23 = vpack.c.bf16 %v308_v19, %v308_v19 }
  0x30   : > { %338 = vst.msk [vmem:[#allocation3 + $0x30] sm:$0xf] %vm325_vm1, %v321_v2 }
  0x31   : > { %339 = vst.msk [vmem:[#allocation3 + $0x34] sm:$0xf] %vm325_vm1, %v322_v4 }
  0x33   : > { %439 = vmatpush.bf16.xpose.msra.mxu0 %v421_v3 }
  0x34   : > { %598 = vmatpush.bf16.xpose.msra.mxu1 %v580_v5 }
  0x35   : > { %758 = vmatpush.bf16.xpose.msra.mxu2 %v740_v6 }
  0x36   : > { %918 = vmatpush.bf16.xpose.msra.mxu3 %v900_v7 }
  0x38   : > { %v2675_v8 = vld [vmem:[%s3215_s14] sm:$0xff] }
  0x39   : > { %v2680_v9 = vld [vmem:[%s3218_s12] sm:$0xff] }
  0x3a   : > { %v2685_v10 = vld [vmem:[%s3221_s19] sm:$0xff]  ;;  %2430 = vmatmul.msk.bf16.vlgmr.msra.gmra.mxu0 %vm407_vm0, %v2675_v8 }
  0x3b   : > { %v2690_v11 = vld [vmem:[%s3224_s20] sm:$0xff]  ;;  %2463 = vmatmul.msk.bf16.vlgmr.msra.gmra.mxu1 %vm407_vm0, %v2680_v9 }
  0x3c   : > { %2496 = vmatmul.msk.bf16.vlgmr.msra.gmra.mxu2 %vm407_vm0, %v2685_v10  ;;  %332 = vst.msk [vmem:[#allocation3 + $0x18] sm:$0xf] %vm325_vm1, %v315_v20 }
  0x3d   : > { %2529 = vmatmul.msk.bf16.vlgmr.msra.gmra.mxu3 %vm407_vm0, %v2690_v11  ;;  %333 = vst.msk [vmem:[#allocation3 + $0x1c] sm:$0xf] %vm325_vm1, %v316_v21 }
  0x3e   : > { %340 = vst.msk [vmem:[#allocation3 + $0x38] sm:$0xf] %vm325_vm1, %v323_v22 }
  0x3f   : > { %341 = vst.msk [vmem:[#allocation3 + $0x3c] sm:$0xf] %vm325_vm1, %v324_v23 }
  0x46   : > { %v2676_v24 = vld [vmem:[%s3215_s14 + $0x8] sm:$0xff]  ;;  %v2677_v27 = vld [vmem:[%s3215_s14 + $0x10] sm:$0xff]  ;;  %v2678_v31 = vld [vmem:[%s3215_s14 + $0x18] sm:$0xff] }
  0x47   : > { %v2681_v25 = vld [vmem:[%s3218_s12 + $0x8] sm:$0xff]  ;;  %v2682_v28 = vld [vmem:[%s3218_s12 + $0x10] sm:$0xff]  ;;  %v2683_v32 = vld [vmem:[%s3218_s12 + $0x18] sm:$0xff]  ;;  %s2407_s12 = sld [smem:[#allocation4 + $0x2]] }
  0x48   : > { %v2686_v60 = vld [vmem:[%s3221_s19 + $0x8] sm:$0xff]  ;;  %v2687_v29 = vld [vmem:[%s3221_s19 + $0x10] sm:$0xff]  ;;  %v2688_v33 = vld [vmem:[%s3221_s19 + $0x18] sm:$0xff] }
  0x49   : > { %v2691_v26 = vld [vmem:[%s3224_s20 + $0x8] sm:$0xff]  ;;  %v2692_v30 = vld [vmem:[%s3224_s20 + $0x10] sm:$0xff]  ;;  %v2693_v34 = vld [vmem:[%s3224_s20 + $0x18] sm:$0xff] }
  0x4a   : > { %2431 = vmatmul.msk.bf16.gmra.mxu0 %vm407_vm0, %v2676_v24 }
  0x4b   : > { %2464 = vmatmul.msk.bf16.gmra.mxu1 %vm407_vm0, %v2681_v25 }
  0x4c   : > { %2497 = vmatmul.msk.bf16.gmra.mxu2 %vm407_vm0, %v2686_v60 }
  0x4d   : > { %2530 = vmatmul.msk.bf16.gmra.mxu3 %vm407_vm0, %v2691_v26 }
  0x5a   : > { %2432 = vmatmul.msk.bf16.gmra.mxu0 %vm407_vm0, %v2677_v27 }
  0x5b   : > { %2465 = vmatmul.msk.bf16.gmra.mxu1 %vm407_vm0, %v2682_v28 }
  0x5c   : > { %2498 = vmatmul.msk.bf16.gmra.mxu2 %vm407_vm0, %v2687_v29 }
  0x5d   : > { %2531 = vmatmul.msk.bf16.gmra.mxu3 %vm407_vm0, %v2692_v30 }
  0x6a   : > { %2433 = vmatmul.msk.bf16.gmra.mxu0 %vm407_vm0, %v2678_v31 }
  0x6b   : > { %2466 = vmatmul.msk.bf16.gmra.mxu1 %vm407_vm0, %v2683_v32 }
  0x6c   : > { %2499 = vmatmul.msk.bf16.gmra.mxu2 %vm407_vm0, %v2688_v33 }
  0x6d   : > { %2532 = vmatmul.msk.bf16.gmra.mxu3 %vm407_vm0, %v2693_v34 }
  0xb7   : > { %v441_v35 = vpop.f32.mrf.mxu0 }
  0xb8   : > { %v3275_v36 = vmul.f32 0.125, %v441_v35  ;;  %v600_v37 = vpop.f32.mrf.mxu1 }
  0xb9   : > { %v3277_v38 = vmul.f32 0.125, %v600_v37 }
  0xba   : > { %470 = vst.msk [vmem:[#allocation2] sm:$0xff] %vm469_vm2, %v3275_v36  ;;  %v478_v37 = vsel %vm469_vm2, %v3275_v36, -inf }
  0xbb   : > { %629 = vst.msk [vmem:[#allocation2 + $0x40] sm:$0xff] %vm469_vm2, %v3277_v38 }
  0xbf   : > { %v760_v39 = vpop.f32.mrf.mxu2  ;;  %v443_v42 = vpop.f32.mrf.mxu0 }
  0xc0   : > { %v3283_v40 = vmul.f32 0.125, %v760_v39  ;;  %v920_v41 = vpop.f32.mrf.mxu3  ;;  %v3287_v44 = vmul.f32 0.125, %v443_v42  ;;  %v602_v45 = vpop.f32.mrf.mxu1 }
  0xc1   : > { %v3285_v43 = vmul.f32 0.125, %v920_v41  ;;  %v3291_v46 = vmul.f32 0.125, %v602_v45 }
  0xc2   : > { %789 = vst.msk [vmem:[#allocation2 + $0x80] sm:$0xff] %vm469_vm2, %v3283_v40  ;;  %v479_v60 = vsel %vm469_vm2, %v3287_v44, -inf }
  0xc3   : > { %949 = vst.msk [vmem:[#allocation2 + $0xc0] sm:$0xff] %vm469_vm2, %v3285_v43  ;;  %v638_v36 = vsel %vm469_vm2, %v3291_v46, -inf }
  0xc4   : > { %471 = vst.msk [vmem:[#allocation2 + $0x8] sm:$0xff] %vm469_vm2, %v3287_v44 }
  0xc5   : > { %630 = vst.msk [vmem:[#allocation2 + $0x48] sm:$0xff] %vm469_vm2, %v3291_v46 }
  0xc7   : > { %v762_v47 = vpop.f32.mrf.mxu2  ;;  %v446_v50 = vpop.f32.mrf.mxu0 }
  0xc8   : > { %v3299_v48 = vmul.f32 0.125, %v762_v47  ;;  %v922_v49 = vpop.f32.mrf.mxu3  ;;  %v3303_v52 = vmul.f32 0.125, %v446_v50  ;;  %v605_v53 = vpop.f32.mrf.mxu1 }
  0xc9   : > { %v3301_v51 = vmul.f32 0.125, %v922_v49  ;;  %v3307_v0 = vmul.f32 0.125, %v605_v53  ;;  %v797_v49 = vsel %vm469_vm2, %v3283_v40, -inf }
  0xca   : > { %790 = vst.msk [vmem:[#allocation2 + $0x88] sm:$0xff] %vm469_vm2, %v3299_v48  ;;  %v480_v39 = vsel %vm469_vm2, %v3303_v52, -inf  ;;  %v798_v50 = vsel %vm469_vm2, %v3299_v48, -inf }
  0xcb   : > { %950 = vst.msk [vmem:[#allocation2 + $0xc8] sm:$0xff] %vm469_vm2, %v3301_v51  ;;  %v639_v53 = vsel %vm469_vm2, %v3307_v0, -inf }
  0xcc   : > { %472 = vst.msk [vmem:[#allocation2 + $0x10] sm:$0xff] %vm469_vm2, %v3303_v52 }
  0xcd   : > { %631 = vst.msk [vmem:[#allocation2 + $0x50] sm:$0xff] %vm469_vm2, %v3307_v0 }
  0xcf   : > { %v765_v54 = vpop.f32.mrf.mxu2  ;;  %v448_v57 = vpop.f32.mrf.mxu0 }
  0xd0   : > { %v3315_v55 = vmul.f32 0.125, %v765_v54  ;;  %v925_v56 = vpop.f32.mrf.mxu3  ;;  %v464_v59 = vmul.f32 0.125, %v448_v57  ;;  %v607_v61 = vpop.f32.mrf.mxu1 }
  0xd1   : > { %v3317_v58 = vmul.f32 0.125, %v925_v56  ;;  %v3321_v62 = vmul.f32 0.125, %v607_v61 }
  0xd2   : > { %791 = vst.msk [vmem:[#allocation2 + $0x90] sm:$0xff] %vm469_vm2, %v3315_v55  ;;  %v481_v41 = vsel %vm469_vm2, %v464_v59, -inf }
  0xd3   : > { %951 = vst.msk [vmem:[#allocation2 + $0xd0] sm:$0xff] %vm469_vm2, %v3317_v58  ;;  %v640_v40 = vsel %vm469_vm2, %v3321_v62, -inf }
  0xd4   : > { %473 = vst.msk [vmem:[#allocation2 + $0x18] sm:$0xff] %vm469_vm2, %v464_v59 }
  0xd5   : > { %632 = vst.msk [vmem:[#allocation2 + $0x58] sm:$0xff] %vm469_vm2, %v3321_v62 }
  0xd7   : > { %v767_v63 = vpop.f32.mrf.mxu2  ;;  %v451_v3 = vpop.f32.mrf.mxu0 }
  0xd8   : > { %v3328_v1 = vmul.f32 0.125, %v767_v63  ;;  %v927_v2 = vpop.f32.mrf.mxu3  ;;  %v610_v5 = vpop.f32.mrf.mxu1  ;;  %v465_v6 = vmul.f32 0.125, %v451_v3 }
  0xd9   : > { %v3330_v4 = vmul.f32 0.125, %v927_v2  ;;  %v3336_v7 = vmul.f32 0.125, %v610_v5 }
  0xda   : > { %792 = vst.msk [vmem:[#allocation2 + $0x98] sm:$0xff] %vm469_vm2, %v3328_v1  ;;  %v482_v29 = vsel %vm469_vm2, %v465_v6, -inf }
  0xdb   : > { %952 = vst.msk [vmem:[#allocation2 + $0xd8] sm:$0xff] %vm469_vm2, %v3330_v4  ;;  %v483_v44 = vmax.f32 %v478_v37, %v482_v29 }
  0xdc   : > { %474 = vst.msk [vmem:[#allocation2 + $0x20] sm:$0xff] %vm469_vm2, %v465_v6  ;;  %v799_v6 = vsel %vm469_vm2, %v3315_v55, -inf }
  0xdd   : > { %633 = vst.msk [vmem:[#allocation2 + $0x60] sm:$0xff] %vm469_vm2, %v3336_v7 }
  0xdf   : > { %v770_v8 = vpop.f32.mrf.mxu2  ;;  %v453_v11 = vpop.f32.mrf.mxu0 }
  0xe0   : > { %v784_v9 = vmul.f32 0.125, %v770_v8  ;;  %v930_v10 = vpop.f32.mrf.mxu3  ;;  %v466_v13 = vmul.f32 0.125, %v453_v11  ;;  %v612_v14 = vpop.f32.mrf.mxu1  ;;  %v641_v8 = vsel %vm469_vm2, %v3336_v7, -inf }
  0xe1   : > { %v3341_v12 = vmul.f32 0.125, %v930_v10  ;;  %v625_v15 = vmul.f32 0.125, %v612_v14 }
  0xe2   : > { %793 = vst.msk [vmem:[#allocation2 + $0xa0] sm:$0xff] %vm469_vm2, %v784_v9  ;;  %v484_v24 = vsel %vm469_vm2, %v466_v13, -inf  ;;  %v801_v59 = vsel %vm469_vm2, %v784_v9, -inf  ;;  %v800_v9 = vsel %vm469_vm2, %v3328_v1, -inf }
  0xe3   : > { %953 = vst.msk [vmem:[#allocation2 + $0xe0] sm:$0xff] %vm469_vm2, %v3341_v12  ;;  %v485_v34 = vmax.f32 %v479_v60, %v484_v24  ;;  %v643_v46 = vsel %vm469_vm2, %v625_v15, -inf }
  0xe4   : > { %475 = vst.msk [vmem:[#allocation2 + $0x28] sm:$0xff] %vm469_vm2, %v466_v13  ;;  %v644_v11 = vmax.f32 %v638_v36, %v643_v46 }
  0xe5   : > { %634 = vst.msk [vmem:[#allocation2 + $0x68] sm:$0xff] %vm469_vm2, %v625_v15  ;;  %v490_v56 = vmax.f32 %v483_v44, %v485_v34  ;;  %v637_v15 = vsel %vm469_vm2, %v3277_v38, -inf }
  0xe6   : > { %v642_v7 = vmax.f32 %v637_v15, %v641_v8 }
  0xe7   : > { %v772_v16 = vpop.f32.mrf.mxu2  ;;  %v456_v19 = vpop.f32.mrf.mxu0 }
  0xe8   : > { %v785_v17 = vmul.f32 0.125, %v772_v16  ;;  %v932_v18 = vpop.f32.mrf.mxu3  ;;  %v615_v21 = vpop.f32.mrf.mxu1  ;;  %v467_v22 = vmul.f32 0.125, %v456_v19  ;;  %v802_v16 = vmax.f32 %v797_v49, %v801_v59  ;;  %v649_v38 = vmax.f32 %v642_v7, %v644_v11  ;;  %v1498_v11 = vld [vmem:[%s3415_s25 + $0x20] sm:$0xff] }
  0xe9   : > { %v3348_v20 = vmul.f32 0.125, %v932_v18  ;;  %v626_v23 = vmul.f32 0.125, %v615_v21 }
  0xea   : > { %794 = vst.msk [vmem:[#allocation2 + $0xa8] sm:$0xff] %vm469_vm2, %v785_v17  ;;  %v486_v30 = vsel %vm469_vm2, %v467_v22, -inf  ;;  %v803_v54 = vsel %vm469_vm2, %v785_v17, -inf }
  0xeb   : > { %954 = vst.msk [vmem:[#allocation2 + $0xe8] sm:$0xff] %vm469_vm2, %v3348_v20  ;;  %v487_v45 = vmax.f32 %v480_v39, %v486_v30  ;;  %v645_v48 = vsel %vm469_vm2, %v626_v23, -inf  ;;  %v804_v62 = vmax.f32 %v798_v50, %v803_v54 }
  0xec   : > { %476 = vst.msk [vmem:[#allocation2 + $0x30] sm:$0xff] %vm469_vm2, %v467_v22  ;;  %v646_v13 = vmax.f32 %v639_v53, %v645_v48  ;;  %v960_v22 = vsel %vm469_vm2, %v3330_v4, -inf }
  0xed   : > { %635 = vst.msk [vmem:[#allocation2 + $0x70] sm:$0xff] %vm469_vm2, %v626_v23  ;;  %v809_v1 = vmax.f32 %v802_v16, %v804_v62  ;;  %v963_v23 = vsel %vm469_vm2, %v3348_v20, -inf  ;;  %v957_v20 = vsel %vm469_vm2, %v3285_v43, -inf }
  0xef   : > { %v775_v25 = vpop.f32.mrf.mxu2  ;;  %v458_v28 = vpop.f32.mrf.mxu0 }
  0xf0   : > { %v786_v26 = vmul.f32 0.125, %v775_v25  ;;  %v935_v27 = vpop.f32.mrf.mxu3  ;;  %v468_v32 = vmul.f32 0.125, %v458_v28  ;;  %v617_v33 = vpop.f32.mrf.mxu1  ;;  %v961_v28 = vsel %vm469_vm2, %v3341_v12, -inf  ;;  %v3425_v12 = vld [vmem:[%s3415_s25 + $0x8] sm:$0xff] }
  0xf1   : > { %v946_v31 = vmul.f32 0.125, %v935_v27  ;;  %v627_v35 = vmul.f32 0.125, %v617_v33  ;;  %v959_v27 = vsel %vm469_vm2, %v3317_v58, -inf  ;;  %v2745_v58 = vld [vmem:[%s4330_s3] ss:$0 sm:$0xff] }
  0xf2   : > { %795 = vst.msk [vmem:[#allocation2 + $0xb0] sm:$0xff] %vm469_vm2, %v786_v26  ;;  %v488_v42 = vsel %vm469_vm2, %v468_v32, -inf  ;;  %v805_v63 = vsel %vm469_vm2, %v786_v26, -inf  ;;  %v958_v26 = vsel %vm469_vm2, %v3301_v51, -inf  ;;  %v3418_v51 = vld [vmem:[%s3415_s25] sm:$0xff]  ;;  %v1510_v15 = vmul.f32 %v2745_v58, %v1498_v11 }
  0xf3   : > { %955 = vst.msk [vmem:[#allocation2 + $0xf0] sm:$0xff] %vm469_vm2, %v946_v31  ;;  %v489_v47 = vmax.f32 %v481_v41, %v488_v42  ;;  %v647_v52 = vsel %vm469_vm2, %v627_v35, -inf  ;;  %v806_v55 = vmax.f32 %v799_v6, %v805_v63  ;;  %v965_v24 = vsel %vm469_vm2, %v946_v31, -inf }
  0xf4   : > { %477 = vst.msk [vmem:[#allocation2 + $0x38] sm:$0xff] %vm469_vm2, %v468_v32  ;;  %v648_v2 = vmax.f32 %v640_v40, %v647_v52  ;;  %v964_v4 = vmax.f32 %v958_v26, %v963_v23  ;;  %v966_v30 = vmax.f32 %v959_v27, %v965_v24  ;;  %v962_v31 = vmax.f32 %v957_v20, %v961_v28  ;;  %v3449_v26 = vld [vmem:[%s3415_s25 + $0x70] sm:$0xff]  ;;  %v3452_v27 = vld [vmem:[%s3415_s25 + $0x78] sm:$0xff] }
  0xf5   : > { %636 = vst.msk [vmem:[#allocation2 + $0x78] sm:$0xff] %vm469_vm2, %v627_v35  ;;  %v491_v57 = vmax.f32 %v487_v45, %v489_v47  ;;  %v1506_v43 = vmul.f32 %v2745_v58, %v3418_v51  ;;  %v1507_v41 = vmul.f32 %v2745_v58, %v3425_v12  ;;  %v2563_v28 = vld [vmem:[%s3415_s25 + $0xb0] sm:$0xff] }
  0xf6   : > { %v650_v19 = vmax.f32 %v646_v13, %v648_v2  ;;  %v969_v33 = vmax.f32 %v962_v31, %v964_v4  ;;  %v3432_v13 = vld [vmem:[%s3415_s25 + $0x18] sm:$0xff]  ;;  %v1154_v4 = vpack.c.bf16 %v3452_v27, %v3449_v26  ;;  %v2583_v20 = vld [vmem:[%s3415_s25 + $0xf0] sm:$0xff] }
  0xf7   : > { %v777_v61 = vpop.f32.mrf.mxu2  ;;  %v492_v0 = vmax.f32 %v490_v56, %v491_v57  ;;  %v1514_v37 = vsel %vm1072_vm3, %v1506_v43, 0.0  ;;  %v1517_v45 = vsel %vm1072_vm3, %v1507_v41, 0.0  ;;  %v1509_v16 = vmul.f32 %v2745_v58, %v3432_v13  ;;  %v2584_v31 = vld [vmem:[%s3415_s25 + $0xf8] sm:$0xff]  ;;  %v3464_v43 = vld [vmem:[%s3415_s25 + $0x68] sm:$0xff]  ;;  %v2581_v41 = vld [vmem:[%s3415_s25 + $0xe0] sm:$0xff] }
  0xf8   : > { %v787_v3 = vmul.f32 0.125, %v777_v61  ;;  %v937_v5 = vpop.f32.mrf.mxu3  ;;  %v651_v29 = vmax.f32 %v649_v38, %v650_v19  ;;  %1515 = vadd.xlane.f32.xlu2 %v1514_v37  ;;  %v1501_v19 = vld [vmem:[%s3415_s25 + $0x38] sm:$0xff]  ;;  %1171 = vmatpush.bf16.msrb.mxu1 %v1154_v4  ;;  %v1234_v4 = vld [vmem:[#allocation2 + $0xa0] sm:$0xff] }
  0xf9   : > { %v947_v10 = vmul.f32 0.125, %v937_v5  ;;  %493 = vmax.xlane.f32.xlu0 %v492_v0  ;;  %v1523_v7 = vsel %vm1072_vm3, %v1509_v16, 0.0  ;;  %v1231_v16 = vld [vmem:[#allocation2 + $0x88] sm:$0xff] }
  0xfa   : > { %796 = vst.msk [vmem:[#allocation2 + $0xb8] sm:$0xff] %vm469_vm2, %v787_v3  ;;  %v807_v14 = vsel %vm469_vm2, %v787_v3, -inf }
  0xfb   : > { %v808_v17 = vmax.f32 %v800_v9, %v807_v14  ;;  %956 = vst.msk [vmem:[#allocation2 + $0xf8] sm:$0xff] %vm469_vm2, %v947_v10  ;;  %v967_v18 = vsel %vm469_vm2, %v947_v10, -inf  ;;  %v3435_v14 = vld [vmem:[%s3415_s25 + $0x10] sm:$0xff] }
  0xfc   : > { %v968_v25 = vmax.f32 %v960_v22, %v967_v18  ;;  %v1513_v22 = vmul.f32 %v2745_v58, %v1501_v19 }
  0xfd   : > { %v810_v21 = vmax.f32 %v806_v55, %v808_v17  ;;  %v1508_v55 = vmul.f32 %v2745_v58, %v3435_v14  ;;  %v1526_v17 = vsel %vm1072_vm3, %v1510_v15, 0.0 }
  0xfe   : > { %v970_v32 = vmax.f32 %v966_v30, %v968_v25  ;;  %v1535_v38 = vsel %vm1072_vm3, %v1513_v22, 0.0  ;;  %v2564_v30 = vld [vmem:[%s3415_s25 + $0xb8] sm:$0xff] }
  0xff   : > { %v811_v60 = vmax.f32 %v809_v1, %v810_v21  ;;  %v1520_v18 = vsel %vm1072_vm3, %v1508_v55, 0.0  ;;  %v1500_v1 = vld [vmem:[%s3415_s25 + $0x30] sm:$0xff]  ;;  %v1499_v21 = vld [vmem:[%s3415_s25 + $0x28] sm:$0xff]  ;;  %v1354_v55 = vld [vmem:[#allocation2 + $0xc0] sm:$0xff] }
 0x100   : > { %v971_v34 = vmax.f32 %v969_v33, %v970_v32  ;;  %1518 = vadd.xlane.f32.xlu2 %v1517_v45  ;;  %v1512_v23 = vmul.f32 %v2745_v58, %v1500_v1  ;;  %v1511_v24 = vmul.f32 %v2745_v58, %v1499_v21  ;;  %v1278_v32 = vpack.c.bf16 %v2564_v30, %v2563_v28  ;;  %v3461_v58 = vld [vmem:[%s3415_s25 + $0x60] sm:$0xff]  ;;  %v1233_v22 = vld [vmem:[#allocation2 + $0x98] sm:$0xff]  ;;  %v1235_v30 = vld [vmem:[#allocation2 + $0xa8] sm:$0xff] }
 0x101   : > { %812 = vmax.xlane.f32.xlu1 %v811_v60  ;;  %652 = vmax.xlane.f32.xlu0 %v651_v29  ;;  %v1030_v29 = vpack.c.bf16 %v1501_v19, %v1500_v1  ;;  %v1402_v33 = vpack.c.bf16 %v2584_v31, %v2583_v20  ;;  %v1153_v37 = vpack.c.bf16 %v3464_v43, %v3461_v58  ;;  %v1236_v20 = vld [vmem:[#allocation2 + $0xb0] sm:$0xff] }
 0x102   : > { %v1532_v25 = vsel %vm1072_vm3, %v1512_v23, 0.0  ;;  %v1529_v60 = vsel %vm1072_vm3, %v1511_v24, 0.0  ;;  %1295 = vmatpush.bf16.msrb.mxu2 %v1278_v32 }
 0x103   : > { %1047 = vmatpush.bf16.msrb.mxu0 %v1030_v29  ;;  %1419 = vmatpush.bf16.msrb.mxu3 %v1402_v33 }
 0x104   : > { %1172 = vmatpush.bf16.msrb.mxu1 %v1153_v37 }
 0x108   : > { %1527 = vadd.xlane.f32.xlu2 %v1526_v17  ;;  %v1355_v17 = vld [vmem:[#allocation2 + $0xc8] sm:$0xff] }
 0x109   : > { %972 = vmax.xlane.f32.xlu1 %v971_v34  ;;  %1521 = vadd.xlane.f32.xlu0 %v1520_v18  ;;  %v1029_v34 = vpack.c.bf16 %v1499_v21, %v1498_v11  ;;  %v1232_v21 = vld [vmem:[#allocation2 + $0x90] sm:$0xff] }
 0x10b   : > { %1048 = vmatpush.bf16.msrb.mxu0 %v1029_v34  ;;  %v1237_v34 = vld [vmem:[#allocation2 + $0xb8] sm:$0xff] }
 0x110   : > { %1536 = vadd.xlane.f32.xlu2 %v1535_v38 }
 0x111   : > { %1524 = vadd.xlane.f32.xlu1 %v1523_v7  ;;  %1530 = vadd.xlane.f32.xlu0 %v1529_v60 }
 0x119   : > { %1533 = vadd.xlane.f32.xlu1 %v1532_v25 }
 0x16c   : > { %v494_v35 = vpop.xlane.xlu0 %493 }
 0x16d   : > { %v495_v39 = vrot.slane %v494_v35, 4 }
 0x16f   : > { %v496_v42 = vmax.f32 %v494_v35, %v495_v39  ;;  %v2561_v35 = vld [vmem:[%s3415_s25 + $0xa0] sm:$0xff]  ;;  %v2562_v39 = vld [vmem:[%s3415_s25 + $0xa8] sm:$0xff] }
 0x171   : > { %v497_v44 = vrot.slane %v496_v42, 2 }
 0x173   : > { %v498_v49 = vmax.f32 %v496_v42, %v497_v44  ;;  %v2582_v42 = vld [vmem:[%s3415_s25 + $0xe8] sm:$0xff]  ;;  %v1277_v44 = vpack.c.bf16 %v2562_v39, %v2561_v35 }
 0x174   : > { %v813_v47 = vpop.xlane.xlu1 %812  ;;  %v653_v50 = vpop.xlane.xlu0 %652  ;;  %v1401_v45 = vpack.c.bf16 %v2582_v42, %v2581_v41  ;;  %v1108_v41 = vld [vmem:[#allocation2 + $0x50] sm:$0xff] }
 0x175   : > { %v814_v36 = vrot.slane %v813_v47, 4  ;;  %v654_v52 = vrot.slane %v653_v50, 4  ;;  %v499_v53 = vrot.slane %v498_v49, 1  ;;  %1296 = vmatpush.bf16.msrb.mxu2 %v1277_v44 }
 0x176   : > { %1420 = vmatpush.bf16.msrb.mxu3 %v1401_v45 }
 0x177   : > { %v815_v54 = vmax.f32 %v813_v47, %v814_v36  ;;  %v655_v56 = vmax.f32 %v653_v50, %v654_v52  ;;  %v500_v57 = vmax.f32 %v498_v49, %v499_v53  ;;  %v3473_v47 = vld [vmem:[%s3415_s25 + $0x50] sm:$0xff]  ;;  %v3476_v49 = vld [vmem:[%s3415_s25 + $0x58] sm:$0xff] }
 0x178   : > { %v2559_v36 = vld [vmem:[%s3415_s25 + $0x90] sm:$0xff]  ;;  %v2560_v50 = vld [vmem:[%s3415_s25 + $0x98] sm:$0xff] }
 0x179   : > { %v816_v40 = vrot.slane %v815_v54, 2  ;;  %v656_v59 = vrot.slane %v655_v56, 2  ;;  %2694 = vpush %v500_v57  ;;  %v2579_v52 = vld [vmem:[%s3415_s25 + $0xd0] sm:$0xff]  ;;  %v2580_v53 = vld [vmem:[%s3415_s25 + $0xd8] sm:$0xff]  ;;  %v1276_v57 = vpack.c.bf16 %v2560_v50, %v2559_v36  ;;  %v1110_v50 = vld [vmem:[#allocation2 + $0x60] sm:$0xff] }
 0x17a   : > { %v1109_v36 = vld [vmem:[#allocation2 + $0x58] sm:$0xff] }
 0x17b   : > { %v817_v46 = vmax.f32 %v815_v54, %v816_v40  ;;  %v657_v61 = vmax.f32 %v655_v56, %v656_v59  ;;  %v1028_v54 = vpack.c.bf16 %v3432_v13, %v3435_v14  ;;  %v1152_v56 = vpack.c.bf16 %v3476_v49, %v3473_v47  ;;  %v3487_v59 = vld [vmem:[%s3415_s25 + $0x40] sm:$0xff]  ;;  %1297 = vmatpush.bf16.msrb.mxu2 %v1276_v57 }
 0x17c   : > { %v973_v48 = vpop.xlane.xlu1 %972  ;;  %v1400_v40 = vpack.c.bf16 %v2580_v53, %v2579_v52  ;;  %v1111_v52 = vld [vmem:[#allocation2 + $0x68] sm:$0xff]  ;;  %v1112_v53 = vld [vmem:[#allocation2 + $0x70] sm:$0xff] }
 0x17d   : > { %v974_v63 = vrot.slane %v973_v48, 4  ;;  %v818_v2 = vrot.slane %v817_v46, 1  ;;  %v658_v3 = vrot.slane %v657_v61, 1  ;;  %1049 = vmatpush.bf16.msrb.mxu0 %v1028_v54  ;;  %1173 = vmatpush.bf16.msrb.mxu1 %v1152_v56  ;;  %v1113_v54 = vld [vmem:[#allocation2 + $0x78] sm:$0xff] }
 0x17e   : > { %1421 = vmatpush.bf16.msrb.mxu3 %v1400_v40 }
 0x17f   : > { %v975_v5 = vmax.f32 %v973_v48, %v974_v63  ;;  %v659_v0 = vmax.f32 %v657_v61, %v658_v3  ;;  %v819_v8 = vmax.f32 %v817_v46, %v818_v2  ;;  %v3490_v46 = vld [vmem:[%s3415_s25 + $0x48] sm:$0xff]  ;;  %v2557_v48 = vld [vmem:[%s3415_s25 + $0x80] sm:$0xff]  ;;  %v1027_v3 = vpack.c.bf16 %v3425_v12, %v3418_v51 }
 0x180   : > { %v2558_v61 = vld [vmem:[%s3415_s25 + $0x88] sm:$0xff]  ;;  %v2577_v63 = vld [vmem:[%s3415_s25 + $0xc0] sm:$0xff] }
 0x181   : > { %v976_v6 = vrot.slane %v975_v5, 2  ;;  %2696 = vpush %v659_v0  ;;  %v2578_v2 = vld [vmem:[%s3415_s25 + $0xc8] sm:$0xff]  ;;  %v1275_v0 = vpack.c.bf16 %v2558_v61, %v2557_v48  ;;  %1050 = vmatpush.bf16.msrb.mxu0 %v1027_v3  ;;  %v1106_v51 = vld [vmem:[#allocation2 + $0x40] sm:$0xff] }
 0x182   : > { %2698 = vpush %v819_v8  ;;  %v982_v8 = vld [vmem:[#allocation2] sm:$0xff] }
 0x183   : > { %v977_v62 = vmax.f32 %v975_v5, %v976_v6  ;;  %v1151_v5 = vpack.c.bf16 %v3490_v46, %v3487_v59  ;;  %v1399_v6 = vpack.c.bf16 %v2578_v2, %v2577_v63  ;;  %1298 = vmatpush.bf16.msrb.mxu2 %v1275_v0 }
 0x185   : > { %v978_v10 = vrot.slane %v977_v62, 1  ;;  %1174 = vmatpush.bf16.msrb.mxu1 %v1151_v5  ;;  %1422 = vmatpush.bf16.msrb.mxu3 %v1399_v6 }
 0x187   : > { %v979_v9 = vmax.f32 %v977_v62, %v978_v10  ;;  %v983_v62 = vld [vmem:[#allocation2 + $0x8] sm:$0xff] }
 0x188   : > { %v1107_v10 = vld [vmem:[#allocation2 + $0x48] sm:$0xff] }
 0x189   : > { %2700 = vpush %v979_v9  ;;  %v1230_v9 = vld [vmem:[#allocation2 + $0x80] sm:$0xff] }
 0x1aa   : > { %s2695_s7 = spop %2694 }
 0x1b2   : > { %s2697_s9 = spop %2696 }
 0x1b3   : > { %s661_s10 = smax.f32 %s2697_s9, %s2695_s7  ;;  %s2699_s11 = spop %2698 }
 0x1b4   : > { %s821_s13 = smax.f32 %s2699_s11, %s661_s10 }
 0x1ba   : > { %s2701_s15 = spop %2700 }
 0x1bb   : > { %s981_s14 = smax.f32 %s2701_s15, %s821_s13 }
 0x1bc   : > { %v3500_v12 = vstv %s981_s14 }
 0x1bd   : > { %v991_v11 = vsub.f32 %v982_v8, %v3500_v12  ;;  %v992_v13 = vsub.f32 %v983_v62, %v3500_v12  ;;  %v1114_v14 = vsub.f32 %v1106_v51, %v3500_v12  ;;  %v1115_v15 = vsub.f32 %v1107_v10, %v3500_v12 }
 0x1be   : > { %v1238_v7 = vsub.f32 %v1230_v9, %v3500_v12  ;;  %v1239_v18 = vsub.f32 %v1231_v16, %v3500_v12  ;;  %v1362_v19 = vsub.f32 %v1354_v55, %v3500_v12  ;;  %v1363_v1 = vsub.f32 %v1355_v17, %v3500_v12 }
 0x1bf   : > { %v999_v23 = vmul.f32 1.442695, %v991_v11  ;;  %v1001_v24 = vmul.f32 1.442695, %v992_v13  ;;  %v1122_v38 = vmul.f32 1.442695, %v1114_v14  ;;  %v1240_v60 = vsub.f32 %v1232_v21, %v3500_v12 }
 0x1c0   : > { %v1124_v25 = vmul.f32 1.442695, %v1115_v15  ;;  %v1241_v28 = vsub.f32 %v1233_v22, %v3500_v12  ;;  %v1246_v29 = vmul.f32 1.442695, %v1238_v7  ;;  %v1248_v31 = vmul.f32 1.442695, %v1239_v18 }
 0x1c1   : > { %2749 = vpow2.f32 %v999_v23  ;;  %v1370_v32 = vmul.f32 1.442695, %v1362_v19  ;;  %v1372_v33 = vmul.f32 1.442695, %v1363_v1  ;;  %v1242_v35 = vsub.f32 %v1234_v4, %v3500_v12  ;;  %v984_v14 = vld [vmem:[#allocation2 + $0x10] sm:$0xff]  ;;  %v985_v21 = vld [vmem:[#allocation2 + $0x18] sm:$0xff] }
 0x1c2   : > { %2751 = vpow2.f32 %v1001_v24  ;;  %v1243_v37 = vsub.f32 %v1235_v30, %v3500_v12  ;;  %v1244_v39 = vsub.f32 %v1236_v20, %v3500_v12  ;;  %v1245_v42 = vsub.f32 %v1237_v34, %v3500_v12  ;;  %v986_v22 = vld [vmem:[#allocation2 + $0x20] sm:$0xff]  ;;  %v988_v30 = vld [vmem:[#allocation2 + $0x30] sm:$0xff]  ;;  %v989_v34 = vld [vmem:[#allocation2 + $0x38] sm:$0xff] }
 0x1c3   : > { %2753 = vpow2.f32 %v1122_v38  ;;  %v1250_v44 = vmul.f32 1.442695, %v1240_v60  ;;  %v1252_v45 = vmul.f32 1.442695, %v1241_v28  ;;  %v1116_v56 = vsub.f32 %v1108_v41, %v3500_v12  ;;  %v987_v38 = vld [vmem:[#allocation2 + $0x28] sm:$0xff] }
 0x1c4   : > { %2755 = vpow2.f32 %v1124_v25  ;;  %v1117_v57 = vsub.f32 %v1109_v36, %v3500_v12  ;;  %v1118_v40 = vsub.f32 %v1110_v50, %v3500_v12  ;;  %v1119_v48 = vsub.f32 %v1111_v52, %v3500_v12 }
 0x1c5   : > { %2757 = vpow2.f32 %v1246_v29  ;;  %v1120_v61 = vsub.f32 %v1112_v53, %v3500_v12  ;;  %v1121_v63 = vsub.f32 %v1113_v54, %v3500_v12  ;;  %v1254_v3 = vmul.f32 1.442695, %v1242_v35 }
 0x1c6   : > { %2759 = vpow2.f32 %v1248_v31  ;;  %v1256_v5 = vmul.f32 1.442695, %v1243_v37  ;;  %v1258_v0 = vmul.f32 1.442695, %v1244_v39  ;;  %v1260_v8 = vmul.f32 1.442695, %v1245_v42 }
 0x1c7   : > { %v3522_v2 = vpop.eup %2749  ;;  %2761 = vpow2.f32 %v1370_v32  ;;  %v1126_v51 = vmul.f32 1.442695, %v1116_v56  ;;  %v1128_v62 = vmul.f32 1.442695, %v1117_v57  ;;  %v1130_v11 = vmul.f32 1.442695, %v1118_v40 }
 0x1c8   : > { %v2752_v6 = vpop.eup %2751  ;;  %2763 = vpow2.f32 %v1372_v33  ;;  %v1132_v13 = vmul.f32 1.442695, %v1119_v48  ;;  %v1134_v16 = vmul.f32 1.442695, %v1120_v61  ;;  %v1136_v55 = vmul.f32 1.442695, %v1121_v63 }
 0x1c9   : > { %v2754_v10 = vpop.eup %2753  ;;  %v1015_v9 = vpack.c.bf16 %v2752_v6, %v3522_v2  ;;  %2765 = vpow2.f32 %v1250_v44  ;;  %v993_v17 = vsub.f32 %v984_v14, %v3500_v12  ;;  %v994_v25 = vsub.f32 %v985_v21, %v3500_v12  ;;  %v1356_v63 = vld [vmem:[#allocation2 + $0xd0] sm:$0xff] }
 0x1ca   : > { %v2756_v15 = vpop.eup %2755  ;;  %2767 = vpow2.f32 %v1252_v45  ;;  %v1205_v19 = vsel %vm469_vm2, %v2754_v10, 0.0  ;;  %v995_v60 = vsub.f32 %v986_v22, %v3500_v12  ;;  %v996_v20 = vsub.f32 %v987_v38, %v3500_v12  ;;  %v1359_v22 = vld [vmem:[#allocation2 + $0xe8] sm:$0xff] }
 0x1cb   : > { %v2758_v7 = vpop.eup %2757  ;;  %2533 = vmatmul.msk.bf16.vlgmr.msrb.gmra.mxu0 %vm469_vm2, %v1015_v9  ;;  %v1138_v18 = vpack.c.bf16 %v2756_v15, %v2754_v10  ;;  %2769 = vpow2.f32 %v1254_v3  ;;  %v1206_v1 = vsel %vm469_vm2, %v2756_v15, 0.0  ;;  %v997_v35 = vsub.f32 %v988_v30, %v3500_v12  ;;  %v1358_v15 = vld [vmem:[#allocation2 + $0xe0] sm:$0xff] }
 0x1cc   : > { %v2760_v23 = vpop.eup %2759  ;;  %2771 = vpow2.f32 %v1256_v5  ;;  %v1329_v24 = vsel %vm469_vm2, %v2758_v7, 0.0  ;;  %v1207_v33 = vadd.f32 %v1206_v1, %v1205_v19  ;;  %v998_v41 = vsub.f32 %v989_v34, %v3500_v12 }
 0x1cd   : > { %v3532_v28 = vpop.eup %2761  ;;  %2545 = vmatmul.msk.bf16.vlgmr.msrb.gmra.mxu1 %vm469_vm2, %v1138_v18  ;;  %v1262_v29 = vpack.c.bf16 %v2760_v23, %v2758_v7  ;;  %2773 = vpow2.f32 %v1258_v0  ;;  %v1330_v4 = vsel %vm469_vm2, %v2760_v23, 0.0  ;;  %v1003_v42 = vmul.f32 1.442695, %v993_v17 }
 0x1ce   : > { %v3537_v31 = vpop.eup %2763  ;;  %2775 = vpow2.f32 %v1260_v8  ;;  %v1331_v32 = vadd.f32 %v1330_v4, %v1329_v24  ;;  %v1005_v36 = vmul.f32 1.442695, %v994_v25  ;;  %v1007_v50 = vmul.f32 1.442695, %v995_v60  ;;  %v1357_v8 = vld [vmem:[#allocation2 + $0xd8] sm:$0xff] }
 0x1cf   : > { %v3540_v37 = vpop.eup %2765  ;;  %2565 = vmatmul.msk.bf16.vlgmr.msrb.gmra.mxu2 %vm469_vm2, %v1262_v29  ;;  %v1386_v39 = vpack.c.bf16 %v3537_v31, %v3532_v28  ;;  %2777 = vpow2.f32 %v1126_v51  ;;  %v1081_v54 = vsel %vm469_vm2, %v3522_v2, 0.0  ;;  %v1082_v56 = vsel %vm469_vm2, %v2752_v6, 0.0 }
 0x1d0   : > { %v3546_v44 = vpop.eup %2767  ;;  %v1332_v45 = vsel %vm469_vm2, %v3540_v37, 0.0  ;;  %2779 = vpow2.f32 %v1128_v62  ;;  %v1009_v48 = vmul.f32 1.442695, %v996_v20  ;;  %v1011_v61 = vmul.f32 1.442695, %v997_v35 }
 0x1d1   : > { %v3550_v52 = vpop.eup %2769  ;;  %2585 = vmatmul.msk.bf16.vlgmr.msrb.gmra.mxu3 %vm469_vm2, %v1386_v39  ;;  %v1333_v53 = vadd.f32 %v1332_v45, %v1331_v32  ;;  %2781 = vpow2.f32 %v1130_v11  ;;  %v1334_v40 = vsel %vm469_vm2, %v3546_v44, 0.0  ;;  %v1013_v0 = vmul.f32 1.442695, %v998_v41  ;;  %v1360_v32 = vld [vmem:[#allocation2 + $0xf0] sm:$0xff]  ;;  %v1361_v45 = vld [vmem:[#allocation2 + $0xf8] sm:$0xff] }
 0x1d2   : > { %v3556_v57 = vpop.eup %2771  ;;  %2783 = vpow2.f32 %v1132_v13  ;;  %v1364_v51 = vsub.f32 %v1356_v63, %v3500_v12  ;;  %v1336_v6 = vsel %vm469_vm2, %v3550_v52, 0.0  ;;  %v1083_v62 = vadd.f32 %v1082_v56, %v1081_v54 }
 0x1d3   : > { %v3560_v3 = vpop.eup %2773  ;;  %v1335_v5 = vadd.f32 %v1334_v40, %v1333_v53  ;;  %2785 = vpow2.f32 %v1134_v16  ;;  %v1365_v10 = vsub.f32 %v1357_v8, %v3500_v12  ;;  %v1338_v13 = vsel %vm469_vm2, %v3556_v57, 0.0 }
 0x1d4   : > { %v3563_v2 = vpop.eup %2775  ;;  %2787 = vpow2.f32 %v1136_v55  ;;  %v1263_v14 = vpack.c.bf16 %v3546_v44, %v3540_v37  ;;  %v1340_v17 = vsel %vm469_vm2, %v3560_v3, 0.0  ;;  %v1366_v55 = vsub.f32 %v1358_v15, %v3500_v12 }
 0x1d5   : > { %v2778_v9 = vpop.eup %2777  ;;  %v1337_v11 = vadd.f32 %v1336_v6, %v1335_v5  ;;  %2789 = vpow2.f32 %v1003_v42  ;;  %v1374_v21 = vmul.f32 1.442695, %v1364_v51  ;;  %v1342_v24 = vsel %vm469_vm2, %v3563_v2, 0.0 }
 0x1d6   : > { %v2780_v16 = vpop.eup %2779  ;;  %v1208_v7 = vsel %vm469_vm2, %v2778_v9, 0.0  ;;  %2791 = vpow2.f32 %v1005_v36  ;;  %v1376_v25 = vmul.f32 1.442695, %v1365_v10  ;;  %v1367_v60 = vsub.f32 %v1359_v22, %v3500_v12 }
 0x1d7   : > { %v3576_v18 = vpop.eup %2781  ;;  %v1339_v19 = vadd.f32 %v1338_v13, %v1337_v11  ;;  %v1209_v1 = vadd.f32 %v1208_v7, %v1207_v33  ;;  %2793 = vpow2.f32 %v1007_v50  ;;  %v1210_v38 = vsel %vm469_vm2, %v2780_v16, 0.0 }
 0x1d8   : > { %v3578_v23 = vpop.eup %2783  ;;  %v1212_v20 = vsel %vm469_vm2, %v3576_v18, 0.0  ;;  %2795 = vpow2.f32 %v1009_v48  ;;  %v1139_v34 = vpack.c.bf16 %v2780_v16, %v2778_v9  ;;  %v1368_v35 = vsub.f32 %v1360_v32, %v3500_v12 }
 0x1d9   : > { %v3584_v29 = vpop.eup %2785  ;;  %v1341_v4 = vadd.f32 %v1340_v17, %v1339_v19  ;;  %v1211_v30 = vadd.f32 %v1210_v38, %v1209_v1  ;;  %2797 = vpow2.f32 %v1011_v61  ;;  %v1378_v37 = vmul.f32 1.442695, %v1366_v55 }
 0x1da   : > { %v3588_v33 = vpop.eup %2787  ;;  %v1214_v44 = vsel %vm469_vm2, %v3578_v23, 0.0  ;;  %2799 = vpow2.f32 %v1374_v21  ;;  %v1369_v53 = vsub.f32 %v1361_v45, %v3500_v12  ;;  %v1380_v54 = vmul.f32 1.442695, %v1367_v60 }
 0x1db   : > { %v2790_v39 = vpop.eup %2789  ;;  %v1343_v41 = vadd.f32 %v1342_v24, %v1341_v4  ;;  %v1213_v42 = vadd.f32 %v1212_v20, %v1211_v30  ;;  %2801 = vpow2.f32 %v1376_v25  ;;  %v1216_v63 = vsel %vm469_vm2, %v3584_v29, 0.0 }
 0x1dc   : > { %v2792_v36 = vpop.eup %2791  ;;  %v1084_v50 = vsel %vm469_vm2, %v2790_v39, 0.0  ;;  %2803 = vpow2.f32 %v1013_v0  ;;  %v1382_v8 = vmul.f32 1.442695, %v1368_v35  ;;  %v1453_v12 = vsel %vm469_vm2, %v3532_v28, 0.0 }
 0x1dd   : > { %v2794_v56 = vpop.eup %2793  ;;  %1344 = vadd.xlane.f32.xlu2 %v1343_v41  ;;  %v1215_v40 = vadd.f32 %v1214_v44, %v1213_v42  ;;  %v1085_v48 = vadd.f32 %v1084_v50, %v1083_v62  ;;  %v1016_v61 = vpack.c.bf16 %v2792_v36, %v2790_v39  ;;  %2546 = vmatmul.msk.bf16.gmra.mxu1 %vm469_vm2, %v1139_v34  ;;  %v1086_v5 = vsel %vm469_vm2, %v2792_v36, 0.0 }
 0x1de   : > { %2805 = vpow2.f32 %v1378_v37  ;;  %v2796_v51 = vpop.eup %2795  ;;  %v1218_v62 = vsel %vm469_vm2, %v3588_v33, 0.0  ;;  %v1088_v9 = vsel %vm469_vm2, %v2794_v56, 0.0  ;;  %v1454_v11 = vsel %vm469_vm2, %v3537_v31, 0.0 }
 0x1df   : > { %v1217_v6 = vadd.f32 %v1216_v63, %v1215_v40  ;;  %v1087_v10 = vadd.f32 %v1086_v5, %v1085_v48  ;;  %2534 = vmatmul.msk.bf16.gmra.mxu0 %vm469_vm2, %v1016_v61  ;;  %2566 = vmatmul.msk.bf16.gmra.mxu2 %vm469_vm2, %v1263_v14  ;;  %v2798_v0 = vpop.eup %2797  ;;  %2807 = vpow2.f32 %v1380_v54  ;;  %v1384_v17 = vmul.f32 1.442695, %v1369_v53  ;;  %v1525_v63 = vpop.xlane.xlu1 %1524 }
 0x1e0   : > { %v2800_v13 = vpop.eup %2799  ;;  %v1090_v14 = vsel %vm469_vm2, %v2796_v51, 0.0  ;;  %2809 = vpow2.f32 %v1382_v8  ;;  %v1455_v55 = vadd.f32 %v1454_v11, %v1453_v12  ;;  %v1092_v24 = vsel %vm469_vm2, %v2798_v0, 0.0  ;;  %v1522_v5 = vpop.xlane.xlu0 %1521 }
 0x1e1   : > { %v1219_v15 = vadd.f32 %v1218_v62, %v1217_v6  ;;  %v1089_v16 = vadd.f32 %v1088_v9, %v1087_v10  ;;  %v2802_v7 = vpop.eup %2801  ;;  %v1456_v21 = vsel %vm469_vm2, %v2800_v13, 0.0  ;;  %2811 = vpow2.f32 %v1384_v17 }
 0x1e2   : > { %v2804_v28 = vpop.eup %2803  ;;  %v1387_v1 = vpack.c.bf16 %v2802_v7, %v2800_v13  ;;  %v1457_v38 = vadd.f32 %v1456_v21, %v1455_v55  ;;  %v1458_v25 = vsel %vm469_vm2, %v2802_v7, 0.0  ;;  %v1140_v44 = vpack.c.bf16 %v3578_v23, %v3576_v18 }
 0x1e3   : > { %1220 = vadd.xlane.f32.xlu1 %v1219_v15  ;;  %v1091_v19 = vadd.f32 %v1090_v14, %v1089_v16  ;;  %v1094_v4 = vsel %vm469_vm2, %v2804_v28, 0.0  ;;  %v1017_v36 = vpack.c.bf16 %v2796_v51, %v2794_v56  ;;  %v1264_v50 = vpack.c.bf16 %v3556_v57, %v3550_v52  ;;  %v1516_v56 = vpop.xlane.xlu2 %1515 }
 0x1e4   : > { %v2806_v22 = vpop.eup %2805  ;;  %2586 = vmatmul.msk.bf16.gmra.mxu3 %vm469_vm2, %v1387_v1  ;;  %v1459_v30 = vadd.f32 %v1458_v25, %v1457_v38  ;;  %v1141_v18 = vpack.c.bf16 %v3588_v33, %v3584_v29  ;;  %v1018_v23 = vpack.c.bf16 %v2804_v28, %v2798_v0  ;;  %v1265_v52 = vpack.c.bf16 %v3563_v2, %v3560_v3 }
 0x1e5   : > { %v1093_v31 = vadd.f32 %v1092_v24, %v1091_v19  ;;  %v2808_v60 = vpop.eup %2807  ;;  %v1460_v32 = vsel %vm469_vm2, %v2806_v22, 0.0  ;;  %v3640_v3 = vstv %s2407_s12 }
 0x1e6   : > { %v2810_v34 = vpop.eup %2809  ;;  %v1461_v35 = vadd.f32 %v1460_v32, %v1459_v30  ;;  %v1462_v37 = vsel %vm469_vm2, %v2808_v60, 0.0  ;;  %v1388_v40 = vpack.c.bf16 %v2808_v60, %v2806_v22  ;;  %v3645_v6 = vadd.f32 %v3640_v3, %v1516_v56 }
 0x1e7   : > { %v1095_v20 = vadd.f32 %v1094_v4, %v1093_v31  ;;  %v2812_v41 = vpop.eup %2811  ;;  %v1464_v42 = vsel %vm469_vm2, %v2810_v34, 0.0  ;;  %v1534_v33 = vpop.xlane.xlu1 %1533  ;;  %v3654_v0 = vadd.f32 %v3640_v3, %v1525_v63  ;;  %v3659_v62 = vadd.f32 %v3640_v3, %v1522_v5 }
 0x1e8   : > { %v1463_v39 = vadd.f32 %v1462_v37, %v1461_v35  ;;  %v1466_v53 = vsel %vm469_vm2, %v2812_v41, 0.0  ;;  %v1389_v57 = vpack.c.bf16 %v2812_v41, %v2810_v34  ;;  %v1531_v8 = vpop.xlane.xlu0 %1530  ;;  %v3665_v11 = vadd.f32 %v3640_v3, %v1534_v33 }
 0x1e9   : > { %1096 = vadd.xlane.f32.xlu0 %v1095_v20  ;;  %v3668_v13 = vadd.f32 %v3640_v3, %v1531_v8 }
 0x1ea   : > { %v1465_v45 = vadd.f32 %v1464_v42, %v1463_v39  ;;  %v1549_v17 = vmax.f32 %v3659_v62, %v3665_v11 }
 0x1eb   : > { %v1519_v48 = vpop.xlane.xlu2 %1518 }
 0x1ec   : > { %v1467_v54 = vadd.f32 %v1466_v53, %v1465_v45  ;;  %v3648_v10 = vadd.f32 %v3640_v3, %v1519_v48 }
 0x1ed   : > { %2547 = vmatmul.msk.bf16.gmra.mxu1 %vm469_vm2, %v1140_v44 }
 0x1ee   : > { %v1548_v7 = vmax.f32 %v3648_v10, %v3668_v13 }
 0x1ef   : > { %2535 = vmatmul.msk.bf16.gmra.mxu0 %vm469_vm2, %v1017_v36  ;;  %2567 = vmatmul.msk.bf16.gmra.mxu2 %vm469_vm2, %v1264_v50 }
 0x1f1   : > { %1468 = vadd.xlane.f32.xlu0 %v1467_v54 }
 0x1f3   : > { %v1528_v61 = vpop.xlane.xlu2 %1527 }
 0x1f4   : > { %2587 = vmatmul.msk.bf16.gmra.mxu3 %vm469_vm2, %v1388_v40  ;;  %v3651_v12 = vadd.f32 %v3640_v3, %v1528_v61 }
 0x1f6   : > { %v1547_v15 = vmax.f32 %v3645_v6, %v3651_v12 }
 0x1f8   : > { %v1551_v22 = vmax.f32 %v1547_v15, %v1548_v7 }
 0x1fb   : > { %v1537_v2 = vpop.xlane.xlu2 %1536 }
 0x1fc   : > { %v3662_v9 = vadd.f32 %v3640_v3, %v1537_v2 }
 0x1fd   : > { %2548 = vmatmul.msk.bf16.gmra.mxu1 %vm469_vm2, %v1141_v18 }
 0x1fe   : > { %v1550_v16 = vmax.f32 %v3654_v0, %v3662_v9 }
 0x1ff   : > { %2536 = vmatmul.msk.bf16.gmra.mxu0 %vm469_vm2, %v1018_v23  ;;  %2568 = vmatmul.msk.bf16.gmra.mxu2 %vm469_vm2, %v1265_v52 }
 0x200   : > { %v1552_v21 = vmax.f32 %v1549_v17, %v1550_v16 }
 0x202   : > { %v1553_v60 = vmax.f32 %v1551_v22, %v1552_v21  ;;  %v2746_v22 = vld [vmem:[%s4330_s3] ss:$0 sm:$0xff] }
 0x204   : > { %2588 = vmatmul.msk.bf16.gmra.mxu3 %vm469_vm2, %v1389_v57  ;;  %v1554_v39 = vrot.slane %v1553_v60, 4 }
 0x206   : > { %v1555_v50 = vmax.f32 %v1553_v60, %v1554_v39 }
 0x208   : > { %v1556_v56 = vrot.slane %v1555_v50, 2 }
 0x248   : > { %v1052_v29 = vpop.f32.mrf.mxu0 }
 0x249   : > { %1073 = vst.msk [vmem:[%s3638_s21] sm:$0xff] %vm1072_vm3, %v1052_v29 }
 0x24a   : > { %v1176_v51 = vpop.f32.mrf.mxu1 }
 0x24b   : > { %2549 = vst.msk [vmem:[%s3638_s21 + $0x40] sm:$0xff] %vm1072_vm3, %v1176_v51  ;;  %v1557_v51 = vmax.f32 %v1555_v50, %v1556_v56 }
 0x250   : > { %v1345_v14 = vpop.xlane.xlu2 %1344  ;;  %v1054_v55 = vpop.f32.mrf.mxu0 }
 0x251   : > { %1074 = vst.msk [vmem:[%s3638_s21 + $0x8] sm:$0xff] %vm1072_vm3, %v1054_v55  ;;  %v1346_v1 = vrot.slane %v1345_v14, 4 }
 0x252   : > { %v1300_v28 = vpop.f32.mrf.mxu2  ;;  %v1178_v19 = vpop.f32.mrf.mxu1 }
 0x253   : > { %2569 = vst.msk [vmem:[%s3638_s21 + $0x80] sm:$0xff] %vm1072_vm3, %v1300_v28  ;;  %v1347_v31 = vadd.f32 %v1346_v1, %v1345_v14  ;;  %v1558_v14 = vrot.slane %v1557_v51, 1 }
 0x254   : > { %v1424_v24 = vpop.f32.mrf.mxu3  ;;  %2550 = vst.msk [vmem:[%s3638_s21 + $0x48] sm:$0xff] %vm1072_vm3, %v1178_v19 }
 0x255   : > { %2589 = vst.msk [vmem:[%s3638_s21 + $0xc0] sm:$0xff] %vm1072_vm3, %v1424_v24  ;;  %v1348_v32 = vrot.slane %v1347_v31, 2  ;;  %v1559_v1 = vmax.f32 %v1557_v51, %v1558_v14 }
 0x256   : > { %v1221_v38 = vpop.xlane.xlu1 %1220 }
 0x257   : > { %v1222_v25 = vrot.slane %v1221_v38, 4  ;;  %v1349_v36 = vadd.f32 %v1348_v32, %v1347_v31  ;;  %v1710_v31 = vmul.f32 %v2746_v22, %v3490_v46  ;;  %v1711_v32 = vmul.f32 %v2746_v22, %v3473_v47 }
 0x258   : > { %v1716_v47 = vmul.f32 %v2746_v22, %v3452_v27 }
 0x259   : > { %v1223_v4 = vadd.f32 %v1222_v25, %v1221_v38  ;;  %v1350_v52 = vrot.slane %v1349_v36, 1  ;;  %v1709_v25 = vmul.f32 %v2746_v22, %v3487_v59  ;;  %v1720_v60 = vsel %vm1072_vm3, %v1710_v31, 0.0 }
 0x25a   : > { %v1302_v30 = vpop.f32.mrf.mxu2  ;;  %v1181_v20 = vpop.f32.mrf.mxu1  ;;  %1721 = vadd.xlane.f32.xlu2 %v1720_v60  ;;  %v1713_v59 = vmul.f32 %v2746_v22, %v3461_v58  ;;  %v1738_v50 = vsel %vm1072_vm3, %v1716_v47, 0.0 }
 0x25b   : > { %v1224_v34 = vrot.slane %v1223_v4, 2  ;;  %2570 = vst.msk [vmem:[%s3638_s21 + $0x88] sm:$0xff] %vm1072_vm3, %v1302_v30  ;;  %v1351_v33 = vadd.f32 %v1350_v52, %v1349_v36 }
 0x25c   : > { %v1097_v35 = vpop.xlane.xlu0 %1096  ;;  %v1426_v37 = vpop.f32.mrf.mxu3  ;;  %2551 = vst.msk [vmem:[%s3638_s21 + $0x50] sm:$0xff] %vm1072_vm3, %v1181_v20  ;;  %v1712_v20 = vmul.f32 %v2746_v22, %v3476_v49  ;;  %v1715_v49 = vmul.f32 %v2746_v22, %v3449_v26 }
 0x25d   : > { %v1098_v41 = vrot.slane %v1097_v35, 4  ;;  %2590 = vst.msk [vmem:[%s3638_s21 + $0xc8] sm:$0xff] %vm1072_vm3, %v1426_v37  ;;  %v1057_v42 = vpop.f32.mrf.mxu0  ;;  %v1225_v44 = vadd.f32 %v1224_v34, %v1223_v4  ;;  %v1717_v4 = vsel %vm1072_vm3, %v1709_v25, 0.0  ;;  %v1729_v37 = vsel %vm1072_vm3, %v1713_v59, 0.0 }
 0x25e   : > { %1075 = vst.msk [vmem:[%s3638_s21 + $0x10] sm:$0xff] %vm1072_vm3, %v1057_v42  ;;  %1718 = vadd.xlane.f32.xlu1 %v1717_v4  ;;  %v1726_v39 = vsel %vm1072_vm3, %v1712_v20, 0.0  ;;  %v1714_v42 = vmul.f32 %v2746_v22, %v3464_v43  ;;  %v1735_v27 = vsel %vm1072_vm3, %v1715_v49, 0.0 }
 0x25f   : > { %v1099_v45 = vadd.f32 %v1098_v41, %v1097_v35  ;;  %v1226_v54 = vrot.slane %v1225_v44, 1  ;;  %v1723_v41 = vsel %vm1072_vm3, %v1711_v32, 0.0 }
 0x260   : > { %1724 = vadd.xlane.f32.xlu0 %v1723_v41 }
 0x261   : > { %v1100_v53 = vrot.slane %v1099_v45, 2  ;;  %v1227_v5 = vadd.f32 %v1226_v54, %v1225_v44 }
 0x262   : > { %v1305_v40 = vpop.f32.mrf.mxu2  ;;  %v1183_v18 = vpop.f32.mrf.mxu1  ;;  %1730 = vadd.xlane.f32.xlu2 %v1729_v37 }
 0x263   : > { %v1101_v23 = vadd.f32 %v1100_v53, %v1099_v45  ;;  %2571 = vst.msk [vmem:[%s3638_s21 + $0x90] sm:$0xff] %vm1072_vm3, %v1305_v40  ;;  %v1732_v45 = vsel %vm1072_vm3, %v1714_v42, 0.0 }
 0x264   : > { %v1469_v57 = vpop.xlane.xlu0 %1468  ;;  %2552 = vst.msk [vmem:[%s3638_s21 + $0x58] sm:$0xff] %vm1072_vm3, %v1183_v18 }
 0x265   : > { %v1470_v48 = vrot.slane %v1469_v57, 4  ;;  %v1102_v61 = vrot.slane %v1101_v23, 1  ;;  %v1059_v63 = vpop.f32.mrf.mxu0 }
 0x266   : > { %1076 = vst.msk [vmem:[%s3638_s21 + $0x18] sm:$0xff] %vm1072_vm3, %v1059_v63  ;;  %1727 = vadd.xlane.f32.xlu1 %v1726_v39 }
 0x267   : > { %v1471_v2 = vadd.f32 %v1470_v48, %v1469_v57  ;;  %v1103_v29 = vadd.f32 %v1102_v61, %v1101_v23  ;;  %v1429_v8 = vpop.f32.mrf.mxu3 }
 0x268   : > { %2591 = vst.msk [vmem:[%s3638_s21 + $0xd0] sm:$0xff] %vm1072_vm3, %v1429_v8  ;;  %1733 = vadd.xlane.f32.xlu0 %v1732_v45 }
 0x269   : > { %v1472_v15 = vrot.slane %v1471_v2, 2  ;;  %2702 = vpush %v1103_v29 }
 0x26a   : > { %2704 = vpush %v1227_v5  ;;  %v1307_v16 = vpop.f32.mrf.mxu2  ;;  %v1186_v17 = vpop.f32.mrf.mxu1  ;;  %1739 = vadd.xlane.f32.xlu2 %v1738_v50 }
 0x26b   : > { %2706 = vpush %v1351_v33  ;;  %v1473_v7 = vadd.f32 %v1472_v15, %v1471_v2 }
 0x26c   : > { %2572 = vst.msk [vmem:[%s3638_s21 + $0x98] sm:$0xff] %vm1072_vm3, %v1307_v16 }
 0x26d   : > { %v1474_v55 = vrot.slane %v1473_v7, 1  ;;  %v1062_v28 = vpop.f32.mrf.mxu0  ;;  %2553 = vst.msk [vmem:[%s3638_s21 + $0x60] sm:$0xff] %vm1072_vm3, %v1186_v17 }
 0x26e   : > { %1077 = vst.msk [vmem:[%s3638_s21 + $0x20] sm:$0xff] %vm1072_vm3, %v1062_v28  ;;  %1736 = vadd.xlane.f32.xlu1 %v1735_v27 }
 0x26f   : > { %v1475_v19 = vadd.f32 %v1474_v55, %v1473_v7  ;;  %v1431_v21 = vpop.f32.mrf.mxu3 }
 0x270   : > { %2592 = vst.msk [vmem:[%s3638_s21 + $0xd8] sm:$0xff] %vm1072_vm3, %v1431_v21 }
 0x271   : > { %2708 = vpush %v1475_v19 }
 0x272   : > { %2710 = vpush %v1559_v1  ;;  %v1310_v24 = vpop.f32.mrf.mxu2  ;;  %v1188_v38 = vpop.f32.mrf.mxu1 }
 0x273   : > { %2573 = vst.msk [vmem:[%s3638_s21 + $0xa0] sm:$0xff] %vm1072_vm3, %v1310_v24 }
 0x274   : > { %2554 = vst.msk [vmem:[%s3638_s21 + $0x68] sm:$0xff] %vm1072_vm3, %v1188_v38 }
 0x275   : > { %v1064_v30 = vpop.f32.mrf.mxu0 }
 0x276   : > { %1078 = vst.msk [vmem:[%s3638_s21 + $0x28] sm:$0xff] %vm1072_vm3, %v1064_v30 }
 0x277   : > { %v1434_v46 = vpop.f32.mrf.mxu3 }
 0x278   : > { %2593 = vst.msk [vmem:[%s3638_s21 + $0xe0] sm:$0xff] %vm1072_vm3, %v1434_v46 }
 0x27a   : > { %v1312_v34 = vpop.f32.mrf.mxu2  ;;  %v1191_v35 = vpop.f32.mrf.mxu1 }
 0x27b   : > { %2574 = vst.msk [vmem:[%s3638_s21 + $0xa8] sm:$0xff] %vm1072_vm3, %v1312_v34 }
 0x27c   : > { %2555 = vst.msk [vmem:[%s3638_s21 + $0x70] sm:$0xff] %vm1072_vm3, %v1191_v35 }
 0x27d   : > { %v1067_v58 = vpop.f32.mrf.mxu0 }
 0x27e   : > { %1079 = vst.msk [vmem:[%s3638_s21 + $0x30] sm:$0xff] %vm1072_vm3, %v1067_v58 }
 0x27f   : > { %v1436_v44 = vpop.f32.mrf.mxu3 }
 0x280   : > { %2594 = vst.msk [vmem:[%s3638_s21 + $0xe8] sm:$0xff] %vm1072_vm3, %v1436_v44 }
 0x282   : > { %v1315_v36 = vpop.f32.mrf.mxu2  ;;  %v1193_v26 = vpop.f32.mrf.mxu1 }
 0x283   : > { %2575 = vst.msk [vmem:[%s3638_s21 + $0xb0] sm:$0xff] %vm1072_vm3, %v1315_v36 }
 0x284   : > { %2556 = vst.msk [vmem:[%s3638_s21 + $0x78] sm:$0xff] %vm1072_vm3, %v1193_v26 }
 0x285   : > { %v1069_v43 = vpop.f32.mrf.mxu0 }
 0x286   : > { %1080 = vst.msk [vmem:[%s3638_s21 + $0x38] sm:$0xff] %vm1072_vm3, %v1069_v43 }
 0x287   : > { %v1439_v53 = vpop.f32.mrf.mxu3 }
 0x288   : > { %2595 = vst.msk [vmem:[%s3638_s21 + $0xf0] sm:$0xff] %vm1072_vm3, %v1439_v53  ;;  %v2747_v53 = vld [vmem:[%s4330_s3] ss:$0 sm:$0xff] }
 0x28a   : > { %v1317_v54 = vpop.f32.mrf.mxu2 }
 0x28b   : > { %2576 = vst.msk [vmem:[%s3638_s21 + $0xb8] sm:$0xff] %vm1072_vm3, %v1317_v54  ;;  %v3839_v54 = vld [vmem:[%s3415_s25 + $0x90] sm:$0xff] }
 0x28f   : > { %v1441_v40 = vpop.f32.mrf.mxu3 }
 0x290   : > { %2596 = vst.msk [vmem:[%s3638_s21 + $0xf8] sm:$0xff] %vm1072_vm3, %v1441_v40 }
 0x29a   : > { %s2703_s23 = spop %2702 }
 0x29b   : > { %s2705_s26 = spop %2704 }
 0x29c   : > { %s1229_s8 = sadd.f32 %s2705_s26, %s2703_s23  ;;  %s2707_s17 = spop %2706 }
 0x29e   : > { %s3757_s16 = sadd.f32 %s2707_s17, %s1229_s8 }
 0x2a2   : > { %s3759_s24 = spop %2708 }
 0x2a3   : > { %s1477_s27 = sadd.f32 %s3759_s24, %s3757_s16  ;;  %s2711_s28 = spop %2710 }
 0x2a4   : > { %v1561_v18 = vstv %s2711_s28 }
 0x2a5   : > { %v1562_v23 = vsub.f32 %v3645_v6, %v1561_v18  ;;  %v1563_v52 = vsub.f32 %v3648_v10, %v1561_v18  ;;  %v1564_v57 = vsub.f32 %v3659_v62, %v1561_v18  ;;  %v1565_v56 = vsub.f32 %v3654_v0, %v1561_v18 }
 0x2a6   : > { %v1566_v5 = vsub.f32 %v3651_v12, %v1561_v18  ;;  %v1567_v2 = vsub.f32 %v3668_v13, %v1561_v18  ;;  %v1568_v33 = vsub.f32 %v3665_v11, %v1561_v18  ;;  %v1569_v6 = vsub.f32 %v3662_v9, %v1561_v18 }
 0x2a7   : > { %v1570_v48 = vmul.f32 1.442695, %v1562_v23  ;;  %v1572_v61 = vmul.f32 1.442695, %v1563_v52  ;;  %v1574_v63 = vmul.f32 1.442695, %v1564_v57 }
 0x2a8   : > { %v1576_v29 = vmul.f32 1.442695, %v1565_v56  ;;  %v1578_v8 = vmul.f32 1.442695, %v1566_v5  ;;  %v1580_v10 = vmul.f32 1.442695, %v1567_v2 }
 0x2a9   : > { %2813 = vpow2.f32 %v1570_v48  ;;  %v1582_v0 = vmul.f32 1.442695, %v1568_v33  ;;  %v1584_v12 = vmul.f32 1.442695, %v1569_v6  ;;  %v3842_v23 = vld [vmem:[%s3415_s25 + $0x88] sm:$0xff]  ;;  %v3846_v57 = vld [vmem:[%s3415_s25 + $0x80] sm:$0xff] }
 0x2aa   : > { %2815 = vpow2.f32 %v1572_v61  ;;  %v1911_v52 = vmul.f32 %v3842_v23, %v2747_v53  ;;  %v1910_v56 = vmul.f32 %v3846_v57, %v2747_v53  ;;  %v3850_v48 = vld [vmem:[%s3415_s25 + $0xa0] sm:$0xff]  ;;  %v3853_v61 = vld [vmem:[%s3415_s25 + $0x98] sm:$0xff] }
 0x2ab   : > { %2817 = vpow2.f32 %v1574_v63  ;;  %v1912_v63 = vmul.f32 %v2747_v53, %v3839_v54  ;;  %v1914_v6 = vmul.f32 %v2747_v53, %v3850_v48 }
 0x2ac   : > { %2819 = vpow2.f32 %v1576_v29  ;;  %v1921_v5 = vsel %vm1072_vm3, %v1911_v52, 0.0  ;;  %v1918_v2 = vsel %vm1072_vm3, %v1910_v56, 0.0  ;;  %v3859_v29 = vld [vmem:[%s3415_s25 + $0xa8] sm:$0xff] }
 0x2ad   : > { %2821 = vpow2.f32 %v1578_v8  ;;  %1922 = vadd.xlane.f32.xlu2 %v1921_v5  ;;  %1919 = vadd.xlane.f32.xlu1 %v1918_v2  ;;  %v1924_v33 = vsel %vm1072_vm3, %v1912_v63, 0.0  ;;  %v3886_v63 = vstv %s1477_s27 }
 0x2ae   : > { %2823 = vpow2.f32 %v1580_v10  ;;  %v1913_v10 = vmul.f32 %v2747_v53, %v3853_v61  ;;  %vm1484_vm10 = vweird.f32 %v3886_v63 }
 0x2af   : > { %v3771_v62 = vpop.eup %2813  ;;  %2825 = vpow2.f32 %v1582_v0  ;;  %v1915_v0 = vmul.f32 %v2747_v53, %v3859_v29 }
 0x2b0   : > { %v3773_v51 = vpop.eup %2815  ;;  %v1587_v13 = vsel %vm1586_vm4, %v3771_v62, 0.0  ;;  %2827 = vpow2.f32 %v1584_v12 }
 0x2b1   : > { %v3777_v15 = vpop.eup %2817  ;;  %v1588_v11 = vsel %vm1586_vm4, %v3773_v51, 0.0 }
 0x2b2   : > { %v3781_v9 = vpop.eup %2819  ;;  %v1589_v16 = vadd.f32 %v1588_v11, %v1587_v13  ;;  %v1590_v17 = vsel %vm1586_vm4, %v3777_v15, 0.0  ;;  %v1930_v13 = vsel %vm1072_vm3, %v1914_v6, 0.0  ;;  %v1927_v11 = vsel %vm1072_vm3, %v1913_v10, 0.0 }
 0x2b3   : > { %v3785_v7 = vpop.eup %2821  ;;  %v1592_v55 = vsel %vm1586_vm4, %v3781_v9, 0.0 }
 0x2b4   : > { %v1591_v14 = vadd.f32 %v1590_v17, %v1589_v16  ;;  %v3789_v28 = vpop.eup %2823  ;;  %v1594_v1 = vsel %vm1586_vm4, %v3785_v7, 0.0  ;;  %v3868_v16 = vld [vmem:[%s3415_s25 + $0xb8] sm:$0xff]  ;;  %v3871_v17 = vld [vmem:[%s3415_s25 + $0xb0] sm:$0xff] }
 0x2b5   : > { %v3793_v21 = vpop.eup %2825  ;;  %v1596_v24 = vsel %vm1586_vm4, %v3789_v28, 0.0  ;;  %1931 = vadd.xlane.f32.xlu2 %v1930_v13  ;;  %1928 = vadd.xlane.f32.xlu1 %v1927_v11 }
 0x2b6   : > { %v1593_v19 = vadd.f32 %v1592_v55, %v1591_v14  ;;  %v3797_v38 = vpop.eup %2827  ;;  %v1598_v25 = vsel %vm1586_vm4, %v3793_v21, 0.0  ;;  %v1933_v14 = vsel %vm1072_vm3, %v1915_v0, 0.0 }
 0x2b7   : > { %v1600_v4 = vsel %vm1586_vm4, %v3797_v38, 0.0 }
 0x2b8   : > { %v1595_v22 = vadd.f32 %v1594_v1, %v1593_v19  ;;  %v1917_v19 = vmul.f32 %v2747_v53, %v3868_v16  ;;  %v1916_v1 = vmul.f32 %v2747_v53, %v3871_v17 }
 0x2ba   : > { %v1597_v31 = vadd.f32 %v1596_v24, %v1595_v22 }
 0x2bc   : > { %v1599_v60 = vadd.f32 %v1598_v25, %v1597_v31  ;;  %v1939_v31 = vsel %vm1072_vm3, %v1917_v19, 0.0  ;;  %v1936_v25 = vsel %vm1072_vm3, %v1916_v1, 0.0 }
 0x2bd   : > { %1940 = vadd.xlane.f32.xlu2 %v1939_v31  ;;  %1937 = vadd.xlane.f32.xlu1 %v1936_v25 }
 0x2be   : > { %v1601_v30 = vadd.f32 %v1600_v4, %v1599_v60 }
 0x2c0   : > { %1602 = vadd.xlane.f32.xlu0 %v1601_v30 }
 0x2c8   : > { %1925 = vadd.xlane.f32.xlu0 %v1924_v33 }
 0x2cd   : > { %v1722_v46 = vpop.xlane.xlu2 %1721 }
 0x2ce   : > { %v3804_v41 = vadd.f32 %v1722_v46, %v3640_v3 }
 0x2d0   : > { %1934 = vadd.xlane.f32.xlu0 %v1933_v14 }
 0x2d1   : > { %v1719_v59 = vpop.xlane.xlu1 %1718 }
 0x2d2   : > { %v3807_v58 = vadd.f32 %v1719_v59, %v3640_v3 }
 0x2d3   : > { %v1725_v20 = vpop.xlane.xlu0 %1724 }
 0x2d4   : > { %v3813_v49 = vadd.f32 %v1725_v20, %v3640_v3 }
 0x2d5   : > { %v1731_v32 = vpop.xlane.xlu2 %1730 }
 0x2d6   : > { %v3810_v47 = vadd.f32 %v1731_v32, %v3640_v3 }
 0x2d8   : > { %v1749_v50 = vmax.f32 %v3807_v58, %v3810_v47 }
 0x2d9   : > { %v1728_v34 = vpop.xlane.xlu1 %1727 }
 0x2da   : > { %v3816_v42 = vadd.f32 %v1728_v34, %v3640_v3 }
 0x2db   : > { %v1734_v35 = vpop.xlane.xlu0 %1733 }
 0x2dc   : > { %v3825_v36 = vadd.f32 %v1734_v35, %v3640_v3 }
 0x2dd   : > { %v1740_v37 = vpop.xlane.xlu2 %1739 }
 0x2de   : > { %v3819_v44 = vadd.f32 %v1740_v37, %v3640_v3  ;;  %v1750_v43 = vmax.f32 %v3804_v41, %v3825_v36 }
 0x2e0   : > { %v1752_v27 = vmax.f32 %v3816_v42, %v3819_v44  ;;  %v1753_v18 = vmax.f32 %v1749_v50, %v1750_v43 }
 0x2e1   : > { %v1737_v39 = vpop.xlane.xlu1 %1736 }
 0x2e2   : > { %v3822_v45 = vadd.f32 %v1737_v39, %v3640_v3 }
 0x2e4   : > { %v1751_v26 = vmax.f32 %v3813_v49, %v3822_v45 }
 0x2e6   : > { %v1754_v40 = vmax.f32 %v1751_v26, %v1752_v27 }
 0x2e8   : > { %v1755_v8 = vmax.f32 %v1753_v18, %v1754_v40 }
 0x2ea   : > { %v1756_v12 = vrot.slane %v1755_v8, 4 }
 0x2ec   : > { %v1757_v55 = vmax.f32 %v1755_v8, %v1756_v12 }
 0x2ee   : > { %v1758_v24 = vrot.slane %v1757_v55, 2 }
 0x2f0   : > { %v1759_v30 = vmax.f32 %v1757_v55, %v1758_v24 }
 0x2f2   : > { %v1760_v20 = vrot.slane %v1759_v30, 1 }
 0x2f4   : > { %v1761_v35 = vmax.f32 %v1759_v30, %v1760_v20  ;;  %v2890_v20 = vld [vmem:[%s3415_s25 + $0x8] sm:$0xff] }
 0x333   : > { %v1603_v22 = vpop.xlane.xlu0 %1602 }
 0x334   : > { %v1604_v60 = vrot.slane %v1603_v22, 4 }
 0x336   : > { %v1605_v4 = vadd.f32 %v1604_v60, %v1603_v22 }
 0x338   : > { %v1606_v46 = vrot.slane %v1605_v4, 2 }
 0x33a   : > { %v1607_v59 = vadd.f32 %v1606_v46, %v1605_v4  ;;  %v2889_v46 = vld [vmem:[%s3415_s25] sm:$0xff] }
 0x33c   : > { %v1608_v32 = vrot.slane %v1607_v59, 1 }
 0x33e   : > { %v1609_v34 = vadd.f32 %v1608_v32, %v1607_v59 }
 0x340   : > { %2712 = vpush %v1609_v34  ;;  %v2892_v34 = vld [vmem:[%s3415_s25 + $0x18] sm:$0xff] }
 0x341   : > { %2714 = vpush %v1761_v35 }
 0x371   : > { %s2713_s7 = spop %2712 }
 0x372   : > { %v1611_v37 = vstv %s2713_s7  ;;  %s2715_s9 = spop %2714 }
 0x373   : > { %2829 = vrcp.f32 %v1611_v37  ;;  %v1763_v39 = vstv %s2715_s9  ;;  %v1623_v33 = vand.u32 2147483648, %v1611_v37  ;;  %vm1617_vm6 = vweird.f32 %v1611_v37 }
 0x374   : > { %v1764_v50 = vsub.f32 %v3807_v58, %v1763_v39  ;;  %v1765_v27 = vsub.f32 %v3804_v41, %v1763_v39  ;;  %v1766_v53 = vsub.f32 %v3813_v49, %v1763_v39  ;;  %v1767_v52 = vsub.f32 %v3816_v42, %v1763_v39 }
 0x375   : > { %v1768_v56 = vsub.f32 %v3810_v47, %v1763_v39  ;;  %v1621_v58 = vand.u32 2147483647, %v1611_v37  ;;  %v1769_v41 = vsub.f32 %v3825_v36, %v1763_v39  ;;  %v1770_v42 = vsub.f32 %v3822_v45, %v1763_v39 }
 0x376   : > { %v1772_v26 = vmul.f32 1.442695, %v1764_v50  ;;  %v1774_v43 = vmul.f32 1.442695, %v1765_v27  ;;  %v1776_v2 = vmul.f32 1.442695, %v1766_v53  ;;  %v1771_v36 = vsub.f32 %v3819_v44, %v1763_v39 }
 0x377   : > { %v1778_v49 = vmul.f32 1.442695, %v1767_v52  ;;  %v1780_v10 = vmul.f32 1.442695, %v1768_v56  ;;  %vm1622_vm8 = vcmp.eq.f32.partialorder %v1621_v58, 8.507059e+37  ;;  %v1624_v12 = vor.u32 1.1754944e-38, %v1623_v33 }
 0x378   : > { %2831 = vpow2.f32 %v1772_v26  ;;  %v1782_v13 = vmul.f32 1.442695, %v1769_v41  ;;  %v1784_v19 = vmul.f32 1.442695, %v1770_v42  ;;  %v1786_v25 = vmul.f32 1.442695, %v1771_v36 }
 0x379   : > { %v2830_v40 = vpop.eup %2829  ;;  %2833 = vpow2.f32 %v1774_v43  ;;  %v2893_v43 = vld [vmem:[%s3415_s25 + $0x20] sm:$0xff] }
 0x37a   : > { %v1613_v18 = vmul.f32 %v2830_v40, %v1611_v37  ;;  %vm1618_vm5 = vweird.f32 %v2830_v40  ;;  %2835 = vrcp.f32 %v3886_v63 }
 0x37b   : > { %2837 = vpow2.f32 %v1776_v2  ;;  %vm1619_vm7 = vmor %vm1617_vm6, %vm1618_vm5  ;;  %v2894_v2 = vld [vmem:[%s3415_s25 + $0x28] sm:$0xff] }
 0x37c   : > { %v1614_v5 = vsub.f32 1.0, %v1613_v18  ;;  %2839 = vpow2.f32 %v1778_v49 }
 0x37d   : > { %2841 = vpow2.f32 %v1780_v10  ;;  %v2895_v10 = vld [vmem:[%s3415_s25 + $0x30] sm:$0xff] }
 0x37e   : > { %v1615_v8 = vmul.f32 %v2830_v40, %v1614_v5  ;;  %v3889_v6 = vpop.eup %2831  ;;  %2843 = vpow2.f32 %v1782_v13 }
 0x37f   : > { %v3893_v47 = vpop.eup %2833  ;;  %v1788_v14 = vsel %vm1586_vm4, %v3889_v6, 0.0  ;;  %2845 = vpow2.f32 %v1784_v19 }
 0x380   : > { %v1616_v0 = vadd.f32 %v2830_v40, %v1615_v8  ;;  %v1789_v45 = vsel %vm1586_vm4, %v3893_v47, 0.0  ;;  %v3904_v31 = vpop.eup %2835  ;;  %2847 = vpow2.f32 %v1786_v25 }
 0x381   : > { %v1790_v60 = vadd.f32 %v1789_v45, %v1788_v14  ;;  %v3906_v4 = vpop.eup %2837  ;;  %v1480_v8 = vmul.f32 %v3904_v31, %v3886_v63  ;;  %v2896_v14 = vld [vmem:[%s3415_s25 + $0x38] sm:$0xff]  ;;  %vm1485_vm9 = vweird.f32 %v3904_v31 }
 0x382   : > { %v1620_v11 = vsel %vm1619_vm7, %v2830_v40, %v1616_v0  ;;  %v1791_v27 = vsel %vm1586_vm4, %v3906_v4, 0.0  ;;  %vm1486_vm11 = vmor %vm1484_vm10, %vm1485_vm9 }
 0x383   : > { %v1625_v55 = vsel %vm1622_vm8, %v1624_v12, %v1620_v11  ;;  %v1792_v40 = vadd.f32 %v1791_v27, %v1790_v60 }
 0x384   : > { %v1627_v1 = vmul.f32 %v3771_v62, %v1625_v55  ;;  %v1628_v22 = vmul.f32 %v3773_v51, %v1625_v55  ;;  %v1629_v44 = vmul.f32 %v3777_v15, %v1625_v55  ;;  %v1630_v24 = vmul.f32 %v3781_v9, %v1625_v55  ;;  %v2891_v51 = vld [vmem:[%s3415_s25 + $0x10] sm:$0xff]  ;;  %v3912_v15 = vpop.eup %2839 }
 0x385   : > { %v1631_v30 = vmul.f32 %v3785_v7, %v1625_v55  ;;  %v1632_v9 = vmul.f32 %v3789_v28, %v1625_v55  ;;  %v3918_v7 = vpop.eup %2841  ;;  %v1633_v26 = vmul.f32 %v3793_v21, %v1625_v55  ;;  %v1793_v56 = vsel %vm1586_vm4, %v3912_v15, 0.0 }
 0x386   : > { %v1635_v59 = vmul.f32 %v2889_v46, %v1627_v1  ;;  %v1636_v62 = vmul.f32 %v2890_v20, %v1628_v22  ;;  %v1637_v32 = vmul.f32 %v2891_v51, %v1629_v44  ;;  %v1638_v35 = vmul.f32 %v2892_v34, %v1630_v24  ;;  %v3925_v18 = vpop.eup %2843 }
 0x387   : > { %v1639_v53 = vmul.f32 %v2893_v43, %v1631_v30  ;;  %v1634_v5 = vmul.f32 %v3797_v38, %v1625_v55  ;;  %v1640_v58 = vmul.f32 %v2894_v2, %v1632_v9  ;;  %v1794_v21 = vadd.f32 %v1793_v56, %v1792_v40  ;;  %v3932_v41 = vpop.eup %2845  ;;  %v1666_v40 = vld [vmem:[%s3638_s21 + $0x8] sm:$0xff]  ;;  %v1668_v56 = vld [vmem:[%s3638_s21 + $0x18] sm:$0xff] }
 0x388   : > { %v1643_v37 = vsel %vm1072_vm3, %v1635_v59, 0.0  ;;  %v1644_v39 = vsel %vm1072_vm3, %v1636_v62, 0.0  ;;  %v1646_v28 = vsel %vm1072_vm3, %v1637_v32, 0.0  ;;  %v1648_v33 = vsel %vm1072_vm3, %v1638_v35, 0.0  ;;  %v3940_v36 = vpop.eup %2847 }
 0x389   : > { %v1645_v50 = vadd.f32 %v1644_v39, %v1643_v37  ;;  %v1795_v42 = vsel %vm1586_vm4, %v3918_v7, 0.0  ;;  %v1641_v0 = vmul.f32 %v2895_v10, %v1633_v26  ;;  %v1650_v12 = vsel %vm1072_vm3, %v1639_v53, 0.0 }
 0x38a   : > { %v1796_v38 = vadd.f32 %v1795_v42, %v1794_v21  ;;  %v1797_v11 = vsel %vm1586_vm4, %v3925_v18, 0.0  ;;  %v1642_v45 = vmul.f32 %v2896_v14, %v1634_v5  ;;  %v1652_v55 = vsel %vm1072_vm3, %v1640_v58, 0.0  ;;  %v1669_v58 = vld [vmem:[%s3638_s21 + $0x20] sm:$0xff]  ;;  %v1670_v21 = vld [vmem:[%s3638_s21 + $0x28] sm:$0xff] }
 0x38b   : > { %v1647_v52 = vadd.f32 %v1646_v28, %v1645_v50  ;;  %v1481_v1 = vsub.f32 1.0, %v1480_v8  ;;  %v1799_v44 = vsel %vm1586_vm4, %v3932_v41, 0.0  ;;  %v1654_v24 = vsel %vm1072_vm3, %v1641_v0, 0.0  ;;  %v1665_v28 = vld [vmem:[%s3638_s21] sm:$0xff]  ;;  %v1671_v0 = vld [vmem:[%s3638_s21 + $0x30] sm:$0xff] }
 0x38c   : > { %v1798_v19 = vadd.f32 %v1797_v11, %v1796_v38  ;;  %v1801_v30 = vsel %vm1586_vm4, %v3940_v36, 0.0  ;;  %v1656_v46 = vsel %vm1072_vm3, %v1642_v45, 0.0  ;;  %v1490_v34 = vand.u32 2147483648, %v3886_v63 }
 0x38d   : > { %v1649_v49 = vadd.f32 %v1648_v33, %v1647_v52  ;;  %v1482_v20 = vmul.f32 %v3904_v31, %v1481_v1  ;;  %v1488_v35 = vand.u32 2147483647, %v3886_v63  ;;  %v1667_v52 = vld [vmem:[%s3638_s21 + $0x10] sm:$0xff] }
 0x38e   : > { %v1800_v25 = vadd.f32 %v1799_v44, %v1798_v19  ;;  %v1491_v27 = vor.u32 1.1754944e-38, %v1490_v34  ;;  %v1920_v44 = vpop.xlane.xlu1 %1919 }
 0x38f   : > { %v1651_v13 = vadd.f32 %v1650_v12, %v1649_v49  ;;  %v1483_v32 = vadd.f32 %v3904_v31, %v1482_v20  ;;  %vm1489_vm12 = vcmp.eq.f32.partialorder %v1488_v35, 8.507059e+37 }
 0x390   : > { %v1802_v59 = vadd.f32 %v1801_v30, %v1800_v25 }
 0x391   : > { %v1653_v22 = vadd.f32 %v1652_v55, %v1651_v13  ;;  %v1487_v39 = vsel %vm1486_vm11, %v3904_v31, %v1483_v32  ;;  %v1672_v13 = vld [vmem:[%s3638_s21 + $0x38] sm:$0xff] }
 0x392   : > { %1803 = vadd.xlane.f32.xlu0 %v1802_v59  ;;  %v3959_v43 = vsel %vm1489_vm12, %v1491_v27, %v1487_v39 }
 0x393   : > { %v1655_v60 = vadd.f32 %v1654_v24, %v1653_v22  ;;  %v1673_v5 = vmul.f32 %v1665_v28, %v3959_v43  ;;  %v1674_v31 = vmul.f32 %v1666_v40, %v3959_v43  ;;  %v1675_v2 = vmul.f32 %v1667_v52, %v3959_v43  ;;  %v1923_v22 = vpop.xlane.xlu2 %1922  ;;  %v1926_v24 = vpop.xlane.xlu0 %1925  ;;  %v2748_v28 = vld [vmem:[%s4330_s3] ss:$0 sm:$0xff]  ;;  %v4035_v52 = vld [vmem:[%s3415_s25 + $0xd0] sm:$0xff] }
 0x394   : > { %v1676_v33 = vmul.f32 %v1668_v56, %v3959_v43  ;;  %v1677_v8 = vmul.f32 %v1669_v58, %v3959_v43  ;;  %v1678_v12 = vmul.f32 %v1670_v21, %v3959_v43  ;;  %v1679_v11 = vmul.f32 %v1671_v0, %v3959_v43  ;;  %v4032_v40 = vld [vmem:[%s3415_s25 + $0xc0] sm:$0xff]  ;;  %v4043_v58 = vld [vmem:[%s3415_s25 + $0xd8] sm:$0xff] }
 0x395   : > { %v1657_v62 = vadd.f32 %v1656_v46, %v1655_v60  ;;  %v1680_v45 = vmul.f32 %v1672_v13, %v3959_v43  ;;  %v3994_v20 = vadd.f32 %v1923_v22, %v3640_v3  ;;  %v4003_v32 = vadd.f32 %v1926_v24, %v3640_v3 }
 0x396   : > { %v1929_v60 = vpop.xlane.xlu1 %1928 }
 0x397   : > { %v1658_v51 = vrot.slane %v1657_v62, 4 }
 0x399   : > { %v1659_v9 = vadd.f32 %v1658_v51, %v1657_v62  ;;  %v3997_v62 = vadd.f32 %v1920_v44, %v3640_v3 }
 0x39b   : > { %v1660_v37 = vrot.slane %v1659_v9, 2  ;;  %v1932_v25 = vpop.xlane.xlu2 %1931  ;;  %v1935_v30 = vpop.xlane.xlu0 %1934 }
 0x39c   : > { %v4000_v51 = vadd.f32 %v1932_v25, %v3640_v3 }
 0x39d   : > { %v1661_v50 = vadd.f32 %v1660_v37, %v1659_v9  ;;  %v4006_v9 = vadd.f32 %v1929_v60, %v3640_v3  ;;  %v4015_v37 = vadd.f32 %v1935_v30, %v3640_v3 }
 0x39e   : > { %v1938_v59 = vpop.xlane.xlu1 %1937  ;;  %v1950_v39 = vmax.f32 %v3997_v62, %v4000_v51 }
 0x39f   : > { %v1662_v26 = vrot.slane %v1661_v50, 1  ;;  %v4012_v35 = vadd.f32 %v1938_v59, %v3640_v3 }
 0x3a1   : > { %v1663_v53 = vadd.f32 %v1662_v26, %v1661_v50  ;;  %v1952_v27 = vmax.f32 %v4003_v32, %v4012_v35  ;;  %v1951_v26 = vmax.f32 %v3994_v20, %v4015_v37 }
 0x3a3   : > { %v1664_v63 = vmul.f32 0.1, %v1663_v53  ;;  %v1941_v46 = vpop.xlane.xlu2 %1940  ;;  %v4026_v53 = vld [vmem:[%s3415_s25 + $0xc8] sm:$0xff] }
 0x3a4   : > { %v4009_v34 = vadd.f32 %v1941_v46, %v3640_v3 }
 0x3a5   : > { %v1681_v49 = vadd.f32 %v1673_v5, %v1664_v63  ;;  %v1682_v42 = vadd.f32 %v1674_v31, %v1664_v63  ;;  %v1683_v10 = vadd.f32 %v1675_v2, %v1664_v63  ;;  %v1684_v38 = vadd.f32 %v1676_v33, %v1664_v63  ;;  %v4040_v2 = vld [vmem:[%s3415_s25 + $0xe0] sm:$0xff] }
 0x3a6   : > { %v1685_v14 = vadd.f32 %v1677_v8, %v1664_v63  ;;  %v1686_v55 = vadd.f32 %v1678_v12, %v1664_v63  ;;  %v1687_v19 = vadd.f32 %v1679_v11, %v1664_v63  ;;  %v1688_v1 = vadd.f32 %v1680_v45, %v1664_v63  ;;  %v4058_v45 = vld [vmem:[%s3415_s25 + $0xf8] sm:$0xff] }
 0x3a7   : > { %1689 = vst.msk [vmem:[%s3638_s21] sm:$0xff] %vm1072_vm3, %v1681_v49  ;;  %v1953_v50 = vmax.f32 %v4006_v9, %v4009_v34  ;;  %v1954_v63 = vmax.f32 %v1950_v39, %v1951_v26  ;;  %v2112_v5 = vmul.f32 %v2748_v28, %v4026_v53  ;;  %v2111_v31 = vmul.f32 %v2748_v28, %v4032_v40  ;;  %v4049_v49 = vld [vmem:[%s3415_s25 + $0xe8] sm:$0xff] }
 0x3a8   : > { %1690 = vst.msk [vmem:[%s3638_s21 + $0x8] sm:$0xff] %vm1072_vm3, %v1682_v42  ;;  %v2113_v33 = vmul.f32 %v2748_v28, %v4035_v52  ;;  %v2115_v0 = vmul.f32 %v2748_v28, %v4040_v2  ;;  %v2114_v12 = vmul.f32 %v2748_v28, %v4043_v58  ;;  %v2118_v22 = vmul.f32 %v2748_v28, %v4058_v45 }
 0x3a9   : > { %1691 = vst.msk [vmem:[%s3638_s21 + $0x10] sm:$0xff] %vm1072_vm3, %v1683_v10  ;;  %v1955_v56 = vmax.f32 %v1952_v27, %v1953_v50  ;;  %v2122_v21 = vsel %vm1072_vm3, %v2112_v5, 0.0  ;;  %v2119_v8 = vsel %vm1072_vm3, %v2111_v31, 0.0 }
 0x3aa   : > { %1692 = vst.msk [vmem:[%s3638_s21 + $0x18] sm:$0xff] %vm1072_vm3, %v1684_v38  ;;  %2123 = vadd.xlane.f32.xlu2 %v2122_v21  ;;  %2120 = vadd.xlane.f32.xlu1 %v2119_v8  ;;  %v2125_v42 = vsel %vm1072_vm3, %v2113_v33, 0.0  ;;  %v2116_v38 = vmul.f32 %v2748_v28, %v4049_v49  ;;  %v2131_v11 = vsel %vm1072_vm3, %v2115_v0, 0.0  ;;  %v2140_v60 = vsel %vm1072_vm3, %v2118_v22, 0.0 }
 0x3ab   : > { %1693 = vst.msk [vmem:[%s3638_s21 + $0x20] sm:$0xff] %vm1072_vm3, %v1685_v14  ;;  %v1956_v10 = vmax.f32 %v1954_v63, %v1955_v56  ;;  %2126 = vadd.xlane.f32.xlu0 %v2125_v42  ;;  %v2128_v14 = vsel %vm1072_vm3, %v2114_v12, 0.0 }
 0x3ac   : > { %1694 = vst.msk [vmem:[%s3638_s21 + $0x28] sm:$0xff] %vm1072_vm3, %v1686_v55  ;;  %v4061_v55 = vld [vmem:[%s3415_s25 + $0xf0] sm:$0xff] }
 0x3ad   : > { %1695 = vst.msk [vmem:[%s3638_s21 + $0x30] sm:$0xff] %vm1072_vm3, %v1687_v19  ;;  %v1957_v13 = vrot.slane %v1956_v10, 4  ;;  %v2134_v19 = vsel %vm1072_vm3, %v2116_v38, 0.0  ;;  %v2117_v44 = vmul.f32 %v2748_v28, %v4061_v55 }
 0x3ae   : > { %1696 = vst.msk [vmem:[%s3638_s21 + $0x38] sm:$0xff] %vm1072_vm3, %v1688_v1 }
 0x3af   : > { %v1958_v1 = vmax.f32 %v1956_v10, %v1957_v13  ;;  %v2137_v30 = vsel %vm1072_vm3, %v2117_v44, 0.0 }
 0x3b1   : > { %v1959_v25 = vrot.slane %v1958_v1, 2 }
 0x3b2   : > { %2132 = vadd.xlane.f32.xlu2 %v2131_v11  ;;  %2129 = vadd.xlane.f32.xlu1 %v2128_v14 }
 0x3b3   : > { %2135 = vadd.xlane.f32.xlu0 %v2134_v19  ;;  %v1960_v39 = vmax.f32 %v1958_v1, %v1959_v25 }
 0x3b5   : > { %v1961_v26 = vrot.slane %v1960_v39, 1 }
 0x3b7   : > { %v1962_v5 = vmax.f32 %v1960_v39, %v1961_v26 }
 0x3ba   : > { %2141 = vadd.xlane.f32.xlu2 %v2140_v60  ;;  %2138 = vadd.xlane.f32.xlu1 %v2137_v30 }
 0x405   : > { %v1804_v24 = vpop.xlane.xlu0 %1803 }
 0x406   : > { %v1805_v46 = vrot.slane %v1804_v24, 4 }
 0x408   : > { %v1806_v59 = vadd.f32 %v1805_v46, %v1804_v24 }
 0x40a   : > { %v1807_v50 = vrot.slane %v1806_v59, 2 }
 0x40c   : > { %v1808_v27 = vadd.f32 %v1807_v50, %v1806_v59 }
 0x40e   : > { %v1809_v56 = vrot.slane %v1808_v27, 1 }
 0x410   : > { %v1810_v63 = vadd.f32 %v1809_v56, %v1808_v27 }
 0x412   : > { %2716 = vpush %v1810_v63 }
 0x413   : > { %2718 = vpush %v1962_v5 }
 0x443   : > { %s2717_s13 = spop %2716 }
 0x444   : > { %v1812_v28 = vstv %s2717_s13  ;;  %s2719_s15 = spop %2718 }
 0x445   : > { %2849 = vrcp.f32 %v1812_v28  ;;  %v1964_v31 = vstv %s2719_s15  ;;  %v1822_v19 = vand.u32 2147483647, %v1812_v28  ;;  %v1824_v1 = vand.u32 2147483648, %v1812_v28 }
 0x446   : > { %v1965_v33 = vsub.f32 %v3997_v62, %v1964_v31  ;;  %v1966_v21 = vsub.f32 %v3994_v20, %v1964_v31  ;;  %v1967_v10 = vsub.f32 %v4003_v32, %v1964_v31  ;;  %v1968_v38 = vsub.f32 %v4006_v9, %v1964_v31 }
 0x447   : > { %v1969_v13 = vsub.f32 %v4000_v51, %v1964_v31  ;;  %v1970_v62 = vsub.f32 %v4015_v37, %v1964_v31  ;;  %v1971_v32 = vsub.f32 %v4012_v35, %v1964_v31  ;;  %vm1818_vm14 = vweird.f32 %v1812_v28 }
 0x448   : > { %v1973_v8 = vmul.f32 1.442695, %v1965_v33  ;;  %v1975_v42 = vmul.f32 1.442695, %v1966_v21  ;;  %v1977_v14 = vmul.f32 1.442695, %v1967_v10  ;;  %v1972_v60 = vsub.f32 %v4009_v34, %v1964_v31 }
 0x449   : > { %v1979_v20 = vmul.f32 1.442695, %v1968_v38  ;;  %v1981_v24 = vmul.f32 1.442695, %v1969_v13  ;;  %vm1823_vm0 = vcmp.eq.f32.partialorder %v1822_v19, 8.507059e+37  ;;  %v1825_v51 = vor.u32 1.1754944e-38, %v1824_v1 }
 0x44a   : > { %2851 = vpow2.f32 %v1973_v8  ;;  %v1983_v30 = vmul.f32 1.442695, %v1970_v62  ;;  %v1985_v39 = vmul.f32 1.442695, %v1971_v32  ;;  %v1987_v56 = vmul.f32 1.442695, %v1972_v60 }
 0x44b   : > { %v2850_v0 = vpop.eup %2849  ;;  %2853 = vpow2.f32 %v1975_v42  ;;  %v2897_v31 = vld [vmem:[%s3415_s25 + $0x40] sm:$0xff]  ;;  %v2898_v21 = vld [vmem:[%s3415_s25 + $0x48] sm:$0xff] }
 0x44c   : > { %v1814_v12 = vmul.f32 %v2850_v0, %v1812_v28  ;;  %vm1819_vm13 = vweird.f32 %v2850_v0  ;;  %2855 = vpow2.f32 %v1977_v14  ;;  %v2901_v14 = vld [vmem:[%s3415_s25 + $0x60] sm:$0xff] }
 0x44d   : > { %vm1820_vm15 = vmor %vm1818_vm14, %vm1819_vm13  ;;  %2857 = vpow2.f32 %v1979_v20 }
 0x44e   : > { %v1815_v11 = vsub.f32 1.0, %v1814_v12  ;;  %2859 = vpow2.f32 %v1981_v24  ;;  %v2902_v24 = vld [vmem:[%s3415_s25 + $0x68] sm:$0xff] }
 0x44f   : > { %2861 = vpow2.f32 %v1983_v30 }
 0x450   : > { %v1816_v22 = vmul.f32 %v2850_v0, %v1815_v11  ;;  %v4074_v44 = vpop.eup %2851  ;;  %2863 = vpow2.f32 %v1985_v39 }
 0x451   : > { %v4077_v25 = vpop.eup %2853  ;;  %v1989_v46 = vsel %vm1586_vm4, %v4074_v44, 0.0  ;;  %2865 = vpow2.f32 %v1987_v56 }
 0x452   : > { %v1817_v9 = vadd.f32 %v2850_v0, %v1816_v22  ;;  %v1990_v35 = vsel %vm1586_vm4, %v4077_v25, 0.0  ;;  %v4088_v5 = vpop.eup %2855 }
 0x453   : > { %v1991_v63 = vadd.f32 %v1990_v35, %v1989_v46  ;;  %v1992_v13 = vsel %vm1586_vm4, %v4088_v5, 0.0  ;;  %v2903_v46 = vld [vmem:[%s3415_s25 + $0x70] sm:$0xff] }
 0x454   : > { %v1821_v37 = vsel %vm1820_vm15, %v2850_v0, %v1817_v9 }
 0x455   : > { %v1826_v59 = vsel %vm1823_vm0, %v1825_v51, %v1821_v37  ;;  %v1993_v1 = vadd.f32 %v1992_v13, %v1991_v63 }
 0x456   : > { %v1828_v50 = vmul.f32 %v3889_v6, %v1826_v59  ;;  %v1829_v27 = vmul.f32 %v3893_v47, %v1826_v59  ;;  %v1830_v34 = vmul.f32 %v3906_v4, %v1826_v59  ;;  %v1831_v26 = vmul.f32 %v3912_v15, %v1826_v59  ;;  %v2899_v6 = vld [vmem:[%s3415_s25 + $0x50] sm:$0xff]  ;;  %v4094_v47 = vpop.eup %2857  ;;  %v2900_v15 = vld [vmem:[%s3415_s25 + $0x58] sm:$0xff] }
 0x457   : > { %v1832_v28 = vmul.f32 %v3918_v7, %v1826_v59  ;;  %v1833_v4 = vmul.f32 %v3925_v18, %v1826_v59  ;;  %v4100_v7 = vpop.eup %2859  ;;  %v1834_v11 = vmul.f32 %v3932_v41, %v1826_v59  ;;  %v1994_v20 = vsel %vm1586_vm4, %v4094_v47, 0.0 }
 0x458   : > { %v1836_v33 = vmul.f32 %v2897_v31, %v1828_v50  ;;  %v1837_v8 = vmul.f32 %v2898_v21, %v1829_v27  ;;  %v1838_v42 = vmul.f32 %v2899_v6, %v1830_v34  ;;  %v1839_v10 = vmul.f32 %v2900_v15, %v1831_v26  ;;  %v4107_v62 = vpop.eup %2861 }
 0x459   : > { %v1840_v19 = vmul.f32 %v2901_v14, %v1832_v28  ;;  %v1835_v32 = vmul.f32 %v3940_v36, %v1826_v59  ;;  %v1841_v9 = vmul.f32 %v2902_v24, %v1833_v4  ;;  %v1995_v41 = vadd.f32 %v1994_v20, %v1993_v1  ;;  %v4114_v60 = vpop.eup %2863  ;;  %v2904_v59 = vld [vmem:[%s3415_s25 + $0x78] sm:$0xff]  ;;  %v2606_v14 = vld [vmem:[%s3638_s21 + $0x48] sm:$0xff] }
 0x45a   : > { %v1844_v0 = vsel %vm1072_vm3, %v1836_v33, 0.0  ;;  %v1845_v12 = vsel %vm1072_vm3, %v1837_v8, 0.0  ;;  %v1847_v18 = vsel %vm1072_vm3, %v1838_v42, 0.0  ;;  %v1849_v51 = vsel %vm1072_vm3, %v1839_v10, 0.0  ;;  %v4120_v27 = vpop.eup %2865  ;;  %v2608_v1 = vld [vmem:[%s3638_s21 + $0x58] sm:$0xff] }
 0x45b   : > { %v1846_v38 = vadd.f32 %v1845_v12, %v1844_v0  ;;  %v1996_v37 = vsel %vm1586_vm4, %v4100_v7, 0.0  ;;  %v1842_v35 = vmul.f32 %v2903_v46, %v1834_v11  ;;  %v1851_v39 = vsel %vm1072_vm3, %v1840_v19, 0.0  ;;  %v2605_v11 = vld [vmem:[%s3638_s21 + $0x40] sm:$0xff]  ;;  %v2607_v19 = vld [vmem:[%s3638_s21 + $0x50] sm:$0xff] }
 0x45c   : > { %v1997_v50 = vadd.f32 %v1996_v37, %v1995_v41  ;;  %v1998_v36 = vsel %vm1586_vm4, %v4107_v62, 0.0  ;;  %v1843_v26 = vmul.f32 %v2904_v59, %v1835_v32  ;;  %v1853_v56 = vsel %vm1072_vm3, %v1841_v9, 0.0  ;;  %v2610_v32 = vld [vmem:[%s3638_s21 + $0x68] sm:$0xff]  ;;  %v2611_v41 = vld [vmem:[%s3638_s21 + $0x70] sm:$0xff]  ;;  %v2612_v37 = vld [vmem:[%s3638_s21 + $0x78] sm:$0xff] }
 0x45d   : > { %v1848_v22 = vadd.f32 %v1847_v18, %v1846_v38  ;;  %v2000_v31 = vsel %vm1586_vm4, %v4114_v60, 0.0  ;;  %v1855_v33 = vsel %vm1072_vm3, %v1842_v35, 0.0  ;;  %v2002_v6 = vsel %vm1586_vm4, %v4120_v27, 0.0 }
 0x45e   : > { %v1999_v63 = vadd.f32 %v1998_v36, %v1997_v50  ;;  %v1857_v42 = vsel %vm1072_vm3, %v1843_v26, 0.0  ;;  %v1874_v24 = vmul.f32 %v2605_v11, %v3959_v43  ;;  %v1875_v9 = vmul.f32 %v2606_v14, %v3959_v43 }
 0x45f   : > { %v1850_v30 = vadd.f32 %v1849_v51, %v1848_v22  ;;  %v2609_v22 = vld [vmem:[%s3638_s21 + $0x60] sm:$0xff]  ;;  %v1876_v51 = vmul.f32 %v2607_v19, %v3959_v43  ;;  %v1880_v59 = vmul.f32 %v2611_v41, %v3959_v43 }
 0x460   : > { %v2001_v21 = vadd.f32 %v2000_v31, %v1999_v63  ;;  %v1878_v46 = vmul.f32 %v2609_v22, %v3959_v43 }
 0x461   : > { %v1852_v34 = vadd.f32 %v1851_v39, %v1850_v30  ;;  %v1877_v30 = vmul.f32 %v2608_v1, %v3959_v43 }
 0x462   : > { %v2003_v4 = vadd.f32 %v2002_v6, %v2001_v21  ;;  %v2121_v21 = vpop.xlane.xlu1 %2120 }
 0x463   : > { %v1854_v28 = vadd.f32 %v1853_v56, %v1852_v34  ;;  %v1879_v34 = vmul.f32 %v2610_v32, %v3959_v43  ;;  %v1881_v56 = vmul.f32 %v2612_v37, %v3959_v43 }
 0x464   : > { %2004 = vadd.xlane.f32.xlu0 %v2003_v4 }
 0x465   : > { %v1856_v8 = vadd.f32 %v1855_v33, %v1854_v28  ;;  %v2124_v33 = vpop.xlane.xlu2 %2123 }
 0x467   : > { %v1858_v15 = vadd.f32 %v1857_v42, %v1856_v8  ;;  %v2127_v8 = vpop.xlane.xlu0 %2126 }
 0x469   : > { %v1859_v10 = vrot.slane %v1858_v15, 4 }
 0x46a   : > { %v2130_v42 = vpop.xlane.xlu1 %2129 }
 0x46b   : > { %v1860_v0 = vadd.f32 %v1859_v10, %v1858_v15  ;;  %v2146_v11 = vadd.f32 %v2130_v42, %v3640_v3 }
 0x46d   : > { %v1861_v12 = vrot.slane %v1860_v0, 2  ;;  %v2133_v6 = vpop.xlane.xlu2 %2132 }
 0x46f   : > { %v1862_v38 = vadd.f32 %v1861_v12, %v1860_v0  ;;  %v2136_v4 = vpop.xlane.xlu0 %2135  ;;  %v2144_v0 = vadd.f32 %v2124_v33, %v3640_v3  ;;  %v2143_v12 = vadd.f32 %v2121_v21, %v3640_v3 }
 0x471   : > { %v1863_v13 = vrot.slane %v1862_v38, 1 }
 0x472   : > { %v2139_v10 = vpop.xlane.xlu1 %2138 }
 0x473   : > { %v1864_v18 = vadd.f32 %v1863_v13, %v1862_v38  ;;  %v2147_v38 = vadd.f32 %v2133_v6, %v3640_v3  ;;  %v2145_v13 = vadd.f32 %v2127_v8, %v3640_v3  ;;  %v4173_v19 = vadd.f32 %v2139_v10, %v3640_v3 }
 0x475   : > { %v1865_v20 = vmul.f32 0.1, %v1864_v18  ;;  %v2142_v15 = vpop.xlane.xlu2 %2141  ;;  %v2148_v18 = vadd.f32 %v2136_v4, %v3640_v3  ;;  %v2151_v1 = vmax.f32 %v2143_v12, %v2147_v38 }
 0x476   : > { %v4170_v14 = vadd.f32 %v2142_v15, %v3640_v3 }
 0x477   : > { %v1882_v35 = vadd.f32 %v1874_v24, %v1865_v20  ;;  %v1883_v39 = vadd.f32 %v1875_v9, %v1865_v20  ;;  %v1884_v50 = vadd.f32 %v1876_v51, %v1865_v20  ;;  %v1885_v36 = vadd.f32 %v1877_v30, %v1865_v20 }
 0x478   : > { %v1886_v26 = vadd.f32 %v1878_v46, %v1865_v20  ;;  %v1887_v63 = vadd.f32 %v1879_v34, %v1865_v20  ;;  %v1888_v28 = vadd.f32 %v1880_v59, %v1865_v20  ;;  %v1889_v31 = vadd.f32 %v1881_v56, %v1865_v20 }
 0x479   : > { %2613 = vst.msk [vmem:[%s3638_s21 + $0x40] sm:$0xff] %vm1072_vm3, %v1882_v35  ;;  %v2154_v22 = vmax.f32 %v2146_v11, %v4170_v14  ;;  %v2153_v20 = vmax.f32 %v2145_v13, %v4173_v19  ;;  %v2152_v32 = vmax.f32 %v2144_v0, %v2148_v18 }
 0x47a   : > { %2614 = vst.msk [vmem:[%s3638_s21 + $0x48] sm:$0xff] %vm1072_vm3, %v1883_v39 }
 0x47b   : > { %2615 = vst.msk [vmem:[%s3638_s21 + $0x50] sm:$0xff] %vm1072_vm3, %v1884_v50  ;;  %v2156_v24 = vmax.f32 %v2153_v20, %v2154_v22  ;;  %v2155_v9 = vmax.f32 %v2151_v1, %v2152_v32 }
 0x47c   : > { %2616 = vst.msk [vmem:[%s3638_s21 + $0x58] sm:$0xff] %vm1072_vm3, %v1885_v36 }
 0x47d   : > { %2617 = vst.msk [vmem:[%s3638_s21 + $0x60] sm:$0xff] %vm1072_vm3, %v1886_v26  ;;  %v2157_v51 = vmax.f32 %v2155_v9, %v2156_v24 }
 0x47e   : > { %2618 = vst.msk [vmem:[%s3638_s21 + $0x68] sm:$0xff] %vm1072_vm3, %v1887_v63 }
 0x47f   : > { %2619 = vst.msk [vmem:[%s3638_s21 + $0x70] sm:$0xff] %vm1072_vm3, %v1888_v28  ;;  %v2158_v41 = vrot.slane %v2157_v51, 4 }
 0x480   : > { %2620 = vst.msk [vmem:[%s3638_s21 + $0x78] sm:$0xff] %vm1072_vm3, %v1889_v31 }
 0x481   : > { %v2159_v30 = vmax.f32 %v2157_v51, %v2158_v41 }
 0x483   : > { %v2160_v46 = vrot.slane %v2159_v30, 2 }
 0x485   : > { %v2161_v50 = vmax.f32 %v2159_v30, %v2160_v46 }
 0x487   : > { %v2162_v59 = vrot.slane %v2161_v50, 1 }
 0x489   : > { %v2163_v56 = vmax.f32 %v2161_v50, %v2162_v59 }
 0x4d7   : > { %v2005_v37 = vpop.xlane.xlu0 %2004 }
 0x4d8   : > { %v2006_v35 = vrot.slane %v2005_v37, 4 }
 0x4da   : > { %v2007_v39 = vadd.f32 %v2006_v35, %v2005_v37 }
 0x4dc   : > { %v2008_v34 = vrot.slane %v2007_v39, 2 }
 0x4de   : > { %v2009_v36 = vadd.f32 %v2008_v34, %v2007_v39 }
 0x4e0   : > { %v2010_v3 = vrot.slane %v2009_v36, 1 }
 0x4e2   : > { %v2011_v26 = vadd.f32 %v2010_v3, %v2009_v36 }
 0x4e4   : > { %2720 = vpush %v2011_v26 }
 0x4e5   : > { %2722 = vpush %v2163_v56 }
 0x515   : > { %s2721_s25 = spop %2720 }
 0x516   : > { %v2013_v63 = vstv %s2721_s25  ;;  %s2723_s14 = spop %2722 }
 0x517   : > { %2867 = vrcp.f32 %v2013_v63  ;;  %v2165_v28 = vstv %s2723_s14  ;;  %v2023_v20 = vand.u32 2147483647, %v2013_v63  ;;  %v2025_v32 = vand.u32 2147483648, %v2013_v63 }
 0x518   : > { %v2166_v31 = vsub.f32 %v2143_v12, %v2165_v28  ;;  %v2167_v33 = vsub.f32 %v2144_v0, %v2165_v28  ;;  %v2168_v6 = vsub.f32 %v2145_v13, %v2165_v28  ;;  %v2169_v15 = vsub.f32 %v2146_v11, %v2165_v28 }
 0x519   : > { %v2170_v10 = vsub.f32 %v2147_v38, %v2165_v28  ;;  %v2171_v24 = vsub.f32 %v2148_v18, %v2165_v28  ;;  %v2172_v0 = vsub.f32 %v4173_v19, %v2165_v28  ;;  %vm2019_vm2 = vweird.f32 %v2013_v63 }
 0x51a   : > { %v2174_v21 = vmul.f32 1.442695, %v2166_v31  ;;  %v2176_v8 = vmul.f32 1.442695, %v2167_v33  ;;  %v2178_v22 = vmul.f32 1.442695, %v2168_v6  ;;  %v2173_v11 = vsub.f32 %v4170_v14, %v2165_v28 }
 0x51b   : > { %v2180_v51 = vmul.f32 1.442695, %v2169_v15  ;;  %v2182_v12 = vmul.f32 1.442695, %v2170_v10  ;;  %vm2024_vm6 = vcmp.eq.f32.partialorder %v2023_v20, 8.507059e+37  ;;  %v2026_v38 = vor.u32 1.1754944e-38, %v2025_v32 }
 0x51c   : > { %2869 = vpow2.f32 %v2174_v21  ;;  %v2184_v37 = vmul.f32 1.442695, %v2171_v24  ;;  %v2186_v39 = vmul.f32 1.442695, %v2172_v0  ;;  %v2188_v59 = vmul.f32 1.442695, %v2173_v11 }
 0x51d   : > { %v2868_v42 = vpop.eup %2867  ;;  %2871 = vpow2.f32 %v2176_v8 }
 0x51e   : > { %v2015_v4 = vmul.f32 %v2868_v42, %v2013_v63  ;;  %vm2020_vm1 = vweird.f32 %v2868_v42  ;;  %2873 = vpow2.f32 %v2178_v22 }
 0x51f   : > { %vm2021_vm5 = vmor %vm2019_vm2, %vm2020_vm1  ;;  %2875 = vpow2.f32 %v2180_v51 }
 0x520   : > { %v2016_v1 = vsub.f32 1.0, %v2015_v4  ;;  %2877 = vpow2.f32 %v2182_v12 }
 0x521   : > { %2879 = vpow2.f32 %v2184_v37 }
 0x522   : > { %v2017_v9 = vmul.f32 %v2868_v42, %v2016_v1  ;;  %v4178_v41 = vpop.eup %2869  ;;  %2881 = vpow2.f32 %v2186_v39 }
 0x523   : > { %v4181_v13 = vpop.eup %2871  ;;  %v2190_v46 = vsel %vm1586_vm4, %v4178_v41, 0.0  ;;  %2883 = vpow2.f32 %v2188_v59  ;;  %v2630_v59 = vld [vmem:[%s3638_s21 + $0x88] sm:$0xff] }
 0x524   : > { %v2018_v30 = vadd.f32 %v2868_v42, %v2017_v9  ;;  %v2191_v19 = vsel %vm1586_vm4, %v4181_v13, 0.0  ;;  %v4192_v26 = vpop.eup %2873 }
 0x525   : > { %v2192_v3 = vadd.f32 %v2191_v19, %v2190_v46 }
 0x526   : > { %v2022_v18 = vsel %vm2021_vm5, %v2868_v42, %v2018_v30 }
 0x527   : > { %v2027_v35 = vsel %vm2024_vm6, %v2026_v38, %v2022_v18 }
 0x528   : > { %v2029_v50 = vmul.f32 %v4074_v44, %v2027_v35  ;;  %v2030_v34 = vmul.f32 %v4077_v25, %v2027_v35  ;;  %v2031_v36 = vmul.f32 %v4088_v5, %v2027_v35  ;;  %v2032_v14 = vmul.f32 %v4094_v47, %v2027_v35  ;;  %v4198_v44 = vpop.eup %2875 }
 0x529   : > { %v2033_v56 = vmul.f32 %v4100_v7, %v2027_v35  ;;  %v2034_v25 = vmul.f32 %v4107_v62, %v2027_v35  ;;  %v4204_v21 = vpop.eup %2877  ;;  %v2195_v42 = vsel %vm1586_vm4, %v4198_v44, 0.0  ;;  %v2036_v4 = vmul.f32 %v4120_v27, %v2027_v35 }
 0x52a   : > { %v2037_v63 = vmul.f32 %v3846_v57, %v2029_v50  ;;  %v2038_v28 = vmul.f32 %v3842_v23, %v2030_v34  ;;  %v2039_v31 = vmul.f32 %v3839_v54, %v2031_v36  ;;  %v2040_v5 = vmul.f32 %v3853_v61, %v2032_v14  ;;  %v4211_v6 = vpop.eup %2879  ;;  %v2629_v14 = vld [vmem:[%s3638_s21 + $0x80] sm:$0xff] }
 0x52b   : > { %v2193_v23 = vsel %vm1586_vm4, %v4192_v26, 0.0  ;;  %v2035_v54 = vmul.f32 %v4114_v60, %v2027_v35  ;;  %v2041_v57 = vmul.f32 %v3850_v48, %v2033_v56  ;;  %v2042_v15 = vmul.f32 %v3859_v29, %v2034_v25  ;;  %v4218_v22 = vpop.eup %2881  ;;  %v2634_v25 = vld [vmem:[%s3638_s21 + $0xa8] sm:$0xff] }
 0x52c   : > { %v2045_v47 = vsel %vm1072_vm3, %v2037_v63, 0.0  ;;  %v2046_v33 = vsel %vm1072_vm3, %v2038_v28, 0.0  ;;  %v2048_v8 = vsel %vm1072_vm3, %v2039_v31, 0.0  ;;  %v2194_v62 = vadd.f32 %v2193_v23, %v2192_v3  ;;  %v4224_v9 = vpop.eup %2883  ;;  %v2631_v3 = vld [vmem:[%s3638_s21 + $0x90] sm:$0xff]  ;;  %v2632_v63 = vld [vmem:[%s3638_s21 + $0x98] sm:$0xff]  ;;  %v2633_v28 = vld [vmem:[%s3638_s21 + $0xa0] sm:$0xff] }
 0x52d   : > { %v2047_v7 = vadd.f32 %v2046_v33, %v2045_v47  ;;  %v2050_v10 = vsel %vm1072_vm3, %v2040_v5, 0.0  ;;  %v2197_v48 = vsel %vm1586_vm4, %v4204_v21, 0.0  ;;  %v2043_v20 = vmul.f32 %v3871_v17, %v2035_v54  ;;  %v2636_v54 = vld [vmem:[%s3638_s21 + $0xb8] sm:$0xff] }
 0x52e   : > { %v2196_v1 = vadd.f32 %v2195_v42, %v2194_v62  ;;  %v2052_v32 = vsel %vm1072_vm3, %v2041_v57, 0.0  ;;  %v2199_v29 = vsel %vm1586_vm4, %v4211_v6, 0.0  ;;  %v2044_v27 = vmul.f32 %v3868_v16, %v2036_v4 }
 0x52f   : > { %v2049_v61 = vadd.f32 %v2048_v8, %v2047_v7  ;;  %v2054_v0 = vsel %vm1072_vm3, %v2042_v15, 0.0  ;;  %v2201_v17 = vsel %vm1586_vm4, %v4218_v22, 0.0  ;;  %v2056_v38 = vsel %vm1072_vm3, %v2043_v20, 0.0  ;;  %v2635_v7 = vld [vmem:[%s3638_s21 + $0xb0] sm:$0xff] }
 0x530   : > { %v2198_v24 = vadd.f32 %v2197_v48, %v2196_v1  ;;  %v2203_v18 = vsel %vm1586_vm4, %v4224_v9, 0.0  ;;  %v2058_v16 = vsel %vm1072_vm3, %v2044_v27, 0.0  ;;  %v2075_v5 = vmul.f32 %v2629_v14, %v3959_v43 }
 0x531   : > { %v2051_v60 = vadd.f32 %v2050_v10, %v2049_v61  ;;  %v2076_v47 = vmul.f32 %v2630_v59, %v3959_v43  ;;  %v2077_v33 = vmul.f32 %v2631_v3, %v3959_v43  ;;  %v2078_v23 = vmul.f32 %v2632_v63, %v3959_v43 }
 0x532   : > { %v2200_v12 = vadd.f32 %v2199_v29, %v2198_v24  ;;  %v2079_v57 = vmul.f32 %v2633_v28, %v3959_v43  ;;  %v2080_v42 = vmul.f32 %v2634_v25, %v3959_v43  ;;  %v2081_v15 = vmul.f32 %v2635_v7, %v3959_v43 }
 0x533   : > { %v2053_v51 = vadd.f32 %v2052_v32, %v2051_v60  ;;  %v2082_v1 = vmul.f32 %v2636_v54, %v3959_v43 }
 0x534   : > { %v2202_v11 = vadd.f32 %v2201_v17, %v2200_v12 }
 0x535   : > { %v2055_v30 = vadd.f32 %v2054_v0, %v2053_v51 }
 0x536   : > { %v2204_v46 = vadd.f32 %v2203_v18, %v2202_v11 }
 0x537   : > { %v2057_v37 = vadd.f32 %v2056_v38, %v2055_v30 }
 0x538   : > { %2205 = vadd.xlane.f32.xlu1 %v2204_v46 }
 0x539   : > { %v2059_v19 = vadd.f32 %v2058_v16, %v2057_v37 }
 0x53b   : > { %v2060_v35 = vrot.slane %v2059_v19, 4 }
 0x53d   : > { %v2061_v39 = vadd.f32 %v2060_v35, %v2059_v19 }
 0x53f   : > { %v2062_v50 = vrot.slane %v2061_v39, 2 }
 0x541   : > { %v2063_v34 = vadd.f32 %v2062_v50, %v2061_v39 }
 0x543   : > { %v2064_v36 = vrot.slane %v2063_v34, 1 }
 0x545   : > { %v2065_v56 = vadd.f32 %v2064_v36, %v2063_v34 }
 0x547   : > { %v2066_v31 = vmul.f32 0.1, %v2065_v56 }
 0x549   : > { %v2083_v8 = vadd.f32 %v2075_v5, %v2066_v31  ;;  %v2084_v62 = vadd.f32 %v2076_v47, %v2066_v31  ;;  %v2085_v61 = vadd.f32 %v2077_v33, %v2066_v31  ;;  %v2086_v4 = vadd.f32 %v2078_v23, %v2066_v31 }
 0x54a   : > { %v2087_v10 = vadd.f32 %v2079_v57, %v2066_v31  ;;  %v2088_v60 = vadd.f32 %v2080_v42, %v2066_v31  ;;  %v2089_v48 = vadd.f32 %v2081_v15, %v2066_v31  ;;  %v2090_v20 = vadd.f32 %v2082_v1, %v2066_v31  ;;  %v2654_v42 = vld [vmem:[%s3638_s21 + $0xc8] sm:$0xff]  ;;  %v2657_v1 = vld [vmem:[%s3638_s21 + $0xe0] sm:$0xff] }
 0x54b   : > { %2637 = vst.msk [vmem:[%s3638_s21 + $0x80] sm:$0xff] %vm1072_vm3, %v2083_v8 }
 0x54c   : > { %2638 = vst.msk [vmem:[%s3638_s21 + $0x88] sm:$0xff] %vm1072_vm3, %v2084_v62 }
 0x54d   : > { %2639 = vst.msk [vmem:[%s3638_s21 + $0x90] sm:$0xff] %vm1072_vm3, %v2085_v61 }
 0x54e   : > { %2640 = vst.msk [vmem:[%s3638_s21 + $0x98] sm:$0xff] %vm1072_vm3, %v2086_v4  ;;  %v2655_v4 = vld [vmem:[%s3638_s21 + $0xd0] sm:$0xff] }
 0x54f   : > { %2641 = vst.msk [vmem:[%s3638_s21 + $0xa0] sm:$0xff] %vm1072_vm3, %v2087_v10  ;;  %v2656_v10 = vld [vmem:[%s3638_s21 + $0xd8] sm:$0xff] }
 0x550   : > { %2642 = vst.msk [vmem:[%s3638_s21 + $0xa8] sm:$0xff] %vm1072_vm3, %v2088_v60 }
 0x551   : > { %2643 = vst.msk [vmem:[%s3638_s21 + $0xb0] sm:$0xff] %vm1072_vm3, %v2089_v48  ;;  %v2658_v48 = vld [vmem:[%s3638_s21 + $0xe8] sm:$0xff] }
 0x552   : > { %2644 = vst.msk [vmem:[%s3638_s21 + $0xb8] sm:$0xff] %vm1072_vm3, %v2090_v20 }
 0x5ab   : > { %v2206_v32 = vpop.xlane.xlu1 %2205 }
 0x5ac   : > { %v2207_v24 = vrot.slane %v2206_v32, 4 }
 0x5ae   : > { %v2208_v51 = vadd.f32 %v2207_v24, %v2206_v32  ;;  %v2277_v32 = vmul.f32 %v2654_v42, %v3959_v43  ;;  %v2278_v24 = vmul.f32 %v2655_v4, %v3959_v43 }
 0x5b0   : > { %v2209_v29 = vrot.slane %v2208_v51, 2 }
 0x5b2   : > { %v2210_v27 = vadd.f32 %v2209_v29, %v2208_v51  ;;  %v2659_v51 = vld [vmem:[%s3638_s21 + $0xf0] sm:$0xff]  ;;  %v2279_v29 = vmul.f32 %v2656_v10, %v3959_v43 }
 0x5b4   : > { %v2211_v0 = vrot.slane %v2210_v27, 1 }
 0x5b6   : > { %v2212_v12 = vadd.f32 %v2211_v0, %v2210_v27  ;;  %v2660_v27 = vld [vmem:[%s3638_s21 + $0xf8] sm:$0xff]  ;;  %v2280_v0 = vmul.f32 %v2657_v1, %v3959_v43 }
 0x5b8   : > { %2724 = vpush %v2212_v12 }
 0x5e9   : > { %s2725_s12 = spop %2724 }
 0x5ea   : > { %v2214_v30 = vstv %s2725_s12 }
 0x5eb   : > { %2885 = vrcp.f32 %v2214_v30  ;;  %v2226_v37 = vand.u32 2147483648, %v2214_v30  ;;  %v2224_v16 = vand.u32 2147483647, %v2214_v30  ;;  %vm2220_vm7 = vweird.f32 %v2214_v30 }
 0x5ed   : > { %v2227_v19 = vor.u32 1.1754944e-38, %v2226_v37  ;;  %vm2225_vm9 = vcmp.eq.f32.partialorder %v2224_v16, 8.507059e+37  ;;  %v2282_v37 = vmul.f32 %v2659_v51, %v3959_v43  ;;  %v2283_v16 = vmul.f32 %v2660_v27, %v3959_v43 }
 0x5f1   : > { %v2886_v17 = vpop.eup %2885 }
 0x5f2   : > { %v2216_v38 = vmul.f32 %v2886_v17, %v2214_v30  ;;  %vm2221_vm4 = vweird.f32 %v2886_v17 }
 0x5f3   : > { %vm2222_vm8 = vmor %vm2220_vm7, %vm2221_vm4 }
 0x5f4   : > { %v2217_v11 = vsub.f32 1.0, %v2216_v38  ;;  %v2281_v38 = vmul.f32 %v2658_v48, %v3959_v43 }
 0x5f6   : > { %v2218_v18 = vmul.f32 %v2886_v17, %v2217_v11 }
 0x5f8   : > { %v2219_v46 = vadd.f32 %v2886_v17, %v2218_v18 }
 0x5fa   : > { %v2223_v35 = vsel %vm2222_vm8, %v2886_v17, %v2219_v46 }
 0x5fb   : > { %v2228_v39 = vsel %vm2225_vm9, %v2227_v19, %v2223_v35 }
 0x5fc   : > { %v2230_v50 = vmul.f32 %v4178_v41, %v2228_v39  ;;  %v2231_v34 = vmul.f32 %v4181_v13, %v2228_v39  ;;  %v2232_v36 = vmul.f32 %v4192_v26, %v2228_v39  ;;  %v2233_v14 = vmul.f32 %v4198_v44, %v2228_v39 }
 0x5fd   : > { %v2234_v59 = vmul.f32 %v4204_v21, %v2228_v39  ;;  %v2235_v28 = vmul.f32 %v4211_v6, %v2228_v39  ;;  %v2236_v26 = vmul.f32 %v4218_v22, %v2228_v39 }
 0x5fe   : > { %v2238_v3 = vmul.f32 %v4032_v40, %v2230_v50  ;;  %v2239_v56 = vmul.f32 %v4026_v53, %v2231_v34  ;;  %v2240_v63 = vmul.f32 %v4035_v52, %v2232_v36  ;;  %v2241_v31 = vmul.f32 %v4043_v58, %v2233_v14 }
 0x5ff   : > { %v2242_v44 = vmul.f32 %v4040_v2, %v2234_v59  ;;  %v2237_v53 = vmul.f32 %v4224_v9, %v2228_v39  ;;  %v2243_v52 = vmul.f32 %v4049_v49, %v2235_v28  ;;  %v2244_v58 = vmul.f32 %v4061_v55, %v2236_v26 }
 0x600   : > { %v2246_v41 = vsel %vm1072_vm3, %v2238_v3, 0.0  ;;  %v2247_v13 = vsel %vm1072_vm3, %v2239_v56, 0.0  ;;  %v2249_v21 = vsel %vm1072_vm3, %v2240_v63, 0.0  ;;  %v2251_v6 = vsel %vm1072_vm3, %v2241_v31, 0.0 }
 0x601   : > { %v2248_v25 = vadd.f32 %v2247_v13, %v2246_v41  ;;  %v2253_v47 = vsel %vm1072_vm3, %v2242_v44, 0.0  ;;  %v2245_v2 = vmul.f32 %v4058_v45, %v2237_v53  ;;  %v2255_v33 = vsel %vm1072_vm3, %v2243_v52, 0.0  ;;  %v2653_v45 = vld [vmem:[%s3638_s21 + $0xc0] sm:$0xff] }
 0x602   : > { %v2257_v49 = vsel %vm1072_vm3, %v2244_v58, 0.0  ;;  %v2276_v20 = vmul.f32 %v2653_v45, %v3959_v43 }
 0x603   : > { %v2250_v40 = vadd.f32 %v2249_v21, %v2248_v25  ;;  %v2259_v23 = vsel %vm1072_vm3, %v2245_v2, 0.0 }
 0x605   : > { %v2252_v5 = vadd.f32 %v2251_v6, %v2250_v40 }
 0x607   : > { %v2254_v22 = vadd.f32 %v2253_v47, %v2252_v5 }
 0x609   : > { %v2256_v9 = vadd.f32 %v2255_v33, %v2254_v22 }
 0x60b   : > { %v2258_v7 = vadd.f32 %v2257_v49, %v2256_v9 }
 0x60d   : > { %v2260_v54 = vadd.f32 %v2259_v23, %v2258_v7 }
 0x60f   : > { %v2261_v55 = vrot.slane %v2260_v54, 4 }
 0x611   : > { %v2262_v57 = vadd.f32 %v2261_v55, %v2260_v54 }
 0x613   : > { %v2263_v8 = vrot.slane %v2262_v57, 2 }
 0x615   : > { %v2264_v62 = vadd.f32 %v2263_v8, %v2262_v57 }
 0x617   : > { %v2265_v61 = vrot.slane %v2264_v62, 1 }
 0x619   : > { %v2266_v15 = vadd.f32 %v2265_v61, %v2264_v62 }
 0x61b   : > { %v2267_v60 = vmul.f32 0.1, %v2266_v15 }
 0x61d   : > { %v2284_v12 = vadd.f32 %v2276_v20, %v2267_v60  ;;  %v2285_v30 = vadd.f32 %v2277_v32, %v2267_v60  ;;  %v2286_v17 = vadd.f32 %v2278_v24, %v2267_v60  ;;  %v2287_v11 = vadd.f32 %v2279_v29, %v2267_v60 }
 0x61e   : > { %v2288_v18 = vadd.f32 %v2280_v0, %v2267_v60  ;;  %v2289_v46 = vadd.f32 %v2281_v38, %v2267_v60  ;;  %v2290_v19 = vadd.f32 %v2282_v37, %v2267_v60  ;;  %v2291_v35 = vadd.f32 %v2283_v16, %v2267_v60 }
 0x61f   : > { %2661 = vst.msk [vmem:[%s3638_s21 + $0xc0] sm:$0xff] %vm1072_vm3, %v2284_v12 }
 0x620   : > { %2662 = vst.msk [vmem:[%s3638_s21 + $0xc8] sm:$0xff] %vm1072_vm3, %v2285_v30 }
 0x621   : > { %2663 = vst.msk [vmem:[%s3638_s21 + $0xd0] sm:$0xff] %vm1072_vm3, %v2286_v17 }
 0x622   : > { %2664 = vst.msk [vmem:[%s3638_s21 + $0xd8] sm:$0xff] %vm1072_vm3, %v2287_v11 }
 0x623   : > { %2665 = vst.msk [vmem:[%s3638_s21 + $0xe0] sm:$0xff] %vm1072_vm3, %v2288_v18 }
 0x624   : > { %2666 = vst.msk [vmem:[%s3638_s21 + $0xe8] sm:$0xff] %vm1072_vm3, %v2289_v46 }
 0x625   : > { %2667 = vst.msk [vmem:[%s3638_s21 + $0xf0] sm:$0xff] %vm1072_vm3, %v2290_v19 }
 0x626   : > { %2668 = vst.msk [vmem:[%s3638_s21 + $0xf8] sm:$0xff] %vm1072_vm3, %v2291_v35 }
 0x627 PF: > { %s16_s18 = sadd.s32 1, %s2930_s18  }
 0x628   : > { %p13_p1 = scmp.ge.s32.totalorder %s16_s18, 4  }
 0x62a   :  { %15 = sbr.rel (!%p13_p1) target bundleno = 1 (0x1), region = 94 }
 0x62f   :  { %2324 = vsyncpa [#allocation5], 1 }
 0x630   :  { %2326 = vsyncpa [#allocation5 + $0x1], 1 }

</bundles_post_ra>
